<compile_context>
chip_gen: v6e
topology: v6e:2x2x1
jax: 0.10.0
libtpu: 0.0.40
codegen_flags: <defaults>
</compile_context>

<pallas_src>
import math

import jax
import jax.numpy as jnp
from jax.experimental import pallas as pl
from jax.experimental.pallas import tpu as pltpu

_GELU_C = math.sqrt(2.0 / math.pi)
_MIB = 1024 * 1024


def _gelu_new(x):
    # "gelu_new" / gelu_pytorch_tanh: 0.5*x*(1+tanh(sqrt(2/pi)*(x+0.044715*x^3)))
    return 0.5 * x * (1.0 + jnp.tanh(_GELU_C * (x + 0.044715 * x * x * x)))


def _round_up(x, m):
    return ((x + m - 1) // m) * m


def _vmem_budget_bytes():
    """Generation-aware VMEM limit: ~48 MiB on v7x (64 MiB physical/TC), ~96 MiB
    on v5e/v6e (128 MiB), leaving headroom for compiler-internal scratch."""
    cap = None
    try:
        cap = getattr(pltpu.get_tpu_info(), "vmem_capacity_bytes", None)
    except Exception:
        cap = None
    if not cap:
        cap = 64 * _MIB  # conservative (v7x-sized) fallback
    budget = min(cap - max(16 * _MIB, cap // 4), 100 * _MIB)
    return int(max(budget, 32 * _MIB))


def _mlp_vmem_footprint(tm, tf, H, Hm):
    """Rough VMEM bytes for one tile plan (bf16 weights/acts, f32 out & acc).

    Pallas allocates two pipeline buffers per BlockSpec operand by default;
    grid-invariant blocks are still only DMA'd from HBM once."""
    weights = 2 * (H * 2 * tf + tf * H) * 2          # fused wi chunk + wo chunk (bf16)
    x_io = 2 * tm * H * 2 + 2 * tm * H * 4           # bf16 x tile + f32 out tile
    acc = 0 if tf == Hm else tm * H * 4               # f32 accumulator (chunked only)
    interm = tm * (2 * tf) * 4 * 2 + tm * tf * 2      # f32 matmul result + GELU temps + bf16 h
    return weights + x_io + acc + interm


def _plan_mlp_tiles(H, Hm, budget, tm_cap=512):
    """Pick (row-tile cap, d_ff chunk) for the VMEM budget.

    Preference: full d_ff residency (weights leave HBM once, MXU-bound); otherwise
    the largest 256-aligned chunk that fits, keeping the row tile large so the
    weight-streaming regime stays high arithmetic intensity."""
    for tm in sorted({tm_cap, 256, 128}, reverse=True):
        if tm <= tm_cap and _mlp_vmem_footprint(tm, Hm, H, Hm) <= budget:
            return tm, Hm
    align = 256 if Hm % 256 == 0 else 128             # v6e/v7x MXU is 256-wide
    if Hm % align:
        return tm_cap, Hm
    tf = align
    for cand in range(Hm - align, align - 1, -align):
        if Hm % cand == 0 and _mlp_vmem_footprint(tm_cap, cand, H, Hm) <= budget:
            tf = cand
            break
    return tm_cap, tf


def _make_resident_kernel(tf):
    """k_tiles == 1: weights fully VMEM-resident, no accumulator scratch."""
    def kernel(x_ref, wi01_ref, wo_ref, o_ref):
        # One fused MXU matmul computes both the gate and the linear branch.
        gl = jnp.dot(x_ref[...], wi01_ref[...], preferred_element_type=jnp.float32)
        h = (_gelu_new(gl[:, :tf]) * gl[:, tf:]).astype(jnp.bfloat16)
        o_ref[...] = jnp.dot(h, wo_ref[...],
                             preferred_element_type=jnp.float32).astype(o_ref.dtype)
    return kernel


def _make_chunked_kernel(tf):
    """k_tiles > 1: stream d_ff chunks, f32 accumulator over the k axis."""
    def kernel(x_ref, wi01_ref, wo_ref, o_ref, acc_ref):
        k = pl.program_id(1)
        gl = jnp.dot(x_ref[...], wi01_ref[...], preferred_element_type=jnp.float32)
        h = (_gelu_new(gl[:, :tf]) * gl[:, tf:]).astype(jnp.bfloat16)
        part = jnp.dot(h, wo_ref[...], preferred_element_type=jnp.float32)

        @pl.when(k == 0)
        def _():                       # first chunk: write (no zero-init + RMW)
            acc_ref[...] = part

        @pl.when(k != 0)
        def _():
            acc_ref[...] += part

        @pl.when(k == pl.num_programs(1) - 1)
        def _():
            o_ref[...] = acc_ref[...].astype(o_ref.dtype)
    return kernel


def prepare_pix2struct_mlp_weights(wi0, wi1, wo, *, tm_cap=512, tf=None,
                                   weight_dtype=jnp.bfloat16):
    """Cast + fuse the MLP weights ONCE (do not redo this per forward call).

    wi0, wi1: (H, d_ff)  — PyTorch wi_0.weight / wi_1.weight transposed.
    wo:       (d_ff, H)  — PyTorch wo.weight transposed.
    """
    H, Hm = wi0.shape
    assert wi1.shape == (H, Hm) and wo.shape == (Hm, H)

    budget = _vmem_budget_bytes()
    plan_tm, plan_tf = _plan_mlp_tiles(H, Hm, budget, tm_cap=tm_cap)
    if tf is not None:                                 # explicit override (tuning/tests)
        plan_tf = tf
    assert Hm % plan_tf == 0 and (plan_tf == Hm or plan_tf % 128 == 0)
    k_tiles = Hm // plan_tf

    # Chunk-interleaved fused gate/linear weight: [wi0_k | wi1_k] per d_ff chunk,
    # so a single BlockSpec / DMA stream / MXU matmul feeds both branches.
    wi0c = wi0.astype(weight_dtype).reshape(H, k_tiles, plan_tf)
    wi1c = wi1.astype(weight_dtype).reshape(H, k_tiles, plan_tf)
    wi01 = jnp.concatenate([wi0c, wi1c], axis=2).reshape(H, 2 * Hm)

    return dict(wi01=wi01, wo=wo.astype(weight_dtype), tf=int(plan_tf),
                tm_cap=int(plan_tm), hidden=int(H), d_ff=int(Hm),
                vmem_limit=int(budget))


def pix2struct_vision_mlp(hidden_states, params):
    """hidden_states: (B, S, H); params from prepare_pix2struct_mlp_weights.
    Returns (B, S, H) in hidden_states.dtype."""
    H, Hm = params["hidden"], params["d_ff"]
    tf, tm_cap = params["tf"], params["tm_cap"]
    wi01, wo = params["wi01"], params["wo"]

    B, S, Hx = hidden_states.shape
    assert Hx == H
    M = B * S

    # bf16 activations: half the x-tile DMA bytes / VMEM, full-rate MXU.
    x2d = hidden_states.reshape(M, H).astype(jnp.bfloat16)

    # Balanced row tile: never more than tm_cap, minimal padding for ragged M.
    m_tiles = -(-M // tm_cap)
    tm = _round_up(-(-M // m_tiles), 8)
    m_pad = m_tiles * tm
    if m_pad != M:
        x2d = jnp.pad(x2d, ((0, m_pad - M), (0, 0)))

    k_tiles = Hm // tf

    if k_tiles == 1:
        # Weights fully VMEM-resident: DMA'd once, reused by every row tile.
        grid = (m_tiles,)
        in_specs = [
            pl.BlockSpec((tm, H), lambda i: (i, 0)),
            pl.BlockSpec((H, 2 * Hm), lambda i: (0, 0)),
            pl.BlockSpec((Hm, H), lambda i: (0, 0)),
        ]
        out_specs = pl.BlockSpec((tm, H), lambda i: (i, 0))
        scratch = []
        kernel = _make_resident_kernel(tf)
        dims = ("parallel",)
    else:
        # Streamed d_ff chunks (large models / small-VMEM v7x): k is the inner,
        # "arbitrary" reduction axis; the f32 accumulator lives in VMEM scratch.
        grid = (m_tiles, k_tiles)
        in_specs = [
            pl.BlockSpec((tm, H), lambda i, k: (i, 0)),
            pl.BlockSpec((H, 2 * tf), lambda i, k: (0, k)),
            pl.BlockSpec((tf, H), lambda i, k: (k, 0)),
        ]
        out_specs = pl.BlockSpec((tm, H), lambda i, k: (i, 0))
        scratch = [pltpu.VMEM((tm, H), jnp.float32)]
        kernel = _make_chunked_kernel(tf)
        dims = ("parallel", "arbitrary")

    weight_bytes = (wi01.size * wi01.dtype.itemsize + wo.size * wo.dtype.itemsize)
    weight_reads = 1 if k_tiles == 1 else m_tiles
    cost = pl.CostEstimate(
        flops=6 * m_pad * H * Hm,                      # fused (gate+linear) matmul + wo matmul
        transcendentals=m_pad * Hm,                    # tanh in gelu_new
        bytes_accessed=(x2d.size * x2d.dtype.itemsize
                        + m_pad * H * hidden_states.dtype.itemsize
                        + weight_reads * weight_bytes),
    )

    out2d = pl.pallas_call(
        kernel,
        out_shape=jax.ShapeDtypeStruct((m_pad, H), hidden_states.dtype),
        grid_spec=pltpu.PrefetchScalarGridSpec(
            num_scalar_prefetch=0,
            grid=grid,
            in_specs=in_specs,
            out_specs=out_specs,
            scratch_shapes=scratch,
        ),
        compiler_params=pltpu.CompilerParams(
            dimension_semantics=dims,
            vmem_limit_bytes=params["vmem_limit"],
        ),
        cost_estimate=cost,
    )(x2d, wi01, wo)

    if m_pad != M:
        out2d = out2d[:M]
    return out2d.reshape(B, S, H)


def _reference(x, wi0, wi1, wo):
    """Mirrors the kernel numerics (bf16 MXU operands, f32 accumulation)."""
    B, S, H = x.shape
    xb = x.reshape(B * S, H).astype(jnp.bfloat16)
    g = jnp.dot(xb, wi0.astype(jnp.bfloat16), preferred_element_type=jnp.float32)
    lin = jnp.dot(xb, wi1.astype(jnp.bfloat16), preferred_element_type=jnp.float32)
    h = (_gelu_new(g) * lin).astype(jnp.bfloat16)
    out = jnp.dot(h, wo.astype(jnp.bfloat16), preferred_element_type=jnp.float32)
    return out.reshape(B, S, H).astype(x.dtype)


def _reference_f32(x, wi0, wi1, wo):
    """Full-f32 reference matching the PyTorch module (eval mode)."""
    g = _gelu_new(jnp.einsum("bsh,hf->bsf", x, wi0))
    lin = jnp.einsum("bsh,hf->bsf", x, wi1)
    return jnp.einsum("bsf,fh->bsh", g * lin, wo)


if __name__ == "__main__":
    # Small Pix2Struct-like config: hidden=128 -> d_ff=512. B*S = 260 tokens
    # exercises the ragged row tile (pads 260 -> 264, not 512).
    B, S, H = 2, 130, 128
    Hm = 4 * H

    key = jax.random.PRNGKey(0)
    kx, k0, k1, k2 = jax.random.split(key, 4)
    x = jax.random.normal(kx, (B, S, H), dtype=jnp.float32)
    # Weights stored as (in, out) == PyTorch nn.Linear weight transposed.
    wi0 = jax.random.normal(k0, (H, Hm), dtype=jnp.float32) * 0.02
    wi1 = jax.random.normal(k1, (H, Hm), dtype=jnp.float32) * 0.02
    wo = jax.random.normal(k2, (Hm, H), dtype=jnp.float32) * 0.02

    ref = _reference(x, wi0, wi1, wo)
    ref_f32 = _reference_f32(x, wi0, wi1, wo)

    # 1) Default plan: weights fully VMEM-resident, 1-D grid, fused matmul.
    params = prepare_pix2struct_mlp_weights(wi0, wi1, wo)
    out = jax.block_until_ready(pix2struct_vision_mlp(x, params))
    assert out.shape == (B, S, H)
    assert jnp.allclose(out, ref, atol=1e-3, rtol=1e-3), "resident path mismatch"
    # bf16 MXU operands are an intentional precision change vs PyTorch f32;
    # check the error against the full-f32 reference stays small.
    assert jnp.allclose(out, ref_f32, atol=5e-2, rtol=5e-2), "f32-reference mismatch"

    # 2) Forced d_ff chunking (exercises the streamed / accumulator fallback path
    #    that large models on small-VMEM generations would take).
    params_c = prepare_pix2struct_mlp_weights(wi0, wi1, wo, tf=256)
    out_c = jax.block_until_ready(pix2struct_vision_mlp(x, params_c))
    assert jnp.allclose(out_c, ref, atol=1e-3, rtol=1e-3), "chunked path mismatch"

    print("KERNEL_OK")
</pallas_src>

<mosaic_0001>
module attributes {stable_mosaic.version = 11 : i64} {
  func.func @kernel(%arg0: i32, %arg1: memref<264x128xbf16, #tpu.memory_space<vmem>>, %arg2: memref<128x1024xbf16, #tpu.memory_space<vmem>>, %arg3: memref<512x128xbf16, #tpu.memory_space<vmem>>, %arg4: memref<264x128xf32, #tpu.memory_space<vmem>>) attributes {dimension_semantics = [#tpu.dimension_semantics<parallel>], iteration_bounds = array<i64: 1>, scalar_prefetch = 0 : i64, scratch_operands = 0 : i64, tpu.core_type = #tpu.core_type<tc>, window_params = [{transform_indices = @transform_0, window_bounds = array<i64: 264, 128>}, {pipeline_mode = #tpu.pipeline_mode<synchronous>, transform_indices = @transform_1, window_bounds = array<i64: 128, 1024>}, {pipeline_mode = #tpu.pipeline_mode<synchronous>, transform_indices = @transform_2, window_bounds = array<i64: 512, 128>}, {transform_indices = @transform_3, window_bounds = array<i64: 264, 128>}]} {
    %c0 = arith.constant 0 : index
    %c0_0 = arith.constant 0 : index
    %0 = vector.load %arg1[%c0, %c0_0] : memref<264x128xbf16, #tpu.memory_space<vmem>>, vector<264x128xbf16>
    %c0_1 = arith.constant 0 : index
    %c0_2 = arith.constant 0 : index
    %1 = vector.load %arg2[%c0_1, %c0_2] : memref<128x1024xbf16, #tpu.memory_space<vmem>>, vector<128x1024xbf16>
    %cst = arith.constant dense<0.000000e+00> : vector<264x1024xf32>
    %2 = tpu.matmul %0, %1, %cst {dimension_numbers = #tpu.dot_dimension_numbers<[1], [0], [0], [1], [0, 0, 1, 1], [], []>} : vector<264x128xbf16>, vector<128x1024xbf16>, vector<264x1024xf32> -> vector<264x1024xf32>
    %3 = vector.extract_strided_slice %2 {offsets = [0, 0], sizes = [264, 512], strides = [1, 1]} : vector<264x1024xf32> to vector<264x512xf32>
    %cst_3 = arith.constant 5.000000e-01 : f32
    %4 = vector.broadcast %cst_3 : f32 to vector<264x512xf32>
    %5 = arith.mulf %4, %3 : vector<264x512xf32>
    %cst_4 = arith.constant 4.471500e-02 : f32
    %6 = vector.broadcast %cst_4 : f32 to vector<264x512xf32>
    %7 = arith.mulf %6, %3 : vector<264x512xf32>
    %8 = arith.mulf %7, %3 : vector<264x512xf32>
    %9 = arith.mulf %8, %3 : vector<264x512xf32>
    %10 = arith.addf %3, %9 : vector<264x512xf32>
    %cst_5 = arith.constant 0.797884583 : f32
    %11 = vector.broadcast %cst_5 : f32 to vector<264x512xf32>
    %12 = arith.mulf %11, %10 : vector<264x512xf32>
    %13 = math.tanh %12 : vector<264x512xf32>
    %cst_6 = arith.constant 1.000000e+00 : f32
    %14 = vector.broadcast %cst_6 : f32 to vector<264x512xf32>
    %15 = arith.addf %14, %13 : vector<264x512xf32>
    %16 = arith.mulf %5, %15 : vector<264x512xf32>
    %17 = vector.extract_strided_slice %2 {offsets = [0, 512], sizes = [264, 512], strides = [1, 1]} : vector<264x1024xf32> to vector<264x512xf32>
    %18 = arith.mulf %16, %17 : vector<264x512xf32>
    %19 = arith.truncf %18 : vector<264x512xf32> to vector<264x512xbf16>
    %c0_7 = arith.constant 0 : index
    %c0_8 = arith.constant 0 : index
    %20 = vector.load %arg3[%c0_7, %c0_8] : memref<512x128xbf16, #tpu.memory_space<vmem>>, vector<512x128xbf16>
    %cst_9 = arith.constant dense<0.000000e+00> : vector<264x128xf32>
    %21 = tpu.matmul %19, %20, %cst_9 {dimension_numbers = #tpu.dot_dimension_numbers<[1], [0], [0], [1], [0, 0, 1, 1], [], []>} : vector<264x512xbf16>, vector<512x128xbf16>, vector<264x128xf32> -> vector<264x128xf32>
    %c0_10 = arith.constant 0 : index
    %c0_11 = arith.constant 0 : index
    %22 = vector.load %arg4[%c0_10, %c0_11] : memref<264x128xf32, #tpu.memory_space<vmem>>, vector<264x128xf32>
    tpu.vector_store %arg4[%c0_10, %c0_11], %21 {strides = array<i32>} : memref<264x128xf32, #tpu.memory_space<vmem>>, vector<264x128xf32>,
    return
  }
  func.func @transform_0(%arg0: i32) -> (i32, i32) {
    %c0_i32 = arith.constant 0 : i32
    %c0_i32_0 = arith.constant 0 : i32
    return %arg0, %c0_i32 : i32, i32
  }
  func.func @transform_1(%arg0: i32) -> (i32, i32) {
    %c0_i32 = arith.constant 0 : i32
    %c0_i32_0 = arith.constant 0 : i32
    %c0_i32_1 = arith.constant 0 : i32
    return %c0_i32, %c0_i32_0 : i32, i32
  }
  func.func @transform_2(%arg0: i32) -> (i32, i32) {
    %c0_i32 = arith.constant 0 : i32
    %c0_i32_0 = arith.constant 0 : i32
    %c0_i32_1 = arith.constant 0 : i32
    return %c0_i32, %c0_i32_0 : i32, i32
  }
  func.func @transform_3(%arg0: i32) -> (i32, i32) {
    %c0_i32 = arith.constant 0 : i32
    %c0_i32_0 = arith.constant 0 : i32
    return %arg0, %c0_i32 : i32, i32
  }
}

</mosaic_0001>

<bundles_post_ra>
// kernel: tpu_custom_call.1
= control target key start
LH: loop header
LB: loop body
LE: loop exit
PB: predicated region body
PF: predicated region fallthrough
CT: control target
= control target key end

     0   :  { %8 = vsyncpa [#allocation3], 0  ;;  %s6174_s0 = inlined_call_operand.hbm [shape: bf16[264,128], index: 0, kind: input, shape index: {}]   ;;  %s6175_s1 = inlined_call_operand.hbm [shape: bf16[128,1024], index: 1, kind: input, shape index: {}]   ;;  %s6176_s2 = inlined_call_operand.hbm [shape: bf16[512,128], index: 2, kind: input, shape index: {}]   ;;  %s6177_s3 = inlined_call_operand.hbm [shape: f32[264,128], index: 3, kind: output, shape index: {}]  }
   0x1   :  { %9 = vsyncpa [#allocation6], 0 }
   0x2   :  { %10 = vsyncpa [#allocation4], 0  ;;  %s3932_s12 = smov [#allocation5]  }
   0x3   :  { %s28_s13 = sshll.u32 %s3932_s12, 4  ;;  %s29_s13 = int_to_ptr.vmem [resolvable:$true] %s28_s13 }
   0x4   :  { %s3854_s14 = scalar_lea.vmem %s29_s13, 8192  ;;  %p3859_p1 = scmp.lt.s32.totalorder %s29_s13, %s29_s13 }
   0x5   :  { %p3855_p0 = scmp.ne.s32.totalorder %s29_s13, %s3854_s14  ;;  %p3860_p2 = scmp.lt.s32.totalorder %s3854_s14, %s3854_s14 }
   0x7   :  { %p3861_p3 = por %p3860_p2, %p3859_p1 }
   0x9   :  { %p3862_p4 = pnand %p3861_p3, %p3855_p0 }
   0xb   :  { %3865 = shalt.err (!%p3862_p4)
}
   0xc   :  { %s3933_s15 = smov 512   ;;  %s3934_s16 = smov 32  }
   0xd   :  { %34 = dma.hbm_to_vmem [thread:$0]  %s6175_s1, 8192, %s29_s13, [#allocation6], %s3933_s15, %s3933_s15, %s3934_s16  }
   0xe   :  { %s3935_s19 = smov [#allocation2]  }
   0xf   :  { %s16_s20 = sshll.u32 %s3935_s19, 4  ;;  %s17_s20 = int_to_ptr.vmem [resolvable:$true] %s16_s20 }
  0x10   :  { %s3874_s21 = scalar_lea.vmem %s17_s20, 2112  ;;  %p3879_p6 = scmp.lt.s32.totalorder %s17_s20, %s17_s20 }
  0x11   :  { %p3875_p5 = scmp.ne.s32.totalorder %s17_s20, %s3874_s21  ;;  %p3880_p7 = scmp.lt.s32.totalorder %s3874_s21, %s3874_s21 }
  0x13   :  { %p3881_p8 = por %p3880_p7, %p3879_p6 }
  0x15   :  { %p3882_p9 = pnand %p3881_p8, %p3875_p5 }
  0x17   :  { %3885 = shalt.err (!%p3882_p9)
}
  0x18   :  { %s3936_s22 = smov 64   ;;  %s3937_s23 = smov 4  }
  0x19   :  { %22 = dma.hbm_to_vmem [thread:$0]  %s6174_s0, 2112, %s17_s20, [#allocation3], %s3936_s22, %s3936_s22, %s3937_s23  }
  0x1a   :  { %s3938_s26 = smov [#allocation7]  }
  0x1b   :  { %s40_s27 = sshll.u32 %s3938_s26, 4  ;;  %s41_s27 = int_to_ptr.vmem [resolvable:$true] %s40_s27 }
  0x1c   :  { %s3894_s1 = scalar_lea.vmem %s41_s27, 4096  ;;  %p3899_p11 = scmp.lt.s32.totalorder %s41_s27, %s41_s27 }
  0x1d   :  { %p3895_p10 = scmp.ne.s32.totalorder %s41_s27, %s3894_s1  ;;  %p3900_p12 = scmp.lt.s32.totalorder %s3894_s1, %s3894_s1 }
  0x1f   :  { %p3901_p13 = por %p3900_p12, %p3899_p11 }
  0x21   :  { %p3902_p0 = pnand %p3901_p13, %p3895_p10 }
  0x23   :  { %3905 = shalt.err (!%p3902_p0)
}
  0x24   :  { %46 = dma.hbm_to_vmem [thread:$0]  %s6176_s2, 4096, %s41_s27, [#allocation6], %s3936_s22, %s3936_s22, %s3937_s23  }
  0x25   :  { %3926 = dma.done.wait [#allocation3], 2112  }
  0x26   :  { %3927 = vsyncadd [#allocation3], 4294965184 }
  0x27   :  { %3928 = dma.done.wait [#allocation6], 12288  }
  0x28   :  { %3929 = vsyncadd [#allocation6], 4294955008  ;;  %v6178_v0 = vmov 0   ;;  %v146_v1 = vld [vmem:[#allocation5 + $0x1c0] sm:$0xff]  ;;  %v147_v3 = vld [vmem:[#allocation5 + $0x1c8] sm:$0xff]  ;;  %s3940_s0 = smov [#allocation8]  }
  0x29   :  { %606 = vmatprep.mubr.bf16.mxu0 %v6178_v0  ;;  %807 = vmatprep.mubr.bf16.mxu1 %v6178_v0  ;;  %v150_v2 = vld [vmem:[#allocation5 + $0x1e0] sm:$0xff]  ;;  %v151_v5 = vld [vmem:[#allocation5 + $0x1e8] sm:$0xff]  ;;  %v148_v62 = vld [vmem:[#allocation5 + $0x1d0] sm:$0xff]  ;;  %s3396_s2 = sshll.u32 %s3940_s0, 4  ;;  %s3397_s2 = int_to_ptr.vmem [resolvable:$true] %s3396_s2 }
  0x2a   :  { %v3483_v4 = vcombine.high %v146_v1, %v150_v2  ;;  %v3482_v6 = vcombine.low %v146_v1, %v150_v2  ;;  %v138_v7 = vld [vmem:[#allocation5 + $0x180] sm:$0xff]  ;;  %v3485_v9 = vcombine.high %v147_v3, %v151_v5  ;;  %v3484_v10 = vcombine.low %v147_v3, %v151_v5  ;;  %v139_v12 = vld [vmem:[#allocation5 + $0x188] sm:$0xff]  ;;  %v152_v63 = vld [vmem:[#allocation5 + $0x1f0] sm:$0xff]  ;;  %s3906_s30 = scalar_lea.vmem %s3397_s2, 4224  ;;  %p3911_p2 = scmp.lt.s32.totalorder %s3397_s2, %s3397_s2 }
  0x2b   :  { %v142_v8 = vld [vmem:[#allocation5 + $0x1a0] sm:$0xff]  ;;  %v143_v13 = vld [vmem:[#allocation5 + $0x1a8] sm:$0xff]  ;;  %v149_v2 = vld [vmem:[#allocation5 + $0x1d8] sm:$0xff]  ;;  %p3907_p1 = scmp.ne.s32.totalorder %s3397_s2, %s3906_s30  ;;  %p3912_p3 = scmp.lt.s32.totalorder %s3906_s30, %s3906_s30 }
  0x2c   :  { %v3475_v11 = vcombine.high %v138_v7, %v142_v8  ;;  %v130_v14 = vld [vmem:[#allocation5 + $0x140] sm:$0xff]  ;;  %574 = vmatprep.subr.bf16.mxu0 %v3483_v4  ;;  %v3477_v15 = vcombine.high %v139_v12, %v143_v13  ;;  %v131_v17 = vld [vmem:[#allocation5 + $0x148] sm:$0xff]  ;;  %775 = vmatprep.subr.bf16.mxu1 %v3485_v9  ;;  %v3474_v19 = vcombine.low %v138_v7, %v142_v8  ;;  %v153_v3 = vld [vmem:[#allocation5 + $0x1f8] sm:$0xff] }
  0x2d   :  { %v134_v16 = vld [vmem:[#allocation5 + $0x160] sm:$0xff]  ;;  %v135_v18 = vld [vmem:[#allocation5 + $0x168] sm:$0xff]  ;;  %575 = vmatpush1.bf16.msra.mxu0 %v3482_v6  ;;  %776 = vmatpush1.bf16.msra.mxu1 %v3484_v10  ;;  %v3476_v20 = vcombine.low %v139_v12, %v143_v13  ;;  %v3487_v6 = vcombine.high %v148_v62, %v152_v63  ;;  %v3489_v8 = vcombine.high %v149_v2, %v153_v3  ;;  %v140_v9 = vld [vmem:[#allocation5 + $0x190] sm:$0xff]  ;;  %p3913_p4 = por %p3912_p3, %p3911_p2 }
  0x2e   :  { %576 = vmatprep.subr.bf16.mxu0 %v3475_v11  ;;  %v3467_v21 = vcombine.high %v130_v14, %v134_v16  ;;  %777 = vmatprep.subr.bf16.mxu1 %v3477_v15  ;;  %v3469_v22 = vcombine.high %v131_v17, %v135_v18  ;;  %v122_v23 = vld [vmem:[#allocation5 + $0x100] sm:$0xff]  ;;  %v123_v25 = vld [vmem:[#allocation5 + $0x108] sm:$0xff]  ;;  %v3466_v27 = vcombine.low %v130_v14, %v134_v16  ;;  %v144_v10 = vld [vmem:[#allocation5 + $0x1b0] sm:$0xff] }
  0x2f   :  { %v126_v24 = vld [vmem:[#allocation5 + $0x120] sm:$0xff]  ;;  %v127_v26 = vld [vmem:[#allocation5 + $0x128] sm:$0xff]  ;;  %v3468_v28 = vcombine.low %v131_v17, %v135_v18  ;;  %v3486_v11 = vcombine.low %v148_v62, %v152_v63  ;;  %v141_v12 = vld [vmem:[#allocation5 + $0x198] sm:$0xff]  ;;  %v3488_v14 = vcombine.low %v149_v2, %v153_v3  ;;  %v3479_v16 = vcombine.high %v140_v9, %v144_v10  ;;  %p3914_p5 = pnand %p3913_p4, %p3907_p1 }
  0x30   :  { %v3459_v29 = vcombine.high %v122_v23, %v126_v24  ;;  %v3461_v30 = vcombine.high %v123_v25, %v127_v26  ;;  %v114_v31 = vld [vmem:[#allocation5 + $0xc0] sm:$0xff]  ;;  %v115_v33 = vld [vmem:[#allocation5 + $0xc8] sm:$0xff]  ;;  %v3458_v35 = vcombine.low %v122_v23, %v126_v24  ;;  %v3460_v36 = vcombine.low %v123_v25, %v127_v26  ;;  %v145_v13 = vld [vmem:[#allocation5 + $0x1b8] sm:$0xff] }
  0x31   :  { %577 = vmatpush1.bf16.msra.mxu0 %v3474_v19  ;;  %778 = vmatpush1.bf16.msra.mxu1 %v3476_v20  ;;  %v118_v32 = vld [vmem:[#allocation5 + $0xe0] sm:$0xff]  ;;  %v119_v34 = vld [vmem:[#allocation5 + $0xe8] sm:$0xff]  ;;  %v132_v15 = vld [vmem:[#allocation5 + $0x150] sm:$0xff]  ;;  %v3481_v18 = vcombine.high %v141_v12, %v145_v13  ;;  %v3480_v23 = vcombine.low %v141_v12, %v145_v13 }
  0x32   :  { %578 = vmatprep.subr.bf16.mxu0 %v3467_v21  ;;  %779 = vmatprep.subr.bf16.mxu1 %v3469_v22  ;;  %v3451_v37 = vcombine.high %v114_v31, %v118_v32  ;;  %v106_v38 = vld [vmem:[#allocation5 + $0x80] sm:$0xff]  ;;  %v3453_v39 = vcombine.high %v115_v33, %v119_v34  ;;  %v107_v41 = vld [vmem:[#allocation5 + $0x88] sm:$0xff]  ;;  %v3450_v43 = vcombine.low %v114_v31, %v118_v32  ;;  %v136_v17 = vld [vmem:[#allocation5 + $0x170] sm:$0xff] }
  0x33   :  { %v110_v40 = vld [vmem:[#allocation5 + $0xa0] sm:$0xff]  ;;  %v111_v42 = vld [vmem:[#allocation5 + $0xa8] sm:$0xff]  ;;  %v3452_v44 = vcombine.low %v115_v33, %v119_v34  ;;  %v133_v19 = vld [vmem:[#allocation5 + $0x158] sm:$0xff]  ;;  %v3478_v21 = vcombine.low %v140_v9, %v144_v10  ;;  %v3471_v24 = vcombine.high %v132_v15, %v136_v17 }
  0x34   :  { %v3443_v45 = vcombine.high %v106_v38, %v110_v40  ;;  %v3445_v46 = vcombine.high %v107_v41, %v111_v42  ;;  %v98_v47 = vld [vmem:[#allocation5 + $0x40] sm:$0xff]  ;;  %v99_v49 = vld [vmem:[#allocation5 + $0x48] sm:$0xff]  ;;  %v3442_v51 = vcombine.low %v106_v38, %v110_v40  ;;  %v3444_v52 = vcombine.low %v107_v41, %v111_v42  ;;  %v137_v20 = vld [vmem:[#allocation5 + $0x178] sm:$0xff] }
  0x35   :  { %579 = vmatpush1.bf16.msra.mxu0 %v3466_v27  ;;  %780 = vmatpush1.bf16.msra.mxu1 %v3468_v28  ;;  %v102_v48 = vld [vmem:[#allocation5 + $0x60] sm:$0xff]  ;;  %v103_v50 = vld [vmem:[#allocation5 + $0x68] sm:$0xff]  ;;  %v124_v25 = vld [vmem:[#allocation5 + $0x110] sm:$0xff]  ;;  %v3473_v27 = vcombine.high %v133_v19, %v137_v20  ;;  %v3472_v33 = vcombine.low %v133_v19, %v137_v20 }
  0x36   :  { %580 = vmatprep.subr.bf16.mxu0 %v3459_v29  ;;  %781 = vmatprep.subr.bf16.mxu1 %v3461_v30  ;;  %v3435_v53 = vcombine.high %v98_v47, %v102_v48  ;;  %v3437_v54 = vcombine.high %v99_v49, %v103_v50  ;;  %v90_v55 = vld [vmem:[#allocation5] sm:$0xff]  ;;  %v91_v57 = vld [vmem:[#allocation5 + $0x8] sm:$0xff]  ;;  %v3434_v59 = vcombine.low %v98_v47, %v102_v48  ;;  %v128_v26 = vld [vmem:[#allocation5 + $0x130] sm:$0xff] }
  0x37   :  { %v94_v56 = vld [vmem:[#allocation5 + $0x20] sm:$0xff]  ;;  %v95_v58 = vld [vmem:[#allocation5 + $0x28] sm:$0xff]  ;;  %v3436_v60 = vcombine.low %v99_v49, %v103_v50  ;;  %v125_v28 = vld [vmem:[#allocation5 + $0x118] sm:$0xff]  ;;  %v3470_v30 = vcombine.low %v132_v15, %v136_v17  ;;  %v3463_v34 = vcombine.high %v124_v25, %v128_v26 }
  0x38   :  { %v3427_v61 = vcombine.high %v90_v55, %v94_v56  ;;  %v3429_v1 = vcombine.high %v91_v57, %v95_v58  ;;  %v3426_v4 = vcombine.low %v90_v55, %v94_v56  ;;  %v3428_v5 = vcombine.low %v91_v57, %v95_v58  ;;  %v3974_v7 = vld [vmem:[#allocation2] sm:$0xff]   ;;  %v3979_v22 = vld [vmem:[#allocation2 + $0x8] sm:$0xff]   ;;  %v116_v31 = vld [vmem:[#allocation5 + $0xd0] sm:$0xff] }
  0x39   :  { %581 = vmatpush1.bf16.msra.mxu0 %v3458_v35  ;;  %782 = vmatpush1.bf16.msra.mxu1 %v3460_v36  ;;  %v129_v29 = vld [vmem:[#allocation5 + $0x138] sm:$0xff]  ;;  %v120_v32 = vld [vmem:[#allocation5 + $0xf0] sm:$0xff]  ;;  %v4006_v9 = vld [vmem:[#allocation2 + $0x28] sm:$0xff]  }
  0x3a   :  { %582 = vmatprep.subr.bf16.mxu0 %v3451_v37  ;;  %783 = vmatprep.subr.bf16.mxu1 %v3453_v39  ;;  %v117_v35 = vld [vmem:[#allocation5 + $0xd8] sm:$0xff]  ;;  %v3465_v37 = vcombine.high %v125_v28, %v129_v29  ;;  %v3986_v38 = vld [vmem:[#allocation2 + $0x10] sm:$0xff]   ;;  %v3462_v39 = vcombine.low %v124_v25, %v128_v26  ;;  %v3464_v42 = vcombine.low %v125_v28, %v129_v29  ;;  %v4030_v13 = vld [vmem:[#allocation2 + $0x48] sm:$0xff]  }
  0x3b   :  { %v121_v36 = vld [vmem:[#allocation5 + $0xf8] sm:$0xff]  ;;  %v108_v40 = vld [vmem:[#allocation5 + $0x90] sm:$0xff]  ;;  %v3454_v47 = vcombine.low %v116_v31, %v120_v32  ;;  %v4054_v17 = vld [vmem:[#allocation2 + $0x68] sm:$0xff]  }
  0x3c   :  { %v112_v41 = vld [vmem:[#allocation5 + $0xb0] sm:$0xff]  ;;  %v3456_v50 = vcombine.low %v117_v35, %v121_v36  ;;  %v97_v62 = vld [vmem:[#allocation5 + $0x38] sm:$0xff]  ;;  %v3554_v26 = vld [vmem:[#allocation7 + $0x28] sm:$0xff]  }
  0x3d   :  { %583 = vmatpush1.bf16.msra.mxu0 %v3450_v43  ;;  %784 = vmatpush1.bf16.msra.mxu1 %v3452_v44  ;;  %v3455_v43 = vcombine.high %v116_v31, %v120_v32  ;;  %v109_v44 = vld [vmem:[#allocation5 + $0x98] sm:$0xff]  ;;  %v100_v48 = vld [vmem:[#allocation5 + $0x50] sm:$0xff]  ;;  %v3446_v56 = vcombine.low %v108_v40, %v112_v41  ;;  %v3557_v28 = vld [vmem:[#allocation7 + $0xa0] sm:$0xff]  }
  0x3e   :  { %584 = vmatprep.subr.bf16.mxu0 %v3443_v45  ;;  %785 = vmatprep.subr.bf16.mxu1 %v3445_v46  ;;  %v113_v45 = vld [vmem:[#allocation5 + $0xb8] sm:$0xff]  ;;  %v3457_v46 = vcombine.high %v117_v35, %v121_v36  ;;  %v104_v49 = vld [vmem:[#allocation5 + $0x70] sm:$0xff]  ;;  %v3562_v32 = vld [vmem:[#allocation7 + $0x8] sm:$0xff]  }
  0x3f   :  { %v3992_v55 = vld [vmem:[#allocation2 + $0x18] sm:$0xff]   ;;  %v4012_v10 = vld [vmem:[#allocation2 + $0x30] sm:$0xff]   ;;  %v4024_v12 = vld [vmem:[#allocation2 + $0x40] sm:$0xff]  }
  0x40   :  { %v92_v57 = vld [vmem:[#allocation5 + $0x10] sm:$0xff]  ;;  %v4072_v20 = vld [vmem:[#allocation2 + $0x80] ss:$0 sps:$4 sm:$0xff]   ;;  %v3565_v35 = vld [vmem:[#allocation7 + $0x80] sm:$0xff]  }
  0x41   :  { %585 = vmatpush1.bf16.msra.mxu0 %v3442_v51  ;;  %786 = vmatpush1.bf16.msra.mxu1 %v3444_v52  ;;  %v3447_v51 = vcombine.high %v108_v40, %v112_v41  ;;  %v101_v52 = vld [vmem:[#allocation5 + $0x58] sm:$0xff]  ;;  %v96_v58 = vld [vmem:[#allocation5 + $0x30] sm:$0xff]  ;;  %v3570_v40 = vld [vmem:[#allocation7 + $0x68] sm:$0xff]  }
  0x42   :  { %586 = vmatprep.subr.bf16.mxu0 %v3435_v53  ;;  %787 = vmatprep.subr.bf16.mxu1 %v3437_v54  ;;  %v105_v53 = vld [vmem:[#allocation5 + $0x78] sm:$0xff]  ;;  %v3449_v54 = vcombine.high %v109_v44, %v113_v45  ;;  %v3431_v3 = vcombine.high %v92_v57, %v96_v58  ;;  %v3553_v25 = vld [vmem:[#allocation7 + $0xb0] sm:$0xff]   ;;  %v3571_v41 = vld [vmem:[#allocation7 + $0xe8] sm:$0xff]  }
  0x43   :  { %v3441_v63 = vcombine.high %v101_v52, %v105_v53  ;;  %v3440_v2 = vcombine.low %v101_v52, %v105_v53  ;;  %v4042_v15 = vld [vmem:[#allocation2 + $0x58] sm:$0xff]  }
  0x44   :  { %v4066_v19 = vld [vmem:[#allocation2 + $0x78] sm:$0xff]  }
  0x45   :  { %587 = vmatpush1.bf16.msra.mxu0 %v3434_v59  ;;  %788 = vmatpush1.bf16.msra.mxu1 %v3436_v60  ;;  %v3448_v59 = vcombine.low %v109_v44, %v113_v45  ;;  %v3439_v60 = vcombine.high %v100_v48, %v104_v49  ;;  %v3558_v29 = vld [vmem:[#allocation7 + $0x18] sm:$0xff]   ;;  %v3561_v31 = vld [vmem:[#allocation7 + $0x90] sm:$0xff]  }
  0x46   :  { %588 = vmatprep.subr.bf16.mxu0 %v3427_v61  ;;  %789 = vmatprep.subr.bf16.mxu1 %v3429_v1  ;;  %v93_v61 = vld [vmem:[#allocation5 + $0x18] sm:$0xff]  ;;  %v3438_v1 = vcombine.low %v100_v48, %v104_v49 }
  0x47   :  { %v3566_v36 = vld [vmem:[#allocation7 + $0x78] sm:$0xff]  }
  0x48   :  { %v3574_v44 = vld [vmem:[#allocation7 + $0x58] sm:$0xff]  }
  0x49   :  { %589 = vmatpush1.bf16.msra.mxu0 %v3426_v4  ;;  %790 = vmatpush1.bf16.msra.mxu1 %v3428_v5  ;;  %v3433_v4 = vcombine.high %v93_v61, %v97_v62  ;;  %v3430_v5 = vcombine.low %v92_v57, %v96_v58  ;;  %v3575_v45 = vld [vmem:[#allocation7 + $0xd8] sm:$0xff]  }
  0x4a   :  { %976 = vmatprep.subr.bf16.mxu0 %v3487_v6  ;;  %1177 = vmatprep.subr.bf16.mxu1 %v3489_v8  ;;  %v3432_v6 = vcombine.low %v93_v61, %v97_v62  ;;  %v3998_v8 = vld [vmem:[#allocation2 + $0x20] sm:$0xff]  }
  0x4c   :  { %607 = vmatmul.mubr.bf16.vlgmr.msra.gmra.mxu0 %v3974_v7  ;;  %808 = vmatmul.mubr.bf16.vlgmr.msra.gmra.mxu1 %v3974_v7 }
  0x4d   :  { %977 = vmatpush1.bf16.msra.mxu0 %v3486_v11  ;;  %1178 = vmatpush1.bf16.msra.mxu1 %v3488_v14  ;;  %v4018_v11 = vld [vmem:[#allocation2 + $0x38] sm:$0xff]   ;;  %v4036_v14 = vld [vmem:[#allocation2 + $0x50] sm:$0xff]  }
  0x4e   :  { %616 = vmatprep.mubr.bf16.mxu0 %v6178_v0  ;;  %817 = vmatprep.mubr.bf16.mxu1 %v6178_v0 }
  0x4f   :  { %978 = vmatprep.subr.bf16.mxu0 %v3479_v16  ;;  %1179 = vmatprep.subr.bf16.mxu1 %v3481_v18  ;;  %v4048_v16 = vld [vmem:[#allocation2 + $0x60] sm:$0xff]   ;;  %v4060_v18 = vld [vmem:[#allocation2 + $0x70] sm:$0xff]  }
  0x51   :  { %979 = vmatpush1.bf16.msra.mxu0 %v3478_v21  ;;  %1180 = vmatpush1.bf16.msra.mxu1 %v3480_v23  ;;  %v3550_v21 = vld [vmem:[#allocation7 + $0x38] sm:$0xff]  }
  0x52   :  { %980 = vmatprep.subr.bf16.mxu0 %v3471_v24  ;;  %1181 = vmatprep.subr.bf16.mxu1 %v3473_v27  ;;  %v3551_v23 = vld [vmem:[#allocation7 + $0xb8] sm:$0xff]   ;;  %v3552_v24 = vld [vmem:[#allocation7 + $0x30] sm:$0xff]   ;;  %v3555_v27 = vld [vmem:[#allocation7 + $0xa8] sm:$0xff]  }
  0x54   :  { %617 = vmatmul.mubr.bf16.gmra.mxu0 %v3979_v22  ;;  %818 = vmatmul.mubr.bf16.gmra.mxu1 %v3979_v22 }
  0x55   :  { %626 = vmatprep.mubr.bf16.mxu0 %v6178_v0  ;;  %827 = vmatprep.mubr.bf16.mxu1 %v6178_v0 }
  0x56   :  { %981 = vmatpush1.bf16.msra.mxu0 %v3470_v30  ;;  %1182 = vmatpush1.bf16.msra.mxu1 %v3472_v33  ;;  %v3559_v30 = vld [vmem:[#allocation7 + $0x98] sm:$0xff]   ;;  %v3563_v33 = vld [vmem:[#allocation7 + $0x88] sm:$0xff]  }
  0x57   :  { %982 = vmatprep.subr.bf16.mxu0 %v3463_v34  ;;  %1183 = vmatprep.subr.bf16.mxu1 %v3465_v37  ;;  %v3564_v34 = vld [vmem:[#allocation7] sm:$0xff]   ;;  %v3567_v37 = vld [vmem:[#allocation7 + $0xf8] sm:$0xff]  }
  0x5a   :  { %983 = vmatpush1.bf16.msra.mxu0 %v3462_v39  ;;  %1184 = vmatpush1.bf16.msra.mxu1 %v3464_v42  ;;  %v3569_v39 = vld [vmem:[#allocation7 + $0xf0] sm:$0xff]   ;;  %v3572_v42 = vld [vmem:[#allocation7 + $0x60] sm:$0xff]  }
  0x5b   :  { %984 = vmatprep.subr.bf16.mxu0 %v3455_v43  ;;  %1185 = vmatprep.subr.bf16.mxu1 %v3457_v46  ;;  %v3573_v43 = vld [vmem:[#allocation7 + $0xe0] sm:$0xff]  }
  0x5c   :  { %627 = vmatmul.mubr.bf16.gmra.mxu0 %v3986_v38  ;;  %828 = vmatmul.mubr.bf16.gmra.mxu1 %v3986_v38 }
  0x5d   :  { %636 = vmatprep.mubr.bf16.mxu0 %v6178_v0  ;;  %837 = vmatprep.mubr.bf16.mxu1 %v6178_v0 }
  0x5e   :  { %985 = vmatpush1.bf16.msra.mxu0 %v3454_v47  ;;  %1186 = vmatpush1.bf16.msra.mxu1 %v3456_v50 }
  0x5f   :  { %986 = vmatprep.subr.bf16.mxu0 %v3447_v51  ;;  %1187 = vmatprep.subr.bf16.mxu1 %v3449_v54  ;;  %v3576_v54 = vld [vmem:[#allocation7 + $0x50] sm:$0xff]  }
  0x62   :  { %987 = vmatpush1.bf16.msra.mxu0 %v3446_v56  ;;  %1188 = vmatpush1.bf16.msra.mxu1 %v3448_v59 }
  0x63   :  { %988 = vmatprep.subr.bf16.mxu0 %v3439_v60  ;;  %1189 = vmatprep.subr.bf16.mxu1 %v3441_v63 }
  0x64   :  { %637 = vmatmul.mubr.bf16.gmra.mxu0 %v3992_v55  ;;  %838 = vmatmul.mubr.bf16.gmra.mxu1 %v3992_v55 }
  0x65   :  { %646 = vmatprep.mubr.bf16.mxu0 %v6178_v0  ;;  %847 = vmatprep.mubr.bf16.mxu1 %v6178_v0 }
  0x66   :  { %989 = vmatpush1.bf16.msra.mxu0 %v3438_v1  ;;  %1190 = vmatpush1.bf16.msra.mxu1 %v3440_v2 }
  0x67   :  { %990 = vmatprep.subr.bf16.mxu0 %v3431_v3  ;;  %1191 = vmatprep.subr.bf16.mxu1 %v3433_v4 }
  0x6a   :  { %991 = vmatpush1.bf16.msra.mxu0 %v3430_v5  ;;  %1192 = vmatpush1.bf16.msra.mxu1 %v3432_v6  ;;  %v3578_v6 = vld [vmem:[#allocation7 + $0x48] sm:$0xff]  }
  0x6b   :  { %3022 = vmatprep.subr.bf16.mxu0 %v6178_v0  ;;  %3190 = vmatprep.subr.bf16.mxu1 %v6178_v0 }
  0x6c   :  { %647 = vmatmul.mubr.bf16.gmra.mxu0 %v3998_v8  ;;  %848 = vmatmul.mubr.bf16.gmra.mxu1 %v3998_v8 }
  0x6d   :  { %656 = vmatprep.mubr.bf16.mxu0 %v6178_v0  ;;  %857 = vmatprep.mubr.bf16.mxu1 %v6178_v0 }
  0x74   :  { %657 = vmatmul.mubr.bf16.gmra.mxu0 %v4006_v9  ;;  %858 = vmatmul.mubr.bf16.gmra.mxu1 %v4006_v9 }
  0x75   :  { %666 = vmatprep.mubr.bf16.mxu0 %v6178_v0  ;;  %867 = vmatprep.mubr.bf16.mxu1 %v6178_v0 }
  0x7c   :  { %667 = vmatmul.mubr.bf16.gmra.mxu0 %v4012_v10  ;;  %868 = vmatmul.mubr.bf16.gmra.mxu1 %v4012_v10 }
  0x7d   :  { %676 = vmatprep.mubr.bf16.mxu0 %v6178_v0  ;;  %877 = vmatprep.mubr.bf16.mxu1 %v6178_v0 }
  0x84   :  { %677 = vmatmul.mubr.bf16.gmra.mxu0 %v4018_v11  ;;  %878 = vmatmul.mubr.bf16.gmra.mxu1 %v4018_v11 }
  0x85   :  { %686 = vmatprep.mubr.bf16.mxu0 %v6178_v0  ;;  %887 = vmatprep.mubr.bf16.mxu1 %v6178_v0 }
  0x8c   :  { %687 = vmatmul.mubr.bf16.gmra.mxu0 %v4024_v12  ;;  %888 = vmatmul.mubr.bf16.gmra.mxu1 %v4024_v12 }
  0x8d   :  { %696 = vmatprep.mubr.bf16.mxu0 %v6178_v0  ;;  %897 = vmatprep.mubr.bf16.mxu1 %v6178_v0 }
  0x94   :  { %697 = vmatmul.mubr.bf16.gmra.mxu0 %v4030_v13  ;;  %898 = vmatmul.mubr.bf16.gmra.mxu1 %v4030_v13 }
  0x95   :  { %706 = vmatprep.mubr.bf16.mxu0 %v6178_v0  ;;  %907 = vmatprep.mubr.bf16.mxu1 %v6178_v0 }
  0x9c   :  { %707 = vmatmul.mubr.bf16.gmra.mxu0 %v4036_v14  ;;  %908 = vmatmul.mubr.bf16.gmra.mxu1 %v4036_v14 }
  0x9d   :  { %716 = vmatprep.mubr.bf16.mxu0 %v6178_v0  ;;  %917 = vmatprep.mubr.bf16.mxu1 %v6178_v0 }
  0xa4   :  { %717 = vmatmul.mubr.bf16.gmra.mxu0 %v4042_v15  ;;  %918 = vmatmul.mubr.bf16.gmra.mxu1 %v4042_v15 }
  0xa5   :  { %726 = vmatprep.mubr.bf16.mxu0 %v6178_v0  ;;  %927 = vmatprep.mubr.bf16.mxu1 %v6178_v0 }
  0xac   :  { %727 = vmatmul.mubr.bf16.gmra.mxu0 %v4048_v16  ;;  %928 = vmatmul.mubr.bf16.gmra.mxu1 %v4048_v16 }
  0xad   :  { %736 = vmatprep.mubr.bf16.mxu0 %v6178_v0  ;;  %937 = vmatprep.mubr.bf16.mxu1 %v6178_v0 }
  0xb4   :  { %737 = vmatmul.mubr.bf16.gmra.mxu0 %v4054_v17  ;;  %938 = vmatmul.mubr.bf16.gmra.mxu1 %v4054_v17 }
  0xb5   :  { %746 = vmatprep.mubr.bf16.mxu0 %v6178_v0  ;;  %947 = vmatprep.mubr.bf16.mxu1 %v6178_v0 }
  0xbc   :  { %747 = vmatmul.mubr.bf16.gmra.mxu0 %v4060_v18  ;;  %948 = vmatmul.mubr.bf16.gmra.mxu1 %v4060_v18 }
  0xbd   :  { %756 = vmatprep.mubr.bf16.mxu0 %v6178_v0  ;;  %957 = vmatprep.mubr.bf16.mxu1 %v6178_v0 }
  0xc4   :  { %757 = vmatmul.mubr.bf16.gmra.mxu0 %v4066_v19  ;;  %958 = vmatmul.mubr.bf16.gmra.mxu1 %v4066_v19 }
  0xc5   :  { %766 = vmatprep.mubr.bf16.mxu0 %v6178_v0  ;;  %967 = vmatprep.mubr.bf16.mxu1 %v6178_v0 }
  0xcc   :  { %767 = vmatmul.mubr.bf16.gmra.mxu0 %v4072_v20  ;;  %968 = vmatmul.mubr.bf16.gmra.mxu1 %v4072_v20 }
  0xcd   :  { %1008 = vmatprep.mubr.bf16.mxu0 %v6178_v0  ;;  %1209 = vmatprep.mubr.bf16.mxu1 %v6178_v0 }
  0xd4   :  { %1009 = vmatmul.mubr.bf16.vlgmr.msra.gmra.mxu0 %v3974_v7  ;;  %1210 = vmatmul.mubr.bf16.vlgmr.msra.gmra.mxu1 %v3974_v7  ;;  %v3556_v7 = vld [vmem:[#allocation7 + $0x20] sm:$0xff]  }
  0xd5   :  { %1018 = vmatprep.mubr.bf16.mxu0 %v6178_v0  ;;  %1219 = vmatprep.mubr.bf16.mxu1 %v6178_v0 }
  0xd6   :  { %3023 = vmatpush1.bf16.msra.mxu0 %v3550_v21  ;;  %3191 = vmatpush1.bf16.msra.mxu1 %v3551_v23 }
  0xd7   :  { %3024 = vmatprep.subr.bf16.mxu0 %v6178_v0  ;;  %3192 = vmatprep.subr.bf16.mxu1 %v6178_v0 }
  0xda   :  { %3025 = vmatpush1.bf16.msra.mxu0 %v3552_v24  ;;  %3193 = vmatpush1.bf16.msra.mxu1 %v3553_v25 }
  0xdb   :  { %3026 = vmatprep.subr.bf16.mxu0 %v6178_v0  ;;  %3194 = vmatprep.subr.bf16.mxu1 %v6178_v0 }
  0xdc   :  { %1019 = vmatmul.mubr.bf16.gmra.mxu0 %v3979_v22  ;;  %1220 = vmatmul.mubr.bf16.gmra.mxu1 %v3979_v22  ;;  %v3560_v22 = vld [vmem:[#allocation7 + $0x10] sm:$0xff]  }
  0xdd   :  { %1028 = vmatprep.mubr.bf16.mxu0 %v6178_v0  ;;  %1229 = vmatprep.mubr.bf16.mxu1 %v6178_v0 }
  0xde   :  { %3027 = vmatpush1.bf16.msra.mxu0 %v3554_v26  ;;  %3195 = vmatpush1.bf16.msra.mxu1 %v3555_v27 }
  0xdf   :  { %3028 = vmatprep.subr.bf16.mxu0 %v6178_v0  ;;  %3196 = vmatprep.subr.bf16.mxu1 %v6178_v0 }
  0xe2   :  { %3029 = vmatpush1.bf16.msra.mxu0 %v3556_v7  ;;  %3197 = vmatpush1.bf16.msra.mxu1 %v3557_v28 }
  0xe3   :  { %3030 = vmatprep.subr.bf16.mxu0 %v6178_v0  ;;  %3198 = vmatprep.subr.bf16.mxu1 %v6178_v0 }
  0xe4   :  { %1029 = vmatmul.mubr.bf16.gmra.mxu0 %v3986_v38  ;;  %1230 = vmatmul.mubr.bf16.gmra.mxu1 %v3986_v38  ;;  %v3568_v38 = vld [vmem:[#allocation7 + $0x70] sm:$0xff]  }
  0xe5   :  { %1038 = vmatprep.mubr.bf16.mxu0 %v6178_v0  ;;  %1239 = vmatprep.mubr.bf16.mxu1 %v6178_v0 }
  0xe6   :  { %3031 = vmatpush1.bf16.msra.mxu0 %v3558_v29  ;;  %3199 = vmatpush1.bf16.msra.mxu1 %v3559_v30 }
  0xe7   :  { %3032 = vmatprep.subr.bf16.mxu0 %v6178_v0  ;;  %3200 = vmatprep.subr.bf16.mxu1 %v6178_v0 }
  0xea   :  { %3033 = vmatpush1.bf16.msra.mxu0 %v3560_v22  ;;  %3201 = vmatpush1.bf16.msra.mxu1 %v3561_v31 }
  0xeb   :  { %3034 = vmatprep.subr.bf16.mxu0 %v6178_v0  ;;  %3202 = vmatprep.subr.bf16.mxu1 %v6178_v0 }
  0xec   :  { %1039 = vmatmul.mubr.bf16.gmra.mxu0 %v3992_v55  ;;  %1240 = vmatmul.mubr.bf16.gmra.mxu1 %v3992_v55  ;;  %v3577_v55 = vld [vmem:[#allocation7 + $0xd0] sm:$0xff]  }
  0xed   :  { %1048 = vmatprep.mubr.bf16.mxu0 %v6178_v0  ;;  %1249 = vmatprep.mubr.bf16.mxu1 %v6178_v0 }
  0xee   :  { %3035 = vmatpush1.bf16.msra.mxu0 %v3562_v32  ;;  %3203 = vmatpush1.bf16.msra.mxu1 %v3563_v33 }
  0xef   :  { %3036 = vmatprep.subr.bf16.mxu0 %v6178_v0  ;;  %3204 = vmatprep.subr.bf16.mxu1 %v6178_v0 }
  0xf2   :  { %3037 = vmatpush1.bf16.msra.mxu0 %v3564_v34  ;;  %3205 = vmatpush1.bf16.msra.mxu1 %v3565_v35 }
  0xf3   :  { %3038 = vmatprep.subr.bf16.mxu0 %v6178_v0  ;;  %3206 = vmatprep.subr.bf16.mxu1 %v6178_v0 }
  0xf4   :  { %1049 = vmatmul.mubr.bf16.gmra.mxu0 %v3998_v8  ;;  %1250 = vmatmul.mubr.bf16.gmra.mxu1 %v3998_v8  ;;  %v3579_v8 = vld [vmem:[#allocation7 + $0xc8] sm:$0xff]  }
  0xf5   :  { %1058 = vmatprep.mubr.bf16.mxu0 %v6178_v0  ;;  %1259 = vmatprep.mubr.bf16.mxu1 %v6178_v0 }
  0xf6   :  { %3039 = vmatpush2.bf16.msra.mxu0 %v3566_v36  ;;  %3207 = vmatpush2.bf16.msra.mxu1 %v3567_v37 }
  0xf7   :  { %3040 = vmatprep.subr.bf16.mxu0 %v6178_v0  ;;  %3208 = vmatprep.subr.bf16.mxu1 %v6178_v0 }
  0xfa   :  { %3041 = vmatpush2.bf16.msra.mxu0 %v3568_v38  ;;  %3209 = vmatpush2.bf16.msra.mxu1 %v3569_v39 }
  0xfb   :  { %3042 = vmatprep.subr.bf16.mxu0 %v6178_v0  ;;  %3210 = vmatprep.subr.bf16.mxu1 %v6178_v0 }
  0xfc   :  { %1059 = vmatmul.mubr.bf16.gmra.mxu0 %v4006_v9  ;;  %1260 = vmatmul.mubr.bf16.gmra.mxu1 %v4006_v9 }
  0xfd   :  { %1068 = vmatprep.mubr.bf16.mxu0 %v6178_v0  ;;  %1269 = vmatprep.mubr.bf16.mxu1 %v6178_v0 }
  0xfe   :  { %3043 = vmatpush2.bf16.msra.mxu0 %v3570_v40  ;;  %3211 = vmatpush2.bf16.msra.mxu1 %v3571_v41 }
  0xff   :  { %3044 = vmatprep.subr.bf16.mxu0 %v6178_v0  ;;  %3212 = vmatprep.subr.bf16.mxu1 %v6178_v0 }
 0x102   :  { %3045 = vmatpush2.bf16.msra.mxu0 %v3572_v42  ;;  %3213 = vmatpush2.bf16.msra.mxu1 %v3573_v43 }
 0x103   :  { %3046 = vmatprep.subr.bf16.mxu0 %v6178_v0  ;;  %3214 = vmatprep.subr.bf16.mxu1 %v6178_v0 }
 0x104   :  { %1069 = vmatmul.mubr.bf16.gmra.mxu0 %v4012_v10  ;;  %1270 = vmatmul.mubr.bf16.gmra.mxu1 %v4012_v10 }
 0x105   :  { %1078 = vmatprep.mubr.bf16.mxu0 %v6178_v0  ;;  %1279 = vmatprep.mubr.bf16.mxu1 %v6178_v0 }
 0x106   :  { %3047 = vmatpush2.bf16.msra.mxu0 %v3574_v44  ;;  %3215 = vmatpush2.bf16.msra.mxu1 %v3575_v45  ;;  %v3580_v45 = vld [vmem:[#allocation7 + $0x40] sm:$0xff]  }
 0x107   :  { %3048 = vmatprep.subr.bf16.mxu0 %v6178_v0  ;;  %3216 = vmatprep.subr.bf16.mxu1 %v6178_v0 }
 0x10a   :  { %3049 = vmatpush2.bf16.msra.mxu0 %v3576_v54  ;;  %3217 = vmatpush2.bf16.msra.mxu1 %v3577_v55 }
 0x10b   :  { %3050 = vmatprep.subr.bf16.mxu0 %v6178_v0  ;;  %3218 = vmatprep.subr.bf16.mxu1 %v6178_v0 }
 0x10c   :  { %v608_v46 = vpop.f32.mrf.mxu0  ;;  %1079 = vmatmul.mubr.bf16.gmra.mxu0 %v4018_v11  ;;  %v4133_v47 = vpop.f32.mrf.mxu1  ;;  %1280 = vmatmul.mubr.bf16.gmra.mxu1 %v4018_v11 }
 0x10d   :  { %1088 = vmatprep.mubr.bf16.mxu0 %v6178_v0  ;;  %1289 = vmatprep.mubr.bf16.mxu1 %v6178_v0  ;;  %v1510_v49 = vmul.f32 0.044715, %v608_v46  ;;  %v1512_v51 = vmul.f32 0.044715, %v4133_v47  ;;  %v4174_v23 = vmul.f32 0.5, %v608_v46  ;;  %v4195_v34 = vmul.f32 0.5, %v4133_v47 }
 0x10e   :  { %v4137_v48 = vpop.f32.mrf.mxu0  ;;  %v4140_v50 = vpop.f32.mrf.mxu1  ;;  %3051 = vmatpush2.bf16.msra.mxu0 %v3578_v6  ;;  %3219 = vmatpush2.bf16.msra.mxu1 %v3579_v8 }
 0x10f   :  { %v1511_v52 = vmul.f32 0.044715, %v4137_v48  ;;  %v1513_v57 = vmul.f32 0.044715, %v4140_v50  ;;  %v1642_v59 = vmul.f32 %v1510_v49, %v608_v46  ;;  %v1644_v62 = vmul.f32 %v1512_v51, %v4133_v47  ;;  %3052 = vmatprep.subr.bf16.mxu0 %v6178_v0  ;;  %3220 = vmatprep.subr.bf16.mxu1 %v6178_v0 }
 0x110   :  { %v4144_v53 = vpop.f32.mrf.mxu0  ;;  %v4146_v56 = vpop.f32.mrf.mxu1  ;;  %v4219_v54 = vmul.f32 0.5, %v4137_v48 }
 0x111   :  { %v1514_v60 = vmul.f32 0.044715, %v4144_v53  ;;  %v1643_v63 = vmul.f32 %v1511_v52, %v4137_v48  ;;  %v1516_v1 = vmul.f32 0.044715, %v4146_v56  ;;  %v1645_v4 = vmul.f32 %v1513_v57, %v4140_v50 }
 0x112   :  { %v4149_v58 = vpop.f32.mrf.mxu0  ;;  %v4152_v61 = vpop.f32.mrf.mxu1  ;;  %v1774_v9 = vmul.f32 %v1642_v59, %v608_v46  ;;  %3053 = vmatpush2.bf16.msra.mxu0 %v3580_v45 }
 0x113   :  { %v1646_v10 = vmul.f32 %v1514_v60, %v4144_v53  ;;  %v1515_v11 = vmul.f32 0.044715, %v4149_v58  ;;  %v1775_v24 = vmul.f32 %v1643_v63, %v4137_v48  ;;  %v1648_v25 = vmul.f32 %v1516_v1, %v4146_v56 }
 0x114   :  { %v4159_v2 = vpop.f32.mrf.mxu0  ;;  %1089 = vmatmul.mubr.bf16.gmra.mxu0 %v4024_v12  ;;  %v4162_v3 = vpop.f32.mrf.mxu1  ;;  %1290 = vmatmul.mubr.bf16.gmra.mxu1 %v4024_v12  ;;  %v1776_v12 = vmul.f32 %v1644_v62, %v4133_v47  ;;  %v1517_v7 = vmul.f32 0.044715, %v4152_v61  ;;  %v1777_v22 = vmul.f32 %v1645_v4, %v4140_v50  ;;  %v1906_v35 = vadd.f32 %v1774_v9, %v608_v46  ;;  %v3581_v46 = vld [vmem:[#allocation7 + $0xc0] sm:$0xff]  }
 0x115   :  { %1098 = vmatprep.mubr.bf16.mxu0 %v6178_v0  ;;  %1299 = vmatprep.mubr.bf16.mxu1 %v6178_v0  ;;  %v1518_v26 = vmul.f32 0.044715, %v4159_v2  ;;  %v1520_v28 = vmul.f32 0.044715, %v4162_v3  ;;  %v1778_v36 = vmul.f32 %v1646_v10, %v4144_v53  ;;  %v1647_v37 = vmul.f32 %v1515_v11, %v4149_v58 }
 0x116   :  { %v4167_v5 = vpop.f32.mrf.mxu0  ;;  %v4172_v21 = vpop.f32.mrf.mxu1  ;;  %v1908_v40 = vadd.f32 %v1776_v12, %v4133_v47  ;;  %v4204_v41 = vadd.f32 %v1775_v24, %v4137_v48  ;;  %v1780_v42 = vmul.f32 %v1648_v25, %v4146_v56  ;;  %v1649_v49 = vmul.f32 %v1517_v7, %v4152_v61  ;;  %3221 = vmatpush2.bf16.msra.mxu1 %v3581_v46 }
 0x117   :  { %6339 = vst [vmem:[#allocation12_spill] sm:$0xff] %v4167_v5  ;;  %6340 = vst [vmem:[#allocation13_spill] sm:$0xff] %v4172_v21  ;;  %v1519_v29 = vmul.f32 0.044715, %v4167_v5  ;;  %v1521_v31 = vmul.f32 0.044715, %v4172_v21  ;;  %v1650_v43 = vmul.f32 %v1518_v26, %v4159_v2  ;;  %v1652_v51 = vmul.f32 %v1520_v28, %v4162_v3 }
 0x118   :  { %v4180_v27 = vpop.f32.mrf.mxu0  ;;  %v4185_v30 = vpop.f32.mrf.mxu1  ;;  %v4222_v55 = vadd.f32 %v1777_v22, %v4140_v50  ;;  %v4230_v62 = vmul.f32 0.5, %v4140_v50  ;;  %v4236_v48 = vmul.f32 %v1647_v37, %v4149_v58  ;;  %v4243_v6 = vadd.f32 %v1780_v42, %v4146_v56 }
 0x119   :  { %6341 = vst [vmem:[#allocation14_spill] sm:$0xff] %v4180_v27  ;;  %6342 = vst [vmem:[#allocation15_spill] sm:$0xff] %v4185_v30  ;;  %v1522_v32 = vmul.f32 0.044715, %v4180_v27  ;;  %v1524_v38 = vmul.f32 0.044715, %v4185_v30  ;;  %v1651_v52 = vmul.f32 %v1519_v29, %v4167_v5  ;;  %v1653_v57 = vmul.f32 %v1521_v31, %v4172_v21 }
 0x11a   :  { %v4192_v33 = vpop.f32.mrf.mxu0  ;;  %v4200_v39 = vpop.f32.mrf.mxu1  ;;  %v1782_v50 = vmul.f32 %v1650_v43, %v4159_v2  ;;  %v4251_v11 = vmul.f32 %v1649_v49, %v4152_v61  ;;  %v1784_v12 = vmul.f32 %v1652_v51, %v4162_v3  ;;  %v2038_v42 = vmul.f32 0.7978846, %v1906_v35 }
 0x11b   :  { %6343 = vst [vmem:[#allocation16_spill] sm:$0xff] %v4192_v33  ;;  %6344 = vst [vmem:[#allocation17_spill] sm:$0xff] %v4200_v39  ;;  %v1654_v59 = vmul.f32 %v1522_v32, %v4180_v27  ;;  %v1656_v63 = vmul.f32 %v1524_v38, %v4185_v30  ;;  %v1523_v1 = vmul.f32 0.044715, %v4192_v33  ;;  %v1525_v8 = vmul.f32 0.044715, %v4200_v39 }
 0x11c   :  { %v4208_v44 = vpop.f32.mrf.mxu0  ;;  %1099 = vmatmul.mubr.bf16.gmra.mxu0 %v4030_v13  ;;  %v4214_v47 = vpop.f32.mrf.mxu1  ;;  %1300 = vmatmul.mubr.bf16.gmra.mxu1 %v4030_v13  ;;  %v4233_v13 = vadd.f32 %v1778_v36, %v4144_v53  ;;  %v1783_v24 = vmul.f32 %v1651_v52, %v4167_v5  ;;  %v1785_v7 = vmul.f32 %v1653_v57, %v4172_v21  ;;  %3582 = vtanh.f32 %v2038_v42 }
 0x11d   :  { %6345 = vst [vmem:[#allocation18_spill] sm:$0xff] %v4208_v44  ;;  %6346 = vst [vmem:[#allocation19_spill] sm:$0xff] %v4214_v47  ;;  %1108 = vmatprep.mubr.bf16.mxu0 %v6178_v0  ;;  %1309 = vmatprep.mubr.bf16.mxu1 %v6178_v0  ;;  %v1526_v9 = vmul.f32 0.044715, %v4208_v44  ;;  %v1528_v25 = vmul.f32 0.044715, %v4214_v47  ;;  %v1786_v28 = vmul.f32 %v1654_v59, %v4180_v27 }
 0x11e   :  { %v4226_v60 = vpop.f32.mrf.mxu0  ;;  %v4240_v4 = vpop.f32.mrf.mxu1  ;;  %v1788_v32 = vmul.f32 %v1656_v63, %v4185_v30  ;;  %v1655_v36 = vmul.f32 %v1523_v1, %v4192_v33  ;;  %v4270_v43 = vadd.f32 %v1782_v50, %v4159_v2  ;;  %v1657_v45 = vmul.f32 %v1525_v8, %v4200_v39 }
 0x11f   :  { %6347 = vst [vmem:[#allocation20_spill] sm:$0xff] %v4226_v60  ;;  %6348 = vst [vmem:[#allocation21_spill] sm:$0xff] %v4240_v4  ;;  %v1527_v29 = vmul.f32 0.044715, %v4226_v60  ;;  %v1529_v22 = vmul.f32 0.044715, %v4240_v4  ;;  %v1658_v46 = vmul.f32 %v1526_v9, %v4208_v44  ;;  %v4279_v52 = vadd.f32 %v1784_v12, %v4162_v3 }
 0x120   :  { %v4248_v10 = vpop.f32.mrf.mxu0  ;;  %v4256_v26 = vpop.f32.mrf.mxu1  ;;  %v4282_v57 = vadd.f32 %v1783_v24, %v4167_v5  ;;  %v1660_v35 = vmul.f32 %v1528_v25, %v4214_v47  ;;  %v2040_v63 = vmul.f32 0.7978846, %v1908_v40  ;;  %v4290_v1 = vadd.f32 %v1785_v7, %v4172_v21 }
 0x121   :  { %6349 = vst [vmem:[#allocation22_spill] sm:$0xff] %v4248_v10  ;;  %6350 = vst [vmem:[#allocation23_spill] sm:$0xff] %v4256_v26  ;;  %v1530_v37 = vmul.f32 0.044715, %v4248_v10  ;;  %v1532_v49 = vmul.f32 0.044715, %v4256_v26  ;;  %v4293_v50 = vadd.f32 %v1786_v28, %v4180_v27  ;;  %v1659_v8 = vmul.f32 %v1527_v29, %v4226_v60 }
 0x122   :  { %v4262_v31 = vpop.f32.mrf.mxu0  ;;  %v4267_v38 = vpop.f32.mrf.mxu1  ;;  %6355 = vst [vmem:[#allocation28_spill] sm:$0xff] %v4290_v1  ;;  %v1661_v9 = vmul.f32 %v1529_v22, %v4240_v4  ;;  %v4301_v24 = vadd.f32 %v1788_v32, %v4185_v30  ;;  %v4311_v28 = vmul.f32 %v1657_v45, %v4200_v39  ;;  %v1790_v29 = vmul.f32 %v1658_v46, %v4208_v44 }
 0x123   :  { %6351 = vst [vmem:[#allocation24_spill] sm:$0xff] %v4262_v31  ;;  %6352 = vst [vmem:[#allocation25_spill] sm:$0xff] %v4267_v38  ;;  %v1662_v40 = vmul.f32 %v1530_v37, %v4248_v10  ;;  %v1531_v25 = vmul.f32 0.044715, %v4262_v31  ;;  %v1664_v22 = vmul.f32 %v1532_v49, %v4256_v26  ;;  %v1533_v30 = vmul.f32 0.044715, %v4267_v38 }
 0x124   :  { %v4275_v51 = vpop.f32.mrf.mxu0  ;;  %1109 = vmatmul.mubr.bf16.gmra.mxu0 %v4036_v14  ;;  %v4285_v59 = vpop.f32.mrf.mxu1  ;;  %1310 = vmatmul.mubr.bf16.gmra.mxu1 %v4036_v14  ;;  %6356 = vst [vmem:[#allocation29_spill] sm:$0xff] %v4293_v50  ;;  %6358 = vst [vmem:[#allocation31_spill] sm:$0xff] %v4301_v24  ;;  %v4304_v14 = vmul.f32 %v1655_v36, %v4192_v33  ;;  %v1792_v36 = vmul.f32 %v1660_v35, %v4214_v47  ;;  %3584 = vtanh.f32 %v2040_v63 }
 0x125   :  { %6353 = vst [vmem:[#allocation26_spill] sm:$0xff] %v4275_v51  ;;  %6354 = vst [vmem:[#allocation27_spill] sm:$0xff] %v4285_v59  ;;  %1118 = vmatprep.mubr.bf16.mxu0 %v6178_v0  ;;  %1319 = vmatprep.mubr.bf16.mxu1 %v6178_v0  ;;  %v1534_v0 = vmul.f32 0.044715, %v4275_v51  ;;  %v1536_v37 = vmul.f32 0.044715, %v4285_v59  ;;  %v1791_v45 = vmul.f32 %v1659_v8, %v4226_v60 }
 0x126   :  { %v4297_v12 = vpop.f32.mrf.mxu0  ;;  %6359 = vst [vmem:[#allocation32_spill] sm:$0xff] %v4304_v14  ;;  %v4308_v7 = vpop.f32.mrf.mxu1  ;;  %6361 = vst [vmem:[#allocation34_spill] sm:$0xff] %v4311_v28  ;;  %v1793_v21 = vmul.f32 %v1661_v9, %v4240_v4  ;;  %v1794_v39 = vmul.f32 %v1662_v40, %v4248_v10  ;;  %v1663_v35 = vmul.f32 %v1531_v25, %v4262_v31 }
 0x127   :  { %6357 = vst [vmem:[#allocation30_spill] sm:$0xff] %v4297_v12  ;;  %6360 = vst [vmem:[#allocation33_spill] sm:$0xff] %v4308_v7  ;;  %v1535_v46 = vmul.f32 0.044715, %v4297_v12  ;;  %v1537_v49 = vmul.f32 0.044715, %v4308_v7  ;;  %v4335_v42 = vadd.f32 %v1790_v29, %v4208_v44  ;;  %v1796_v8 = vmul.f32 %v1664_v22, %v4256_v26 }
 0x128   :  { %v4316_v32 = vpop.f32.mrf.mxu0  ;;  %v4321_v27 = vpop.f32.mrf.mxu1  ;;  %v1666_v9 = vmul.f32 %v1534_v0, %v4275_v51  ;;  %v4344_v40 = vadd.f32 %v1792_v36, %v4214_v47  ;;  %v1665_v25 = vmul.f32 %v1533_v30, %v4267_v38  ;;  %v1668_v63 = vmul.f32 %v1536_v37, %v4285_v59 }
 0x129   :  { %6362 = vst [vmem:[#allocation35_spill] sm:$0xff] %v4316_v32  ;;  %6363 = vst [vmem:[#allocation36_spill] sm:$0xff] %v4321_v27  ;;  %v1538_v14 = vmul.f32 0.044715, %v4316_v32  ;;  %v1540_v24 = vmul.f32 0.044715, %v4321_v27  ;;  %v4356_v22 = vadd.f32 %v1791_v45, %v4226_v60  ;;  %v4359_v44 = vadd.f32 %v1793_v21, %v4240_v4 }
 0x12a   :  { %v4327_v28 = vpop.f32.mrf.mxu0  ;;  %v4332_v33 = vpop.f32.mrf.mxu1  ;;  %6366 = vst [vmem:[#allocation39_spill] sm:$0xff] %v4335_v42  ;;  %6367 = vst [vmem:[#allocation40_spill] sm:$0xff] %v4344_v40  ;;  %v6369_v29 = vmov 0   ;;  %v4353_v0 = vmul.f32 0.5, %v4144_v53  ;;  %v1667_v36 = vmul.f32 %v1535_v46, %v4297_v12  ;;  %v1669_v30 = vmul.f32 %v1537_v49, %v4308_v7 }
 0x12b   :  { %6364 = vst [vmem:[#allocation37_spill] sm:$0xff] %v4327_v28  ;;  %6365 = vst [vmem:[#allocation38_spill] sm:$0xff] %v4332_v33  ;;  %v4370_v53 = vmul.f32 %v1663_v35, %v4262_v31  ;;  %v1670_v45 = vmul.f32 %v1538_v14, %v4316_v32  ;;  %v1539_v60 = vmul.f32 0.044715, %v4327_v28  ;;  %v4377_v46 = vadd.f32 %v1796_v8, %v4256_v26 }
 0x12c   :  { %v4340_v50 = vpop.f32.mrf.mxu0  ;;  %1119 = vmatmul.mubr.bf16.gmra.mxu0 %v4042_v15  ;;  %v4348_v1 = vpop.f32.mrf.mxu1  ;;  %1320 = vmatmul.mubr.bf16.gmra.mxu1 %v4042_v15  ;;  %6370 = vst [vmem:[#allocation42_spill] sm:$0xff] %v4356_v22  ;;  %6371 = vst [vmem:[#allocation43_spill] sm:$0xff] %v4359_v44  ;;  %v4367_v15 = vadd.f32 %v1794_v39, %v4248_v10  ;;  %v1798_v49 = vmul.f32 %v1666_v9, %v4275_v51  ;;  %v1541_v10 = vmul.f32 0.044715, %v4332_v33 }
 0x12d   :  { %6368 = vst [vmem:[#allocation41_spill] sm:$0xff] %v4348_v1  ;;  %1128 = vmatprep.mubr.bf16.mxu0 %v6369_v29  ;;  %1329 = vmatprep.mubr.bf16.mxu1 %v6369_v29  ;;  %6374 = vst [vmem:[#allocation46_spill] sm:$0xff] %v4370_v53  ;;  %v1672_v4 = vmul.f32 %v1540_v24, %v4321_v27  ;;  %v1542_v47 = vmul.f32 0.044715, %v4340_v50  ;;  %v4385_v35 = vmul.f32 %v1665_v25, %v4267_v38 }
 0x12e   :  { %v4363_v37 = vpop.f32.mrf.mxu0  ;;  %6373 = vst [vmem:[#allocation45_spill] sm:$0xff] %v4367_v15  ;;  %v4374_v21 = vpop.f32.mrf.mxu1  ;;  %6376 = vst [vmem:[#allocation48_spill] sm:$0xff] %v4377_v46  ;;  %v1800_v14 = vmul.f32 %v1668_v63, %v4285_v59  ;;  %v1544_v53 = vmul.f32 0.044715, %v4348_v1  ;;  %v1799_v8 = vmul.f32 %v1667_v36, %v4297_v12  ;;  %v1801_v9 = vmul.f32 %v1669_v30, %v4308_v7 }
 0x12f   :  { %6372 = vst [vmem:[#allocation44_spill] sm:$0xff] %v4363_v37  ;;  %6375 = vst [vmem:[#allocation47_spill] sm:$0xff] %v4374_v21  ;;  %v1543_v24 = vmul.f32 0.044715, %v4363_v37  ;;  %v1545_v26 = vmul.f32 0.044715, %v4374_v21  ;;  %v1802_v25 = vmul.f32 %v1670_v45, %v4316_v32  ;;  %v1671_v63 = vmul.f32 %v1539_v60, %v4327_v28 }
 0x130   :  { %v4382_v39 = vpop.f32.mrf.mxu0  ;;  %6378 = vst [vmem:[#allocation50_spill] sm:$0xff] %v4385_v35  ;;  %v4390_v31 = vpop.f32.mrf.mxu1  ;;  %v4404_v15 = vmul.f32 0.7978846, %v4204_v41  ;;  %v4407_v36 = vadd.f32 %v1798_v49, %v4275_v51  ;;  %v1804_v30 = vmul.f32 %v1672_v4, %v4321_v27  ;;  %v1674_v44 = vmul.f32 %v1542_v47, %v4340_v50 }
 0x131   :  { %6377 = vst [vmem:[#allocation49_spill] sm:$0xff] %v4382_v39  ;;  %6379 = vst [vmem:[#allocation51_spill] sm:$0xff] %v4390_v31  ;;  %v1546_v35 = vmul.f32 0.044715, %v4382_v39  ;;  %v4415_v60 = vmul.f32 0.7978846, %v4222_v55  ;;  %v4418_v45 = vadd.f32 %v1800_v14, %v4285_v59  ;;  %v1673_v41 = vmul.f32 %v1541_v10, %v4332_v33  ;;  %v3583_v47 = vpop.eup %3582 }
 0x132   :  { %v4396_v46 = vpop.f32.mrf.mxu0  ;;  %v4401_v38 = vpop.f32.mrf.mxu1  ;;  %6381 = vst [vmem:[#allocation53_spill] sm:$0xff] %v4407_v36  ;;  %v1676_v40 = vmul.f32 %v1544_v53, %v4348_v1  ;;  %v1548_v49 = vmul.f32 0.044715, %v4390_v31  ;;  %v4428_v4 = vadd.f32 %v1799_v8, %v4297_v12  ;;  %v4431_v55 = vadd.f32 %v1801_v9, %v4308_v7 }
 0x133   :  { %6380 = vst [vmem:[#allocation52_spill] sm:$0xff] %v4396_v46  ;;  %6383 = vst [vmem:[#allocation55_spill] sm:$0xff] %v4418_v45  ;;  %v1675_v14 = vmul.f32 %v1543_v24, %v4363_v37  ;;  %v1677_v10 = vmul.f32 %v1545_v26, %v4374_v21  ;;  %v4439_v59 = vadd.f32 %v1802_v25, %v4316_v32  ;;  %v3585_v7 = vpop.eup %3584  ;;  %3586 = vtanh.f32 %v4404_v15 }
 0x134   :  { %v4411_v22 = vpop.f32.mrf.mxu0  ;;  %1129 = vmatmul.mubr.bf16.gmra.mxu0 %v4048_v16  ;;  %v4423_v51 = vpop.f32.mrf.mxu1  ;;  %1330 = vmatmul.mubr.bf16.gmra.mxu1 %v4048_v16  ;;  %6385 = vst [vmem:[#allocation57_spill] sm:$0xff] %v4428_v4  ;;  %6386 = vst [vmem:[#allocation58_spill] sm:$0xff] %v4431_v55  ;;  %v4442_v16 = vmul.f32 %v1671_v63, %v4327_v28  ;;  %v1678_v8 = vmul.f32 %v1546_v35, %v4382_v39  ;;  %v1547_v55 = vmul.f32 0.044715, %v4396_v46 }
 0x135   :  { %6382 = vst [vmem:[#allocation54_spill] sm:$0xff] %v4411_v22  ;;  %6384 = vst [vmem:[#allocation56_spill] sm:$0xff] %v4423_v51  ;;  %1138 = vmatprep.mubr.bf16.mxu0 %v6369_v29  ;;  %1339 = vmatprep.mubr.bf16.mxu1 %v6369_v29  ;;  %v1550_v12 = vmul.f32 0.044715, %v4411_v22  ;;  %v4449_v24 = vadd.f32 %v1804_v30, %v4321_v27  ;;  %v1806_v26 = vmul.f32 %v1674_v44, %v4340_v50 }
 0x136   :  { %v4435_v53 = vpop.f32.mrf.mxu0  ;;  %6388 = vst [vmem:[#allocation60_spill] sm:$0xff] %v4439_v59  ;;  %6389 = vst [vmem:[#allocation61_spill] sm:$0xff] %v4442_v16  ;;  %v4446_v9 = vpop.f32.mrf.mxu1  ;;  %v1552_v25 = vmul.f32 0.044715, %v4423_v51  ;;  %v4457_v63 = vmul.f32 %v1673_v41, %v4332_v33  ;;  %v1808_v35 = vmul.f32 %v1676_v40, %v4348_v1  ;;  %v1680_v16 = vmul.f32 %v1548_v49, %v4390_v31 }
 0x137   :  { %6387 = vst [vmem:[#allocation59_spill] sm:$0xff] %v4435_v53  ;;  %6390 = vst [vmem:[#allocation62_spill] sm:$0xff] %v4446_v9  ;;  %v1551_v28 = vmul.f32 0.044715, %v4435_v53  ;;  %v1807_v30 = vmul.f32 %v1675_v14, %v4363_v37  ;;  %v1809_v44 = vmul.f32 %v1677_v10, %v4374_v21  ;;  %v1549_v27 = vmul.f32 0.044715, %v4401_v38 }
 0x138   :  { %6391 = vst [vmem:[#allocation63_spill] sm:$0xff] %v4449_v24  ;;  %v4454_v32 = vpop.f32.mrf.mxu0  ;;  %6393 = vst [vmem:[#allocation65_spill] sm:$0xff] %v4457_v63  ;;  %v4462_v59 = vpop.f32.mrf.mxu1  ;;  %v1553_v24 = vmul.f32 0.044715, %v4446_v9  ;;  %v1810_v41 = vmul.f32 %v1678_v8, %v4382_v39  ;;  %v1682_v40 = vmul.f32 %v1550_v12, %v4411_v22  ;;  %v2302_v33 = vadd.f32 1.0, %v3583_v47 }
 0x139   :  { %6392 = vst [vmem:[#allocation64_spill] sm:$0xff] %v4454_v32  ;;  %6394 = vst [vmem:[#allocation66_spill] sm:$0xff] %v4462_v59  ;;  %v1554_v49 = vmul.f32 0.044715, %v4454_v32  ;;  %v4476_v45 = vadd.f32 %v1806_v26, %v4340_v50  ;;  %v1679_v14 = vmul.f32 %v1547_v55, %v4396_v46  ;;  %v1684_v10 = vmul.f32 %v1552_v25, %v4423_v51 }
 0x13a   :  { %v4468_v4 = vpop.f32.mrf.mxu0  ;;  %v4473_v63 = vpop.f32.mrf.mxu1  ;;  %v2304_v42 = vadd.f32 1.0, %v3585_v7  ;;  %v4484_v8 = vadd.f32 %v1808_v35, %v4348_v1  ;;  %v1812_v12 = vmul.f32 %v1680_v16, %v4390_v31  ;;  %v1683_v5 = vmul.f32 %v1551_v28, %v4435_v53 }
 0x13b   :  { %6395 = vst [vmem:[#allocation67_spill] sm:$0xff] %v4468_v4  ;;  %6396 = vst [vmem:[#allocation68_spill] sm:$0xff] %v4473_v63  ;;  %v1556_v47 = vmul.f32 0.044715, %v4462_v59  ;;  %v4494_v55 = vadd.f32 %v1807_v30, %v4363_v37  ;;  %v4497_v7 = vadd.f32 %v1809_v44, %v4374_v21  ;;  %v1681_v25 = vmul.f32 %v1549_v27, %v4401_v38 }
 0x13c   :  { %v4480_v36 = vpop.f32.mrf.mxu0  ;;  %1139 = vmatmul.mubr.bf16.gmra.mxu0 %v4054_v17  ;;  %v4489_v26 = vpop.f32.mrf.mxu1  ;;  %1340 = vmatmul.mubr.bf16.gmra.mxu1 %v4054_v17  ;;  %v1685_v16 = vmul.f32 %v1553_v24, %v4446_v9  ;;  %v4505_v28 = vadd.f32 %v1810_v41, %v4382_v39  ;;  %v1814_v17 = vmul.f32 %v1682_v40, %v4411_v22  ;;  %v1555_v30 = vmul.f32 0.044715, %v4468_v4 }
 0x13d   :  { %6397 = vst [vmem:[#allocation69_spill] sm:$0xff] %v4480_v36  ;;  %6398 = vst [vmem:[#allocation70_spill] sm:$0xff] %v4489_v26  ;;  %1148 = vmatprep.mubr.bf16.mxu0 %v6369_v29  ;;  %1349 = vmatprep.mubr.bf16.mxu1 %v6369_v29  ;;  %v1686_v1 = vmul.f32 %v1554_v49, %v4454_v32  ;;  %v4513_v44 = vmul.f32 %v1679_v14, %v4396_v46  ;;  %v1558_v24 = vmul.f32 0.044715, %v4480_v36 }
 0x13e   :  { %6399 = vst [vmem:[#allocation71_spill] sm:$0xff] %v4497_v7  ;;  %v4501_v35 = vpop.f32.mrf.mxu0  ;;  %6401 = vst [vmem:[#allocation73_spill] sm:$0xff] %v4505_v28  ;;  %v4510_v37 = vpop.f32.mrf.mxu1  ;;  %v1816_v27 = vmul.f32 %v1684_v10, %v4423_v51  ;;  %v1560_v21 = vmul.f32 0.044715, %v4489_v26  ;;  %v4521_v41 = vadd.f32 %v1812_v12, %v4390_v31  ;;  %v1815_v40 = vmul.f32 %v1683_v5, %v4435_v53 }
 0x13f   :  { %6400 = vst [vmem:[#allocation72_spill] sm:$0xff] %v4501_v35  ;;  %6402 = vst [vmem:[#allocation74_spill] sm:$0xff] %v4510_v37  ;;  %v1688_v49 = vmul.f32 %v1556_v47, %v4462_v59  ;;  %v1557_v39 = vmul.f32 0.044715, %v4473_v63  ;;  %v4529_v14 = vmul.f32 %v1681_v25, %v4401_v38  ;;  %v1817_v10 = vmul.f32 %v1685_v16, %v4446_v9 }
 0x140   :  { %6403 = vst [vmem:[#allocation75_spill] sm:$0xff] %v4513_v44  ;;  %v4518_v7 = vpop.f32.mrf.mxu0  ;;  %6405 = vst [vmem:[#allocation77_spill] sm:$0xff] %v4521_v41  ;;  %v4526_v28 = vpop.f32.mrf.mxu1  ;;  %v1559_v44 = vmul.f32 0.044715, %v4501_v35  ;;  %v4536_v12 = vmul.f32 %v2302_v33, %v4174_v23  ;;  %v4539_v5 = vadd.f32 %v1814_v17, %v4411_v22  ;;  %v1818_v47 = vmul.f32 %v1686_v1, %v4454_v32 }
 0x141   :  { %6404 = vst [vmem:[#allocation76_spill] sm:$0xff] %v4518_v7  ;;  %6406 = vst [vmem:[#allocation78_spill] sm:$0xff] %v4526_v28  ;;  %v1687_v31 = vmul.f32 %v1555_v30, %v4468_v4  ;;  %v4546_v25 = vmul.f32 %v2304_v42, %v4195_v34  ;;  %v4549_v16 = vadd.f32 %v1816_v27, %v4423_v51  ;;  %v1561_v33 = vmul.f32 0.044715, %v4510_v37 }
 0x142   :  { %6407 = vst [vmem:[#allocation79_spill] sm:$0xff] %v4529_v14  ;;  %v4533_v46 = vpop.f32.mrf.mxu0  ;;  %v4543_v41 = vpop.f32.mrf.mxu1  ;;  %v1690_v14 = vmul.f32 %v1558_v24, %v4480_v36  ;;  %v1692_v23 = vmul.f32 %v1560_v21, %v4489_v26  ;;  %v4558_v1 = vadd.f32 %v1815_v40, %v4435_v53  ;;  %v1820_v30 = vmul.f32 %v1688_v49, %v4462_v59 }
 0x143   :  { %6408 = vst [vmem:[#allocation80_spill] sm:$0xff] %v4533_v46  ;;  %6409 = vst [vmem:[#allocation81_spill] sm:$0xff] %v4543_v41  ;;  %v1689_v34 = vmul.f32 %v1557_v39, %v4473_v63  ;;  %v4567_v21 = vmul.f32 0.5, %v4146_v56  ;;  %v4570_v27 = vadd.f32 %v1817_v10, %v4446_v9  ;;  %v1691_v24 = vmul.f32 %v1559_v44, %v4501_v35 }
 0x144   :  { %v4554_v17 = vpop.f32.mrf.mxu0  ;;  %1149 = vmatmul.mubr.bf16.gmra.mxu0 %v4060_v18  ;;  %v4562_v42 = vpop.f32.mrf.mxu1  ;;  %1350 = vmatmul.mubr.bf16.gmra.mxu1 %v4060_v18  ;;  %v1562_v40 = vmul.f32 0.044715, %v4518_v7  ;;  %v4579_v18 = vadd.f32 %v1818_v47, %v4454_v32  ;;  %v4582_v39 = vmul.f32 %v1687_v31, %v4468_v4  ;;  %v1564_v56 = vmul.f32 0.044715, %v4526_v28 }
 0x145   :  { %6410 = vst [vmem:[#allocation82_spill] sm:$0xff] %v4554_v17  ;;  %6411 = vst [vmem:[#allocation83_spill] sm:$0xff] %v4562_v42  ;;  %1158 = vmatprep.mubr.bf16.mxu0 %v6369_v29  ;;  %1359 = vmatprep.mubr.bf16.mxu1 %v6369_v29  ;;  %3588 = vtanh.f32 %v4415_v60  ;;  %v1822_v44 = vmul.f32 %v1690_v14, %v4480_v36  ;;  %v1824_v10 = vmul.f32 %v1692_v23, %v4489_v26 }
 0x146   :  { %6412 = vst [vmem:[#allocation84_spill] sm:$0xff] %v4570_v27  ;;  %v4574_v53 = vpop.f32.mrf.mxu0  ;;  %6414 = vst [vmem:[#allocation86_spill] sm:$0xff] %v4579_v18  ;;  %v4585_v49 = vpop.f32.mrf.mxu1  ;;  %v1693_v9 = vmul.f32 %v1561_v33, %v4510_v37  ;;  %v1566_v15 = vmul.f32 0.044715, %v4554_v17  ;;  %v4595_v47 = vadd.f32 %v1820_v30, %v4462_v59  ;;  %v4598_v31 = vmul.f32 %v1689_v34, %v4473_v63 }
 0x147   :  { %6413 = vst [vmem:[#allocation85_spill] sm:$0xff] %v4574_v53  ;;  %6415 = vst [vmem:[#allocation87_spill] sm:$0xff] %v4582_v39  ;;  %v1568_v32 = vmul.f32 0.044715, %v4562_v42  ;;  %v1567_v60 = vmul.f32 0.044715, %v4574_v53  ;;  %v1823_v14 = vmul.f32 %v1691_v24, %v4501_v35  ;;  %v1694_v23 = vmul.f32 %v1562_v40, %v4518_v7 }
 0x148   :  { %6416 = vst [vmem:[#allocation88_spill] sm:$0xff] %v4585_v49  ;;  %v4592_v51 = vpop.f32.mrf.mxu0  ;;  %6418 = vst [vmem:[#allocation90_spill] sm:$0xff] %v4595_v47  ;;  %v4602_v22 = vpop.f32.mrf.mxu1  ;;  %v1569_v33 = vmul.f32 0.044715, %v4585_v49  ;;  %v2042_v30 = vmul.f32 0.7978846, %v4233_v13  ;;  %v1696_v59 = vmul.f32 %v1564_v56, %v4526_v28  ;;  %v4617_v24 = vadd.f32 %v1822_v44, %v4480_v36 }
 0x149   :  { %6417 = vst [vmem:[#allocation89_spill] sm:$0xff] %v4592_v51  ;;  %6419 = vst [vmem:[#allocation91_spill] sm:$0xff] %v4598_v31  ;;  %v1563_v34 = vmul.f32 0.044715, %v4533_v46  ;;  %v1570_v31 = vmul.f32 0.044715, %v4592_v51  ;;  %v4620_v40 = vadd.f32 %v1824_v10, %v4489_v26  ;;  %v1825_v47 = vmul.f32 %v1693_v9, %v4510_v37 }
 0x14a   :  { %6420 = vst [vmem:[#allocation92_spill] sm:$0xff] %v4602_v22  ;;  %v4607_v39 = vpop.f32.mrf.mxu0  ;;  %v4613_v63 = vpop.f32.mrf.mxu1  ;;  %v2044_v4 = vmul.f32 0.7978846, %v4243_v6  ;;  %v1698_v13 = vmul.f32 %v1566_v15, %v4554_v17  ;;  %v1565_v56 = vmul.f32 0.044715, %v4543_v41  ;;  %v1700_v27 = vmul.f32 %v1568_v32, %v4562_v42 }
 0x14b   :  { %6421 = vst [vmem:[#allocation93_spill] sm:$0xff] %v4607_v39  ;;  %6422 = vst [vmem:[#allocation94_spill] sm:$0xff] %v4613_v63  ;;  %v1699_v6 = vmul.f32 %v1567_v60, %v4574_v53  ;;  %v1572_v44 = vmul.f32 0.044715, %v4602_v22  ;;  %v4636_v9 = vadd.f32 %v1823_v14, %v4501_v35  ;;  %v1826_v10 = vmul.f32 %v1694_v23, %v4518_v7 }
 0x14c   :  { %6423 = vst [vmem:[#allocation95_spill] sm:$0xff] %v4620_v40  ;;  %v4624_v18 = vpop.f32.mrf.mxu0  ;;  %1159 = vmatmul.mubr.bf16.gmra.mxu0 %v4066_v19  ;;  %v4631_v36 = vpop.f32.mrf.mxu1  ;;  %1360 = vmatmul.mubr.bf16.gmra.mxu1 %v4066_v19  ;;  %v1701_v15 = vmul.f32 %v1569_v33, %v4585_v49  ;;  %3590 = vtanh.f32 %v2042_v30  ;;  %v1828_v32 = vmul.f32 %v1696_v59, %v4526_v28 }
 0x14d   :  { %6424 = vst [vmem:[#allocation96_spill] sm:$0xff] %v4624_v18  ;;  %6425 = vst [vmem:[#allocation97_spill] sm:$0xff] %v4631_v36  ;;  %1168 = vmatprep.mubr.bf16.mxu0 %v6369_v29  ;;  %1369 = vmatprep.mubr.bf16.mxu1 %v6369_v29  ;;  %v4645_v60 = vmul.f32 %v1563_v34, %v4533_v46  ;;  %v1702_v19 = vmul.f32 %v1570_v31, %v4592_v51  ;;  %3592 = vtanh.f32 %v2044_v4 }
 0x14e   :  { %6426 = vst [vmem:[#allocation98_spill] sm:$0xff] %v4636_v9  ;;  %v4640_v26 = vpop.f32.mrf.mxu0  ;;  %v4648_v40 = vpop.f32.mrf.mxu1  ;;  %v4651_v14 = vadd.f32 %v1825_v47, %v4510_v37  ;;  %v1830_v23 = vmul.f32 %v1698_v13, %v4554_v17  ;;  %v1574_v33 = vmul.f32 0.044715, %v4624_v18  ;;  %v1576_v29 = vmul.f32 0.044715, %v4631_v36 }
 0x14f   :  { %6427 = vst [vmem:[#allocation99_spill] sm:$0xff] %v4640_v26  ;;  %6428 = vst [vmem:[#allocation100_spill] sm:$0xff] %v4645_v60  ;;  %v1832_v59 = vmul.f32 %v1700_v27, %v4562_v42  ;;  %v1831_v34 = vmul.f32 %v1699_v6, %v4574_v53  ;;  %v1704_v31 = vmul.f32 %v1572_v44, %v4602_v22  ;;  %v1575_v35 = vmul.f32 0.044715, %v4640_v26  ;;  %v3587_v27 = vpop.eup %3586 }
 0x150   :  { %6429 = vst [vmem:[#allocation101_spill] sm:$0xff] %v4648_v40  ;;  %6430 = vst [vmem:[#allocation102_spill] sm:$0xff] %v4651_v14  ;;  %v4656_v30 = vpop.f32.mrf.mxu0  ;;  %v4662_v4 = vpop.f32.mrf.mxu1  ;;  %v4665_v47 = vadd.f32 %v1826_v10, %v4518_v7  ;;  %v4668_v13 = vmul.f32 %v1565_v56, %v4543_v41  ;;  %v1833_v37 = vmul.f32 %v1701_v15, %v4585_v49  ;;  %v1571_v60 = vmul.f32 0.044715, %v4607_v39 }
 0x151   :  { %6431 = vst [vmem:[#allocation103_spill] sm:$0xff] %v4656_v30  ;;  %6432 = vst [vmem:[#allocation104_spill] sm:$0xff] %v4662_v4  ;;  %v4675_v6 = vadd.f32 %v1828_v32, %v4526_v28  ;;  %v1834_v44 = vmul.f32 %v1702_v19, %v4592_v51  ;;  %v1573_v14 = vmul.f32 0.044715, %v4613_v63  ;;  %v1577_v10 = vmul.f32 0.044715, %v4648_v40 }
 0x152   :  { %6433 = vst [vmem:[#allocation105_spill] sm:$0xff] %v4665_v47  ;;  %6434 = vst [vmem:[#allocation106_spill] sm:$0xff] %v4668_v13  ;;  %v4672_v46 = vpop.f32.mrf.mxu0  ;;  %v4680_v7 = vpop.f32.mrf.mxu1  ;;  %v4683_v13 = vadd.f32 %v1830_v23, %v4554_v17  ;;  %v1706_v15 = vmul.f32 %v1574_v33, %v4624_v18  ;;  %v1708_v41 = vmul.f32 %v1576_v29, %v4631_v36  ;;  %v1578_v47 = vmul.f32 0.044715, %v4656_v30 }
 0x153   :  { %6435 = vst [vmem:[#allocation107_spill] sm:$0xff] %v4672_v46  ;;  %6436 = vst [vmem:[#allocation108_spill] sm:$0xff] %v4675_v6  ;;  %v3589_v56 = vpop.eup %3588  ;;  %v4692_v19 = vadd.f32 %v1832_v59, %v4562_v42  ;;  %v4695_v28 = vadd.f32 %v1831_v34, %v4574_v53  ;;  %v1836_v6 = vmul.f32 %v1704_v31, %v4602_v22  ;;  %v1580_v59 = vmul.f32 0.044715, %v4662_v4 }
 0x154   :  { %6437 = vst [vmem:[#allocation109_spill] sm:$0xff] %v4680_v7  ;;  %6438 = vst [vmem:[#allocation110_spill] sm:$0xff] %v4683_v13  ;;  %v4688_v32 = vpop.f32.mrf.mxu0  ;;  %1169 = vmatmul.mubr.bf16.gmra.mxu0 %v4072_v20  ;;  %v1707_v23 = vmul.f32 %v1575_v35, %v4640_v26  ;;  %v4699_v17 = vpop.f32.mrf.mxu1  ;;  %1370 = vmatmul.mubr.bf16.gmra.mxu1 %v4072_v20  ;;  %v4703_v33 = vadd.f32 %v1833_v37, %v4585_v49  ;;  %v2303_v34 = vadd.f32 1.0, %v3587_v27 }
 0x155   :  { %6439 = vst [vmem:[#allocation111_spill] sm:$0xff] %v4688_v32  ;;  %6440 = vst [vmem:[#allocation112_spill] sm:$0xff] %v4692_v19  ;;  %v4706_v29 = vmul.f32 %v1571_v60, %v4607_v39  ;;  %v4712_v53 = vadd.f32 %v1834_v44, %v4592_v51  ;;  %v4715_v35 = vmul.f32 %v1573_v14, %v4613_v63  ;;  %v2305_v37 = vadd.f32 1.0, %v3589_v56 }
 0x156   :  { %6441 = vst [vmem:[#allocation113_spill] sm:$0xff] %v4695_v28  ;;  %6442 = vst [vmem:[#allocation114_spill] sm:$0xff] %v4699_v17  ;;  %v4709_v42 = vpop.f32.mrf.mxu0  ;;  %v1709_v31 = vmul.f32 %v1577_v10, %v4648_v40  ;;  %v4718_v20 = vpop.f32.mrf.mxu1  ;;  %v1838_v49 = vmul.f32 %v1706_v15, %v4624_v18  ;;  %v1840_v60 = vmul.f32 %v1708_v41, %v4631_v36  ;;  %v1582_v39 = vmul.f32 0.044715, %v4688_v32 }
 0x157   :  { %6443 = vst [vmem:[#allocation115_spill] sm:$0xff] %v4703_v33  ;;  %6444 = vst [vmem:[#allocation116_spill] sm:$0xff] %v4706_v29  ;;  %v1710_v29 = vmul.f32 %v1578_v47, %v4656_v30  ;;  %v4727_v44 = vadd.f32 %v1836_v6, %v4602_v22  ;;  %v1839_v14 = vmul.f32 %v1707_v23, %v4640_v26  ;;  %v1584_v10 = vmul.f32 0.044715, %v4699_v17 }
 0x158   :  { %6445 = vst [vmem:[#allocation117_spill] sm:$0xff] %v4709_v42  ;;  %6446 = vst [vmem:[#allocation118_spill] sm:$0xff] %v4712_v53  ;;  %v4724_v27 = vpop.f32.mrf.mxu0  ;;  %v1583_v51 = vmul.f32 0.044715, %v4709_v42  ;;  %v4732_v56 = vpop.f32.mrf.mxu1  ;;  %v1712_v15 = vmul.f32 %v1580_v59, %v4662_v4  ;;  %v1579_v41 = vmul.f32 0.044715, %v4672_v46  ;;  %v4740_v63 = vmul.f32 %v2303_v34, %v4219_v54 }
 0x159   :  { %6447 = vst [vmem:[#allocation119_spill] sm:$0xff] %v4715_v35  ;;  %6448 = vst [vmem:[#allocation120_spill] sm:$0xff] %v4718_v20  ;;  %v1585_v47 = vmul.f32 0.044715, %v4718_v20  ;;  %v3591_v6 = vpop.eup %3590  ;;  %v1841_v23 = vmul.f32 %v1709_v31, %v4648_v40  ;;  %v1581_v22 = vmul.f32 0.044715, %v4680_v7  ;;  %v4748_v59 = vmul.f32 %v2305_v37, %v4230_v62 }
 0x15a   :  { %6449 = vst [vmem:[#allocation121_spill] sm:$0xff] %v4724_v27  ;;  %6450 = vst [vmem:[#allocation122_spill] sm:$0xff] %v4727_v44  ;;  %v4737_v35 = vpop.f32.mrf.mxu0  ;;  %v1586_v44 = vmul.f32 0.044715, %v4724_v27  ;;  %v4745_v53 = vpop.f32.mrf.mxu1  ;;  %v4751_v28 = vadd.f32 %v1838_v49, %v4624_v18  ;;  %v4754_v19 = vadd.f32 %v1840_v60, %v4631_v36  ;;  %v1842_v54 = vmul.f32 %v1710_v29, %v4656_v30 }
 0x15b   :  { %6451 = vst [vmem:[#allocation123_spill] sm:$0xff] %v4732_v56  ;;  %6452 = vst [vmem:[#allocation124_spill] sm:$0xff] %v4737_v35  ;;  %v3593_v33 = vpop.eup %3592  ;;  %v1714_v34 = vmul.f32 %v1582_v39, %v4688_v32  ;;  %v4761_v13 = vadd.f32 %v1839_v14, %v4640_v26  ;;  %v1716_v9 = vmul.f32 %v1584_v10, %v4699_v17  ;;  %v1588_v37 = vmul.f32 0.044715, %v4732_v56 }
 0x15c   :  { %6453 = vst [vmem:[#allocation125_spill] sm:$0xff] %v4745_v53  ;;  %v4758_v31 = vpop.f32.mrf.mxu0  ;;  %v1715_v62 = vmul.f32 %v1583_v51, %v4709_v42  ;;  %v4766_v49 = vpop.f32.mrf.mxu1  ;;  %v1844_v60 = vmul.f32 %v1712_v15, %v4662_v4  ;;  %v4770_v36 = vmul.f32 %v1579_v41, %v4672_v46  ;;  %v1717_v39 = vmul.f32 %v1585_v47, %v4718_v20 }
 0x15d   :  { %6454 = vst [vmem:[#allocation126_spill] sm:$0xff] %v4758_v31  ;;  %6455 = vst [vmem:[#allocation127_spill] sm:$0xff] %v4761_v13  ;;  %v2306_v18 = vadd.f32 1.0, %v3591_v6  ;;  %v4776_v14 = vadd.f32 %v1841_v23, %v4648_v40  ;;  %v4779_v10 = vmul.f32 %v1581_v22, %v4680_v7  ;;  %v1718_v51 = vmul.f32 %v1586_v44, %v4724_v27 }
 0x15e   :  { %6456 = vst [vmem:[#allocation128_spill] sm:$0xff] %v4766_v49  ;;  %6457 = vst [vmem:[#allocation129_spill] sm:$0xff] %v4770_v36  ;;  %v4773_v29 = vpop.f32.mrf.mxu0  ;;  %v4782_v26 = vpop.f32.mrf.mxu1  ;;  %v2308_v13 = vadd.f32 1.0, %v3593_v33  ;;  %v4785_v15 = vadd.f32 %v1842_v54, %v4656_v30  ;;  %v1846_v41 = vmul.f32 %v1714_v34, %v4688_v32  ;;  %v1590_v47 = vmul.f32 0.044715, %v4758_v31 }
 0x15f   :  { %6458 = vst [vmem:[#allocation130_spill] sm:$0xff] %v4773_v29  ;;  %6459 = vst [vmem:[#allocation131_spill] sm:$0xff] %v4776_v14  ;;  %v1592_v6 = vmul.f32 0.044715, %v4766_v49  ;;  %v1848_v23 = vmul.f32 %v1716_v9, %v4699_v17  ;;  %v1847_v22 = vmul.f32 %v1715_v62, %v4709_v42  ;;  %v1720_v44 = vmul.f32 %v1588_v37, %v4732_v56 }
 0x160   :  { %6460 = vst [vmem:[#allocation132_spill] sm:$0xff] %v4779_v10  ;;  %6461 = vst [vmem:[#allocation133_spill] sm:$0xff] %v4782_v26  ;;  %v4790_v36 = vpop.f32.mrf.mxu0  ;;  %v1587_v40 = vmul.f32 0.044715, %v4737_v35  ;;  %v4796_v33 = vpop.f32.mrf.mxu1  ;;  %v4799_v54 = vadd.f32 %v1844_v60, %v4662_v4  ;;  %v1849_v34 = vmul.f32 %v1717_v39, %v4718_v20  ;;  %v1591_v30 = vmul.f32 0.044715, %v4773_v29 }
 0x161   :  { %6462 = vst [vmem:[#allocation134_spill] sm:$0xff] %v4785_v15  ;;  %6463 = vst [vmem:[#allocation135_spill] sm:$0xff] %v4790_v36  ;;  %v4806_v7 = vmul.f32 %v2306_v18, %v4353_v0  ;;  %v1850_v9 = vmul.f32 %v1718_v51, %v4724_v27  ;;  %v1589_v62 = vmul.f32 0.044715, %v4745_v53  ;;  %v1593_v37 = vmul.f32 0.044715, %v4782_v26 }
 0x162   :  { %6464 = vst [vmem:[#allocation136_spill] sm:$0xff] %v4796_v33  ;;  %6465 = vst [vmem:[#allocation137_spill] sm:$0xff] %v4799_v54  ;;  %v4803_v10 = vpop.f32.mrf.mxu0  ;;  %v4811_v46 = vpop.f32.mrf.mxu1  ;;  %v4814_v60 = vmul.f32 %v2308_v13, %v4567_v21  ;;  %v4817_v39 = vadd.f32 %v1846_v41, %v4688_v32  ;;  %v1722_v4 = vmul.f32 %v1590_v47, %v4758_v31  ;;  %v1594_v0 = vmul.f32 0.044715, %v4790_v36 }
 0x163   :  { %6466 = vst [vmem:[#allocation138_spill] sm:$0xff] %v4803_v10  ;;  %6467 = vst [vmem:[#allocation139_spill] sm:$0xff] %v4811_v46  ;;  %v1724_v54 = vmul.f32 %v1592_v6, %v4766_v49  ;;  %v4825_v51 = vadd.f32 %v1848_v23, %v4699_v17  ;;  %v4828_v15 = vadd.f32 %v1847_v22, %v4709_v42  ;;  %v1596_v32 = vmul.f32 0.044715, %v4796_v33 }
 0x164   :  { %6468 = vst [vmem:[#allocation140_spill] sm:$0xff] %v4817_v39  ;;  %v4822_v18 = vpop.f32.mrf.mxu0  ;;  %v1852_v21 = vmul.f32 %v1720_v44, %v4732_v56  ;;  %v4832_v13 = vmul.f32 %v1587_v40, %v4737_v35  ;;  %v4834_v41 = vpop.f32.mrf.mxu1  ;;  %v4837_v47 = vadd.f32 %v1849_v34, %v4718_v20  ;;  %v1723_v6 = vmul.f32 %v1591_v30, %v4773_v29 }
 0x165   :  { %6469 = vst [vmem:[#allocation141_spill] sm:$0xff] %v4822_v18  ;;  %6470 = vst [vmem:[#allocation142_spill] sm:$0xff] %v4825_v51  ;;  %v1911_v23 = vadd.f32 %v4236_v48, %v4149_v58  ;;  %v4846_v22 = vadd.f32 %v1850_v9, %v4724_v27  ;;  %v4849_v40 = vmul.f32 %v1589_v62, %v4745_v53  ;;  %v1598_v34 = vmul.f32 0.044715, %v4822_v18 }
 0x166   :  { %6471 = vst [vmem:[#allocation143_spill] sm:$0xff] %v4828_v15  ;;  %6472 = vst [vmem:[#allocation144_spill] sm:$0xff] %v4832_v13  ;;  %v4841_v39 = vpop.f32.mrf.mxu0  ;;  %v1725_v44 = vmul.f32 %v1593_v37, %v4782_v26  ;;  %v4853_v20 = vpop.f32.mrf.mxu1  ;;  %v1854_v30 = vmul.f32 %v1722_v4, %v4758_v31  ;;  %v1856_v13 = vmul.f32 %v1724_v54, %v4766_v49  ;;  %v1600_v48 = vmul.f32 0.044715, %v4834_v41 }
 0x167   :  { %6473 = vst [vmem:[#allocation145_spill] sm:$0xff] %v4834_v41  ;;  %6474 = vst [vmem:[#allocation146_spill] sm:$0xff] %v4837_v47  ;;  %v1726_v35 = vmul.f32 %v1594_v0, %v4790_v36  ;;  %v4862_v9 = vadd.f32 %v1852_v21, %v4732_v56  ;;  %v1599_v62 = vmul.f32 0.044715, %v4841_v39  ;;  %v4868_v27 = vmul.f32 0.5, %v4149_v58 }
 0x168   :  { %6475 = vst [vmem:[#allocation147_spill] sm:$0xff] %v4841_v39  ;;  %6476 = vst [vmem:[#allocation148_spill] sm:$0xff] %v4846_v22  ;;  %v4859_v42 = vpop.f32.mrf.mxu0  ;;  %v4865_v37 = vpop.f32.mrf.mxu1  ;;  %v4871_v4 = vmul.f32 0.5, %v4152_v61  ;;  %v1855_v54 = vmul.f32 %v1723_v6, %v4773_v29  ;;  %v1728_v0 = vmul.f32 %v1596_v32, %v4796_v33  ;;  %v2043_v21 = vmul.f32 0.7978846, %v1911_v23 }
 0x169   :  { %6477 = vst [vmem:[#allocation149_spill] sm:$0xff] %v4849_v40  ;;  %6478 = vst [vmem:[#allocation150_spill] sm:$0xff] %v4853_v20  ;;  %v1595_v40 = vmul.f32 0.044715, %v4803_v10  ;;  %v1857_v56 = vmul.f32 %v1725_v44, %v4782_v26  ;;  %v1730_v17 = vmul.f32 %v1598_v34, %v4822_v18  ;;  %v1601_v58 = vmul.f32 0.044715, %v4853_v20 }
 0x16a   :  { %6479 = vst [vmem:[#allocation151_spill] sm:$0xff] %v4859_v42  ;;  %6480 = vst [vmem:[#allocation152_spill] sm:$0xff] %v4862_v9  ;;  %v4876_v53 = vpop.f32.mrf.mxu0  ;;  %v1597_v9 = vmul.f32 0.044715, %v4811_v46  ;;  %v4882_v22 = vpop.f32.mrf.mxu1  ;;  %v4885_v47 = vadd.f32 %v1854_v30, %v4758_v31  ;;  %v4888_v32 = vadd.f32 %v1856_v13, %v4766_v49  ;;  %v1858_v6 = vmul.f32 %v1726_v35, %v4790_v36 }
 0x16b   :  { %6481 = vst [vmem:[#allocation153_spill] sm:$0xff] %v4865_v37  ;;  %6482 = vst [vmem:[#allocation154_spill] sm:$0xff] %v4876_v53  ;;  %v1732_v23 = vmul.f32 %v1600_v48, %v4834_v41  ;;  %v1731_v44 = vmul.f32 %v1599_v62, %v4841_v39  ;;  %v1602_v34 = vmul.f32 0.044715, %v4859_v42  ;;  %v1604_v51 = vmul.f32 0.044715, %v4865_v37 }
 0x16c   :  { %6483 = vst [vmem:[#allocation155_spill] sm:$0xff] %v4882_v22  ;;  %6484 = vst [vmem:[#allocation156_spill] sm:$0xff] %v4885_v47  ;;  %v4892_v15 = vpop.f32.mrf.mxu0  ;;  %v4897_v14 = vpop.f32.mrf.mxu1  ;;  %v1913_v30 = vadd.f32 %v4251_v11, %v4152_v61  ;;  %v4902_v13 = vadd.f32 %v1855_v54, %v4773_v29  ;;  %v1860_v35 = vmul.f32 %v1728_v0, %v4796_v33  ;;  %3594 = vtanh.f32 %v2043_v21 }
 0x16d   :  { %6485 = vst [vmem:[#allocation157_spill] sm:$0xff] %v4888_v32  ;;  %6486 = vst [vmem:[#allocation158_spill] sm:$0xff] %v4892_v15  ;;  %v4906_v48 = vmul.f32 %v1595_v40, %v4803_v10  ;;  %v4911_v62 = vadd.f32 %v1857_v56, %v4782_v26  ;;  %v4914_v31 = vmul.f32 %v1597_v9, %v4811_v46  ;;  %v1606_v0 = vmul.f32 0.044715, %v4892_v15 }
 0x16e   :  { %6487 = vst [vmem:[#allocation159_spill] sm:$0xff] %v4897_v14  ;;  %6488 = vst [vmem:[#allocation160_spill] sm:$0xff] %v4902_v13  ;;  %v4908_v49 = vpop.f32.mrf.mxu0  ;;  %v1862_v32 = vmul.f32 %v1730_v17, %v4822_v18  ;;  %v1733_v61 = vmul.f32 %v1601_v58, %v4853_v20  ;;  %v4918_v11 = vpop.f32.mrf.mxu1  ;;  %v4921_v54 = vadd.f32 %v1858_v6, %v4790_v36  ;;  %v4928_v56 = vmul.f32 0.5, %v4159_v2 }
 0x16f   :  { %6489 = vst [vmem:[#allocation161_spill] sm:$0xff] %v4906_v48  ;;  %6490 = vst [vmem:[#allocation162_spill] sm:$0xff] %v4908_v49  ;;  %v1864_v40 = vmul.f32 %v1732_v23, %v4834_v41  ;;  %v1863_v9 = vmul.f32 %v1731_v44, %v4841_v39  ;;  %v1734_v17 = vmul.f32 %v1602_v34, %v4859_v42  ;;  %v2045_v29 = vmul.f32 0.7978846, %v1913_v30 }
 0x170   :  { %6491 = vst [vmem:[#allocation163_spill] sm:$0xff] %v4911_v62  ;;  %6492 = vst [vmem:[#allocation164_spill] sm:$0xff] %v4914_v31  ;;  %v4925_v21 = vpop.f32.mrf.mxu0  ;;  %v1736_v58 = vmul.f32 %v1604_v51, %v4865_v37  ;;  %v4933_v26 = vpop.f32.mrf.mxu1  ;;  %v4936_v6 = vadd.f32 %v1860_v35, %v4796_v33  ;;  %v1608_v23 = vmul.f32 0.044715, %v4897_v14  ;;  %v1607_v36 = vmul.f32 0.044715, %v4908_v49 }
 0x171   :  { %6493 = vst [vmem:[#allocation165_spill] sm:$0xff] %v4918_v11  ;;  %6494 = vst [vmem:[#allocation166_spill] sm:$0xff] %v4921_v54  ;;  %v2046_v2 = vmul.f32 0.7978846, %v4270_v43  ;;  %v4944_v44 = vadd.f32 %v1862_v32, %v4822_v18  ;;  %v1865_v34 = vmul.f32 %v1733_v61, %v4853_v20  ;;  %v1603_v51 = vmul.f32 0.044715, %v4876_v53 }
 0x172   :  { %6495 = vst [vmem:[#allocation167_spill] sm:$0xff] %v4925_v21  ;;  %6496 = vst [vmem:[#allocation168_spill] sm:$0xff] %v4933_v26  ;;  %v4940_v31 = vpop.f32.mrf.mxu0  ;;  %v1609_v30 = vmul.f32 0.044715, %v4918_v11  ;;  %v4949_v46 = vpop.f32.mrf.mxu1  ;;  %v4952_v35 = vadd.f32 %v1864_v40, %v4834_v41  ;;  %v1605_v33 = vmul.f32 0.044715, %v4882_v22  ;;  %v1738_v48 = vmul.f32 %v1606_v0, %v4892_v15 }
 0x173   :  { %6497 = vst [vmem:[#allocation169_spill] sm:$0xff] %v4936_v6  ;;  %6498 = vst [vmem:[#allocation170_spill] sm:$0xff] %v4940_v31  ;;  %v1610_v43 = vmul.f32 0.044715, %v4925_v21  ;;  %v4960_v32 = vadd.f32 %v1863_v9, %v4841_v39  ;;  %v1866_v61 = vmul.f32 %v1734_v17, %v4859_v42  ;;  %v1868_v18 = vmul.f32 %v1736_v58, %v4865_v37 }
 0x174   :  { %6499 = vst [vmem:[#allocation171_spill] sm:$0xff] %v4944_v44  ;;  %6500 = vst [vmem:[#allocation172_spill] sm:$0xff] %v4949_v46  ;;  %v4957_v10 = vpop.f32.mrf.mxu0  ;;  %v4964_v44 = vpop.f32.mrf.mxu1  ;;  %3596 = vtanh.f32 %v2045_v29  ;;  %v1740_v40 = vmul.f32 %v1608_v23, %v4897_v14  ;;  %v1739_v41 = vmul.f32 %v1607_v36, %v4908_v49  ;;  %v1612_v0 = vmul.f32 0.044715, %v4933_v26 }
 0x175   :  { %6501 = vst [vmem:[#allocation173_spill] sm:$0xff] %v4952_v35  ;;  %6502 = vst [vmem:[#allocation174_spill] sm:$0xff] %v4957_v10  ;;  %3598 = vtanh.f32 %v2046_v2  ;;  %v4972_v6 = vadd.f32 %v1865_v34, %v4853_v20  ;;  %v4975_v9 = vmul.f32 %v1603_v51, %v4876_v53  ;;  %v1741_v17 = vmul.f32 %v1609_v30, %v4918_v11 }
 0x176   :  { %6503 = vst [vmem:[#allocation175_spill] sm:$0xff] %v4960_v32  ;;  %6504 = vst [vmem:[#allocation176_spill] sm:$0xff] %v4964_v44  ;;  %v4969_v35 = vpop.f32.mrf.mxu0  ;;  %v1614_v58 = vmul.f32 0.044715, %v4957_v10  ;;  %v4979_v29 = vpop.f32.mrf.mxu1  ;;  %v4982_v23 = vmul.f32 %v1605_v33, %v4882_v22  ;;  %v1870_v36 = vmul.f32 %v1738_v48, %v4892_v15  ;;  %v1742_v39 = vmul.f32 %v1610_v43, %v4925_v21 }
 0x177   :  { %6505 = vst [vmem:[#allocation177_spill] sm:$0xff] %v4969_v35  ;;  %6506 = vst [vmem:[#allocation178_spill] sm:$0xff] %v4972_v6  ;;  %v1616_v2 = vmul.f32 0.044715, %v4964_v44  ;;  %v4990_v51 = vadd.f32 %v1866_v61, %v4859_v42  ;;  %v4993_v30 = vadd.f32 %v1868_v18, %v4865_v37  ;;  %v1615_v20 = vmul.f32 0.044715, %v4969_v35 }
 0x178   :  { %6507 = vst [vmem:[#allocation179_spill] sm:$0xff] %v4975_v9  ;;  %6508 = vst [vmem:[#allocation180_spill] sm:$0xff] %v4979_v29  ;;  %v4987_v34 = vpop.f32.mrf.mxu0  ;;  %v4996_v9 = vpop.f32.mrf.mxu1  ;;  %v2048_v33 = vmul.f32 0.7978846, %v4279_v52  ;;  %v1872_v48 = vmul.f32 %v1740_v40, %v4897_v14  ;;  %v1871_v43 = vmul.f32 %v1739_v41, %v4908_v49  ;;  %v5005_v61 = vmul.f32 0.5, %v4162_v3 }
 0x179   :  { %6509 = vst [vmem:[#allocation181_spill] sm:$0xff] %v4982_v23  ;;  %6510 = vst [vmem:[#allocation182_spill] sm:$0xff] %v4987_v34  ;;  %v1744_v23 = vmul.f32 %v1612_v0, %v4933_v26  ;;  %v3595_v42 = vpop.eup %3594  ;;  %v1873_v18 = vmul.f32 %v1741_v17, %v4918_v11  ;;  %v1611_v37 = vmul.f32 0.044715, %v4940_v31  ;;  %v1746_v53 = vmul.f32 %v1614_v58, %v4957_v10 }
 0x17a   :  { %6511 = vst [vmem:[#allocation183_spill] sm:$0xff] %v4990_v51  ;;  %6512 = vst [vmem:[#allocation184_spill] sm:$0xff] %v4993_v30  ;;  %v5002_v22 = vpop.f32.mrf.mxu0  ;;  %v1617_v52 = vmul.f32 0.044715, %v4979_v29  ;;  %v5011_v6 = vpop.f32.mrf.mxu1  ;;  %v5014_v41 = vadd.f32 %v1870_v36, %v4892_v15  ;;  %v1874_v40 = vmul.f32 %v1742_v39, %v4925_v21  ;;  %v1613_v0 = vmul.f32 0.044715, %v4949_v46 }
 0x17b   :  { %6513 = vst [vmem:[#allocation185_spill] sm:$0xff] %v4996_v9  ;;  %6514 = vst [vmem:[#allocation186_spill] sm:$0xff] %v5002_v22  ;;  %v1748_v3 = vmul.f32 %v1616_v2, %v4964_v44  ;;  %v1747_v17 = vmul.f32 %v1615_v20, %v4969_v35  ;;  %v1618_v51 = vmul.f32 0.044715, %v4987_v34  ;;  %v1620_v58 = vmul.f32 0.044715, %v4996_v9 }
 0x17c   :  { %6515 = vst [vmem:[#allocation187_spill] sm:$0xff] %v5011_v6  ;;  %6516 = vst [vmem:[#allocation188_spill] sm:$0xff] %v5014_v41  ;;  %v5019_v30 = vpop.f32.mrf.mxu0  ;;  %v5024_v32 = vpop.f32.mrf.mxu1  ;;  %3600 = vtanh.f32 %v2048_v33  ;;  %v5027_v36 = vadd.f32 %v1872_v48, %v4897_v14  ;;  %v5030_v39 = vadd.f32 %v1871_v43, %v4908_v49  ;;  %v1876_v15 = vmul.f32 %v1744_v23, %v4933_v26 }
 0x17d   :  { %6517 = vst [vmem:[#allocation189_spill] sm:$0xff] %v5019_v30  ;;  %6518 = vst [vmem:[#allocation190_spill] sm:$0xff] %v5024_v32  ;;  %v2307_v41 = vadd.f32 1.0, %v3595_v42  ;;  %v5036_v20 = vadd.f32 %v1873_v18, %v4918_v11  ;;  %v5039_v54 = vmul.f32 %v1611_v37, %v4940_v31  ;;  %v1878_v62 = vmul.f32 %v1746_v53, %v4957_v10 }
 0x17e   :  { %6519 = vst [vmem:[#allocation191_spill] sm:$0xff] %v5027_v36  ;;  %6520 = vst [vmem:[#allocation192_spill] sm:$0xff] %v5030_v39  ;;  %v5033_v2 = vpop.f32.mrf.mxu0  ;;  %v1749_v33 = vmul.f32 %v1617_v52, %v4979_v29  ;;  %v5043_v48 = vpop.f32.mrf.mxu1  ;;  %v5046_v43 = vadd.f32 %v1874_v40, %v4925_v21  ;;  %v5049_v23 = vmul.f32 %v1613_v0, %v4949_v46  ;;  %v1622_v18 = vmul.f32 0.044715, %v5019_v30 }
 0x17f   :  { %6521 = vst [vmem:[#allocation193_spill] sm:$0xff] %v5033_v2  ;;  %6522 = vst [vmem:[#allocation194_spill] sm:$0xff] %v5036_v20  ;;  %v1880_v42 = vmul.f32 %v1748_v3, %v4964_v44  ;;  %v1879_v37 = vmul.f32 %v1747_v17, %v4969_v35  ;;  %v1750_v53 = vmul.f32 %v1618_v51, %v4987_v34  ;;  %v1624_v49 = vmul.f32 0.044715, %v5024_v32 }
 0x180   :  { %6523 = vst [vmem:[#allocation195_spill] sm:$0xff] %v5039_v54  ;;  %6524 = vst [vmem:[#allocation196_spill] sm:$0xff] %v5043_v48  ;;  %v5053_v11 = vpop.f32.mrf.mxu0  ;;  %v1752_v52 = vmul.f32 %v1620_v58, %v4996_v9  ;;  %v5059_v14 = vpop.f32.mrf.mxu1  ;;  %v5062_v0 = vadd.f32 %v1876_v15, %v4933_v26  ;;  %v1619_v3 = vmul.f32 0.044715, %v5002_v22  ;;  %v1623_v21 = vmul.f32 0.044715, %v5033_v2 }
 0x181   :  { %6525 = vst [vmem:[#allocation197_spill] sm:$0xff] %v5046_v43  ;;  %6526 = vst [vmem:[#allocation198_spill] sm:$0xff] %v5049_v23  ;;  %v3597_v40 = vpop.eup %3596  ;;  %v5069_v17 = vmul.f32 %v2307_v41, %v4868_v27  ;;  %v5072_v58 = vadd.f32 %v1878_v62, %v4957_v10  ;;  %v1881_v46 = vmul.f32 %v1749_v33, %v4979_v29  ;;  %v1625_v54 = vmul.f32 0.044715, %v5043_v48 }
 0x182   :  { %6527 = vst [vmem:[#allocation199_spill] sm:$0xff] %v5053_v11  ;;  %6528 = vst [vmem:[#allocation200_spill] sm:$0xff] %v5059_v14  ;;  %v5066_v23 = vpop.f32.mrf.mxu0  ;;  %v3599_v51 = vpop.eup %3598  ;;  %v1626_v15 = vmul.f32 0.044715, %v5053_v11  ;;  %v5080_v31 = vadd.f32 %v1880_v42, %v4964_v44  ;;  %v1754_v27 = vmul.f32 %v1622_v18, %v5019_v30  ;;  %v1628_v41 = vmul.f32 0.044715, %v5059_v14 }
 0x183   :  { %6529 = vst [vmem:[#allocation201_spill] sm:$0xff] %v5062_v0  ;;  %6530 = vst [vmem:[#allocation202_spill] sm:$0xff] %v5066_v23  ;;  %v5077_v26 = vpop.f32.mrf.mxu1  ;;  %v1621_v0 = vmul.f32 0.044715, %v5011_v6  ;;  %v5088_v62 = vadd.f32 %v1879_v37, %v4969_v35  ;;  %v1882_v33 = vmul.f32 %v1750_v53, %v4987_v34  ;;  %v1884_v10 = vmul.f32 %v1752_v52, %v4996_v9 }
 0x184   :  { %6531 = vst [vmem:[#allocation203_spill] sm:$0xff] %v5072_v58  ;;  %6532 = vst [vmem:[#allocation204_spill] sm:$0xff] %v5077_v26  ;;  %v5085_v43 = vpop.f32.mrf.mxu0  ;;  %v1756_v58 = vmul.f32 %v1624_v49, %v5024_v32  ;;  %v5096_v42 = vmul.f32 %v1619_v3, %v5002_v22  ;;  %v1755_v18 = vmul.f32 %v1623_v21, %v5033_v2  ;;  %v2310_v39 = vadd.f32 1.0, %v3599_v51 }
 0x185   :  { %6533 = vst [vmem:[#allocation205_spill] sm:$0xff] %v5080_v31  ;;  %6534 = vst [vmem:[#allocation206_spill] sm:$0xff] %v5085_v43  ;;  %v5093_v20 = vpop.f32.mrf.mxu1  ;;  %v2309_v31 = vadd.f32 1.0, %v3597_v40  ;;  %v5102_v37 = vadd.f32 %v1881_v46, %v4979_v29  ;;  %v1757_v53 = vmul.f32 %v1625_v54, %v5043_v48  ;;  %v1758_v52 = vmul.f32 %v1626_v15, %v5053_v11 }
 0x186   :  { %6535 = vst [vmem:[#allocation207_spill] sm:$0xff] %v5088_v62  ;;  %6536 = vst [vmem:[#allocation208_spill] sm:$0xff] %v5093_v20  ;;  %v5099_v44 = vpop.f32.mrf.mxu0  ;;  %v1630_v49 = vmul.f32 0.044715, %v5085_v43  ;;  %v5110_v3 = vmul.f32 %v1621_v0, %v5011_v6  ;;  %v1886_v21 = vmul.f32 %v1754_v27, %v5019_v30  ;;  %v1632_v40 = vmul.f32 0.044715, %v5093_v20 }
 0x187   :  { %6537 = vst [vmem:[#allocation209_spill] sm:$0xff] %v5096_v42  ;;  %6538 = vst [vmem:[#allocation210_spill] sm:$0xff] %v5099_v44  ;;  %v5107_v35 = vpop.f32.mrf.mxu1  ;;  %v1760_v42 = vmul.f32 %v1628_v41, %v5059_v14  ;;  %v5118_v46 = vadd.f32 %v1882_v33, %v4987_v34  ;;  %v5121_v54 = vadd.f32 %v1884_v10, %v4996_v9  ;;  %v1631_v29 = vmul.f32 0.044715, %v5099_v44 }
 0x188   :  { %6539 = vst [vmem:[#allocation211_spill] sm:$0xff] %v5102_v37  ;;  %6540 = vst [vmem:[#allocation212_spill] sm:$0xff] %v5107_v35  ;;  %v5115_v51 = vpop.f32.mrf.mxu0  ;;  %v1888_v15 = vmul.f32 %v1756_v58, %v5024_v32  ;;  %v1887_v27 = vmul.f32 %v1755_v18, %v5033_v2  ;;  %v1627_v41 = vmul.f32 0.044715, %v5066_v23  ;;  %v5132_v22 = vmul.f32 %v2309_v31, %v4871_v4 }
 0x189   :  { %6541 = vst [vmem:[#allocation213_spill] sm:$0xff] %v5110_v3  ;;  %6542 = vst [vmem:[#allocation214_spill] sm:$0xff] %v5115_v51  ;;  %v5125_v0 = vpop.f32.mrf.mxu1  ;;  %v3601_v3 = vpop.eup %3600  ;;  %v5135_v33 = vmul.f32 %v2310_v39, %v4928_v56  ;;  %v1889_v10 = vmul.f32 %v1757_v53, %v5043_v48  ;;  %v1890_v58 = vmul.f32 %v1758_v52, %v5053_v11  ;;  %v1629_v9 = vmul.f32 0.044715, %v5077_v26 }
 0x18a   :  { %6543 = vst [vmem:[#allocation215_spill] sm:$0xff] %v5118_v46  ;;  %6544 = vst [vmem:[#allocation216_spill] sm:$0xff] %v5121_v54  ;;  %v5129_v6 = vpop.f32.mrf.mxu0  ;;  %v1762_v34 = vmul.f32 %v1630_v49, %v5085_v43  ;;  %v5144_v18 = vadd.f32 %v1886_v21, %v5019_v30  ;;  %v1892_v37 = vmul.f32 %v1760_v42, %v5059_v14  ;;  %v1633_v4 = vmul.f32 0.044715, %v5107_v35 }
 0x18b   :  { %6545 = vst [vmem:[#allocation217_spill] sm:$0xff] %v5125_v0  ;;  %6546 = vst [vmem:[#allocation218_spill] sm:$0xff] %v5129_v6  ;;  %v5141_v54 = vpop.f32.mrf.mxu1  ;;  %v1764_v31 = vmul.f32 %v1632_v40, %v5093_v20  ;;  %v5152_v39 = vadd.f32 %v1888_v15, %v5024_v32  ;;  %v1763_v53 = vmul.f32 %v1631_v29, %v5099_v44  ;;  %v2312_v49 = vadd.f32 1.0, %v3601_v3 }
 0x18c   :  { %6547 = vst [vmem:[#allocation219_spill] sm:$0xff] %v5141_v54  ;;  %6548 = vst [vmem:[#allocation220_spill] sm:$0xff] %v5144_v18  ;;  %v5149_v56 = vpop.f32.mrf.mxu0  ;;  %v2047_v46 = vmul.f32 0.7978846, %v4282_v57  ;;  %v5159_v21 = vadd.f32 %v1887_v27, %v5033_v2  ;;  %v5162_v42 = vmul.f32 %v1627_v41, %v5066_v23  ;;  %v1634_v40 = vmul.f32 0.044715, %v5115_v51 }
 0x18d   :  { %6549 = vst [vmem:[#allocation221_spill] sm:$0xff] %v5149_v56  ;;  %6550 = vst [vmem:[#allocation222_spill] sm:$0xff] %v5152_v39  ;;  %v5155_v52 = vpop.f32.mrf.mxu1  ;;  %v1636_v30 = vmul.f32 0.044715, %v5125_v0  ;;  %v5169_v15 = vadd.f32 %v1889_v10, %v5043_v48  ;;  %v5172_v29 = vadd.f32 %v1890_v58, %v5053_v11  ;;  %v5175_v57 = vmul.f32 %v1629_v9, %v5077_v26  ;;  %v6560_v10 = vld [vmem:[#allocation12_spill] sm:$0xff] }
 0x18e   :  { %6551 = vst [vmem:[#allocation223_spill] sm:$0xff] %v5155_v52  ;;  %6552 = vst [vmem:[#allocation224_spill] sm:$0xff] %v5159_v21  ;;  %v5166_v18 = vpop.f32.mrf.mxu0  ;;  %v1894_v3 = vmul.f32 %v1762_v34, %v5085_v43  ;;  %v5181_v41 = vadd.f32 %v1892_v37, %v5059_v14  ;;  %v1896_v2 = vmul.f32 %v1764_v31, %v5093_v20  ;;  %v5186_v48 = vmul.f32 0.5, %v6560_v10  ;;  %v6561_v34 = vld [vmem:[#allocation28_spill] sm:$0xff]  ;;  %v6579_v21 = vld [vmem:[#allocation42_spill] sm:$0xff] }
 0x18f   :  { %6553 = vst [vmem:[#allocation225_spill] sm:$0xff] %v5162_v42  ;;  %6554 = vst [vmem:[#allocation226_spill] sm:$0xff] %v5166_v18  ;;  %v5178_v27 = vpop.f32.mrf.mxu1  ;;  %v1765_v32 = vmul.f32 %v1633_v4, %v5107_v35  ;;  %v1895_v58 = vmul.f32 %v1763_v53, %v5099_v44  ;;  %v5190_v9 = vmul.f32 %v2312_v49, %v5005_v61  ;;  %3602 = vtanh.f32 %v2047_v46  ;;  %v6564_v61 = vld [vmem:[#allocation31_spill] sm:$0xff] }
 0x190   :  { %6555 = vst [vmem:[#allocation227_spill] sm:$0xff] %v5169_v15  ;;  %6556 = vst [vmem:[#allocation228_spill] sm:$0xff] %v5172_v29  ;;  %v772_v42 = vpop.f32.mrf.mxu0  ;;  %v1766_v37 = vmul.f32 %v1634_v40, %v5115_v51  ;;  %v1768_v14 = vmul.f32 %v1636_v30, %v5125_v0  ;;  %v1635_v31 = vmul.f32 0.044715, %v5129_v6  ;;  %v5198_v10 = vadd.f32 %v1894_v3, %v5085_v43 }
 0x191   :  { %6557 = vst [vmem:[#allocation229_spill] sm:$0xff] %v5175_v57  ;;  %6558 = vst [vmem:[#allocation230_spill] sm:$0xff] %v5178_v27  ;;  %v973_v11 = vpop.f32.mrf.mxu1  ;;  %v2049_v57 = vmul.f32 0.7978846, %v6561_v34  ;;  %v6562_v42 = vld [vmem:[#allocation29_spill] sm:$0xff]  ;;  %v5203_v49 = vadd.f32 %v1896_v2, %v5093_v20  ;;  %v5206_v40 = vmul.f32 %v1765_v32, %v5107_v35 }
 0x192   :  { %6559 = vst [vmem:[#allocation231_spill] sm:$0xff] %v5181_v41  ;;  %v773_v4 = vpop.f32.mrf.mxu0  ;;  %v2050_v26 = vmul.f32 0.7978846, %v6562_v42  ;;  %6563 = vst [vmem:[#allocation12_spill] sm:$0xff] %v5198_v10  ;;  %v1638_v11 = vmul.f32 0.044715, %v5149_v56  ;;  %v5218_v2 = vmul.f32 %v1766_v37, %v5115_v51  ;;  %v5221_v32 = vmul.f32 %v1768_v14, %v5125_v0 }
 0x193   :  { %v974_v53 = vpop.f32.mrf.mxu1  ;;  %3604 = vtanh.f32 %v2049_v57  ;;  %v2052_v46 = vmul.f32 0.7978846, %v6564_v61  ;;  %6565 = vst [vmem:[#allocation28_spill] sm:$0xff] %v5203_v49  ;;  %6566 = vst [vmem:[#allocation29_spill] sm:$0xff] %v5206_v40  ;;  %v1640_v30 = vmul.f32 0.044715, %v5155_v52  ;;  %v5210_v4 = vadd.f32 %v1895_v58, %v5099_v44 }
 0x194   :  { %v1010_v34 = vpop.f32.mrf.mxu0  ;;  %3606 = vtanh.f32 %v2050_v26  ;;  %v5213_v3 = vmul.f32 0.044715, %v5141_v54  ;;  %v6569_v57 = vld [vmem:[#allocation16_spill] sm:$0xff]  ;;  %v5224_v20 = vmul.f32 %v1635_v31, %v5129_v6  ;;  %v6574_v58 = vld [vmem:[#allocation17_spill] sm:$0xff]  ;;  %v6575_v44 = vld [vmem:[#allocation34_spill] sm:$0xff] }
 0x195   :  { %6567 = vst [vmem:[#allocation31_spill] sm:$0xff] %v5210_v4  ;;  %v1211_v42 = vpop.f32.mrf.mxu1  ;;  %3608 = vtanh.f32 %v2052_v46  ;;  %v6570_v53 = vld [vmem:[#allocation32_spill] sm:$0xff]  ;;  %6571 = vst [vmem:[#allocation16_spill] sm:$0xff] %v5218_v2  ;;  %v1921_v43 = vadd.f32 %v6575_v44, %v6574_v58  ;;  %v1770_v4 = vmul.f32 %v1638_v11, %v5149_v56  ;;  %v1639_v46 = vmul.f32 0.044715, %v5166_v18 }
 0x196   :  { %6568 = vst [vmem:[#allocation232_spill] sm:$0xff] %v5213_v3  ;;  %v1919_v61 = vadd.f32 %v6570_v53, %v6569_v57  ;;  %6572 = vst [vmem:[#allocation32_spill] sm:$0xff] %v5221_v32  ;;  %v1012_v26 = vpop.f32.mrf.mxu0  ;;  %v6576_v53 = vld [vmem:[#allocation39_spill] sm:$0xff]  ;;  %v5232_v37 = vmul.f32 %v1640_v30, %v5155_v52  ;;  %v1641_v14 = vmul.f32 0.044715, %v5178_v27  ;;  %v2566_v31 = vmul.f32 %v4536_v12, %v1010_v34  ;;  %v6578_v41 = vld [vmem:[#allocation40_spill] sm:$0xff] }
 0x197   :  { %6573 = vst [vmem:[#allocation233_spill] sm:$0xff] %v5224_v20  ;;  %v1213_v49 = vpop.f32.mrf.mxu1  ;;  %v2054_v15 = vmul.f32 0.7978846, %v6576_v53  ;;  %v2053_v6 = vmul.f32 0.7978846, %v1921_v43  ;;  %v2568_v23 = vmul.f32 %v4546_v25, %v1211_v42  ;;  %v6596_v0 = vld [vmem:[#allocation20_spill] sm:$0xff] }
 0x198   :  { %v2051_v10 = vmul.f32 0.7978846, %v1919_v61  ;;  %6577 = vst [vmem:[#allocation17_spill] sm:$0xff] %v5232_v37  ;;  %v1014_v20 = vpop.f32.mrf.mxu0  ;;  %v2056_v39 = vmul.f32 0.7978846, %v6578_v41  ;;  %v2567_v61 = vmul.f32 %v4740_v63, %v1012_v26  ;;  %v2569_v12 = vmul.f32 %v4748_v59, %v1213_v49  ;;  %v6580_v41 = vld [vmem:[#allocation43_spill] sm:$0xff] }
 0x199   :  { %v2570_v44 = vmul.f32 %v4806_v7, %v1014_v20  ;;  %v1215_v11 = vpop.f32.mrf.mxu1  ;;  %v2055_v29 = vmul.f32 0.7978846, %v6579_v21  ;;  %v2057_v42 = vmul.f32 0.7978846, %v6580_v41  ;;  %v6581_v63 = vld [vmem:[#allocation45_spill] sm:$0xff]  ;;  %v6585_v49 = vld [vmem:[#allocation14_spill] sm:$0xff] }
 0x19a   :  { %3610 = vtanh.f32 %v2051_v10  ;;  %v2572_v53 = vmul.f32 %v4814_v60, %v1215_v11  ;;  %v1016_v30 = vpop.f32.mrf.mxu0  ;;  %v2058_v26 = vmul.f32 0.7978846, %v6581_v63  ;;  %v5248_v60 = vmul.f32 %v1770_v4, %v5149_v56  ;;  %v6583_v11 = vld [vmem:[#allocation13_spill] sm:$0xff]  ;;  %v6586_v4 = vld [vmem:[#allocation15_spill] sm:$0xff]  ;;  %v6591_v63 = vld [vmem:[#allocation50_spill] sm:$0xff] }
 0x19b   :  { %3612 = vtanh.f32 %v2053_v6  ;;  %v2698_v34 = vpack.c.bf16 %v2570_v44, %v2566_v31  ;;  %v2571_v43 = vmul.f32 %v5069_v17, %v1016_v30  ;;  %v1217_v25 = vpop.f32.mrf.mxu1  ;;  %v5251_v59 = vmul.f32 0.5, %v6583_v11  ;;  %v6587_v30 = vld [vmem:[#allocation48_spill] sm:$0xff]  ;;  %v6590_v41 = vld [vmem:[#allocation25_spill] sm:$0xff] }
 0x19c   :  { %3614 = vtanh.f32 %v2054_v15  ;;  %v2700_v7 = vpack.c.bf16 %v2572_v53, %v2568_v23  ;;  %v2573_v20 = vmul.f32 %v5132_v22, %v1217_v25  ;;  %v1020_v10 = vpop.f32.mrf.mxu0  ;;  %6582 = vst [vmem:[#allocation34_spill] sm:$0xff] %v5248_v60  ;;  %v3603_v17 = vpop.eup %3602  ;;  %v5254_v15 = vmul.f32 %v1639_v46, %v5166_v18  ;;  %v6588_v25 = vld [vmem:[#allocation24_spill] sm:$0xff]  ;;  %v6595_v56 = vld [vmem:[#allocation53_spill] sm:$0xff] }
 0x19d   :  { %v2699_v6 = vpack.c.bf16 %v2571_v43, %v2567_v61  ;;  %v1221_v21 = vpop.f32.mrf.mxu1  ;;  %3616 = vtanh.f32 %v2056_v39  ;;  %v1390_v31 = vmul.f32 0.5, %v6585_v49  ;;  %v1392_v61 = vmul.f32 0.5, %v6586_v4 }
 0x19e   :  { %6584 = vst [vmem:[#allocation39_spill] sm:$0xff] %v5254_v15  ;;  %v2701_v23 = vpack.c.bf16 %v2573_v20, %v2569_v12  ;;  %v5256_v22 = vpop.f32.mrf.mxu0  ;;  %3618 = vtanh.f32 %v2055_v29  ;;  %v1391_v53 = vmul.f32 0.5, %v6569_v57  ;;  %v2060_v39 = vmul.f32 0.7978846, %v6587_v30  ;;  %v6589_v20 = vld [vmem:[#allocation46_spill] sm:$0xff]  ;;  %v6593_v30 = vld [vmem:[#allocation19_spill] sm:$0xff] }
 0x19f   :  { %v5259_v44 = vpop.f32.mrf.mxu1  ;;  %3054 = vmatprep.mubr.bf16.mxu0 %v2699_v6  ;;  %3620 = vtanh.f32 %v2058_v26  ;;  %v1393_v12 = vmul.f32 0.5, %v6574_v58  ;;  %v1927_v29 = vadd.f32 %v6589_v20, %v6588_v25  ;;  %v1929_v6 = vadd.f32 %v6591_v63, %v6590_v41  ;;  %v6592_v57 = vld [vmem:[#allocation18_spill] sm:$0xff] }
 0x1a0   :  { %v3605_v43 = vpop.eup %3604  ;;  %3222 = vmatprep.mubr.bf16.mxu1 %v2701_v23  ;;  %v1024_v46 = vpop.f32.mrf.mxu0  ;;  %3055 = vmatmul.mubr.bf16.vlgmr.msra.gmra.mxu0 %v2698_v34  ;;  %3622 = vtanh.f32 %v2057_v42  ;;  %v2311_v49 = vadd.f32 1.0, %v3603_v17  ;;  %v5270_v26 = vmul.f32 0.5, %v6592_v57  ;;  %v5273_v23 = vmul.f32 0.5, %v6593_v30  ;;  %v6597_v57 = vld [vmem:[#allocation21_spill] sm:$0xff]  ;;  %v6598_v30 = vld [vmem:[#allocation22_spill] sm:$0xff] }
 0x1a1   :  { %v3607_v11 = vpop.eup %3606  ;;  %v1225_v4 = vpop.f32.mrf.mxu1  ;;  %3223 = vmatmul.mubr.bf16.vlgmr.msra.gmra.mxu1 %v2700_v7  ;;  %3624 = vtanh.f32 %v2060_v39  ;;  %v5276_v58 = vmul.f32 %v1641_v14, %v5178_v27  ;;  %v2059_v20 = vmul.f32 0.7978846, %v1927_v29  ;;  %v2061_v60 = vmul.f32 0.7978846, %v1929_v6  ;;  %v6599_v29 = vld [vmem:[#allocation55_spill] sm:$0xff] }
 0x1a2   :  { %v3609_v34 = vpop.eup %3608  ;;  %v1026_v42 = vpop.f32.mrf.mxu0  ;;  %v2062_v63 = vmul.f32 0.7978846, %v6595_v56  ;;  %v2314_v32 = vadd.f32 1.0, %v3607_v11  ;;  %v5280_v7 = vmul.f32 0.5, %v6596_v0  ;;  %v5283_v62 = vmul.f32 0.5, %v6597_v57  ;;  %v6600_v57 = vld [vmem:[#allocation57_spill] sm:$0xff] }
 0x1a3   :  { %6594 = vst [vmem:[#allocation40_spill] sm:$0xff] %v5276_v58  ;;  %v1227_v17 = vpop.f32.mrf.mxu1  ;;  %v5286_v2 = vmul.f32 0.5, %v6598_v30  ;;  %v5289_v39 = vmul.f32 %v5135_v33, %v1020_v10  ;;  %v2316_v14 = vadd.f32 1.0, %v3609_v34  ;;  %3626 = vtanh.f32 %v2059_v20  ;;  %v6601_v10 = vld [vmem:[#allocation23_spill] sm:$0xff] }
 0x1a4   :  { %v5291_v51 = vpop.f32.mrf.mxu0  ;;  %v2064_v56 = vmul.f32 0.7978846, %v6599_v29  ;;  %v5295_v6 = vmul.f32 %v5190_v9, %v1221_v21  ;;  %v2313_v0 = vadd.f32 1.0, %v3605_v43  ;;  %3628 = vtanh.f32 %v2061_v60 }
 0x1a5   :  { %v5297_v11 = vpop.f32.mrf.mxu1  ;;  %v2063_v3 = vmul.f32 0.7978846, %v6600_v57  ;;  %v2443_v54 = vmul.f32 %v2311_v49, %v5186_v48  ;;  %v5304_v34 = vmul.f32 0.5, %v6601_v10  ;;  %v5307_v20 = vmul.f32 0.5, %v6588_v25  ;;  %v6602_v57 = vld [vmem:[#allocation60_spill] sm:$0xff]  ;;  %v6603_v10 = vld [vmem:[#allocation58_spill] sm:$0xff] }
 0x1a6   :  { %v5301_v33 = vpop.f32.mrf.mxu0  ;;  %3630 = vtanh.f32 %v2062_v63  ;;  %v2446_v21 = vmul.f32 %v2314_v32, %v1390_v31  ;;  %v5312_v60 = vmul.f32 0.5, %v6590_v41  ;;  %v2066_v40 = vmul.f32 0.7978846, %v6602_v57 }
 0x1a7   :  { %v3611_v30 = vpop.eup %3610  ;;  %v5309_v29 = vpop.f32.mrf.mxu1  ;;  %v2448_v49 = vmul.f32 %v2316_v14, %v1392_v61  ;;  %3632 = vtanh.f32 %v2064_v56  ;;  %v2065_v25 = vmul.f32 0.7978846, %v6603_v10  ;;  %v2575_v63 = vmul.f32 %v2443_v54, %v5256_v22  ;;  %v6604_v10 = vld [vmem:[#allocation63_spill] sm:$0xff]  ;;  %v6605_v22 = vld [vmem:[#allocation37_spill] sm:$0xff] }
 0x1a8   :  { %v3613_v9 = vpop.eup %3612  ;;  %v2315_v43 = vadd.f32 1.0, %v3611_v30  ;;  %v5315_v58 = vpop.f32.mrf.mxu0  ;;  %v2445_v32 = vmul.f32 %v2313_v0, %v5251_v59  ;;  %3634 = vtanh.f32 %v2063_v3  ;;  %v2578_v27 = vmul.f32 %v2446_v21, %v1024_v46  ;;  %v6606_v59 = vld [vmem:[#allocation61_spill] sm:$0xff] }
 0x1a9   :  { %v3615_v48 = vpop.eup %3614  ;;  %v2317_v35 = vadd.f32 1.0, %v3613_v9  ;;  %v5320_v30 = vpop.f32.mrf.mxu1  ;;  %v2580_v15 = vmul.f32 %v2448_v49, %v1225_v4  ;;  %3636 = vtanh.f32 %v2066_v40  ;;  %v2068_v54 = vmul.f32 0.7978846, %v6604_v10  ;;  %v6608_v40 = vld [vmem:[#allocation27_spill] sm:$0xff] }
 0x1aa   :  { %v2447_v31 = vmul.f32 %v2315_v43, %v1391_v53  ;;  %v3617_v41 = vpop.eup %3616  ;;  %v2318_v18 = vadd.f32 1.0, %v3615_v48  ;;  %v5322_v61 = vpop.f32.mrf.mxu0  ;;  %v1935_v53 = vadd.f32 %v6606_v59, %v6605_v22  ;;  %v2577_v3 = vmul.f32 %v2445_v32, %v5259_v44 }
 0x1ab   :  { %v2449_v57 = vmul.f32 %v2317_v35, %v1393_v12  ;;  %v3619_v14 = vpop.eup %3618  ;;  %v5324_v56 = vpop.f32.mrf.mxu1  ;;  %v6607_v35 = vld [vmem:[#allocation26_spill] sm:$0xff]  ;;  %3638 = vtanh.f32 %v2065_v25  ;;  %v2320_v21 = vadd.f32 1.0, %v3617_v41  ;;  %v5338_v49 = vmul.f32 0.5, %v6608_v40 }
 0x1ac   :  { %v2579_v9 = vmul.f32 %v2447_v31, %v1026_v42  ;;  %v3621_v0 = vpop.eup %3620  ;;  %v5330_v46 = vpop.f32.mrf.mxu0  ;;  %v5333_v12 = vmul.f32 0.5, %v6607_v35  ;;  %v6609_v31 = vld [vmem:[#allocation30_spill] sm:$0xff]  ;;  %v2702_v44 = vpack.c.bf16 %v2578_v27, %v5289_v39  ;;  %v2067_v25 = vmul.f32 0.7978846, %v1935_v53 }
 0x1ad   :  { %v2581_v43 = vmul.f32 %v2449_v57, %v1227_v17  ;;  %v3623_v4 = vpop.eup %3622  ;;  %v5335_v48 = vpop.f32.mrf.mxu1  ;;  %v5341_v10 = vmul.f32 0.5, %v6609_v31  ;;  %v2704_v17 = vpack.c.bf16 %v2580_v15, %v5295_v6  ;;  %v2319_v41 = vadd.f32 1.0, %v3619_v14  ;;  %v6610_v27 = vld [vmem:[#allocation38_spill] sm:$0xff]  ;;  %v6611_v15 = vld [vmem:[#allocation65_spill] sm:$0xff]  ;;  %v6613_v14 = vld [vmem:[#allocation35_spill] sm:$0xff] }
 0x1ae   :  { %v2703_v42 = vpack.c.bf16 %v2579_v9, %v2575_v63  ;;  %v3625_v59 = vpop.eup %3624  ;;  %v5345_v57 = vpop.f32.mrf.mxu0  ;;  %v2450_v63 = vmul.f32 %v2318_v18, %v5270_v26  ;;  %v2322_v9 = vadd.f32 1.0, %v3621_v0  ;;  %3640 = vtanh.f32 %v2068_v54  ;;  %v6612_v18 = vld [vmem:[#allocation33_spill] sm:$0xff] }
 0x1af   :  { %v2705_v32 = vpack.c.bf16 %v2581_v43, %v2577_v3  ;;  %v5348_v35 = vpop.f32.mrf.mxu1  ;;  %v2321_v40 = vadd.f32 1.0, %v3623_v4  ;;  %v2324_v31 = vadd.f32 1.0, %v3625_v59  ;;  %3642 = vtanh.f32 %v2067_v25  ;;  %v6614_v3 = vld [vmem:[#allocation36_spill] sm:$0xff] }
 0x1b0   :  { %3062 = vmatprep.mubr.bf16.mxu0 %v2703_v42  ;;  %v5350_v37 = vpop.f32.mrf.mxu0  ;;  %v1937_v39 = vadd.f32 %v6611_v15, %v6610_v27  ;;  %v3627_v6 = vpop.eup %3626  ;;  %v2452_v53 = vmul.f32 %v2320_v21, %v5273_v23  ;;  %v5356_v26 = vmul.f32 0.5, %v6612_v18  ;;  %v5359_v0 = vmul.f32 0.5, %v6613_v14 }
 0x1b1   :  { %3230 = vmatprep.mubr.bf16.mxu1 %v2705_v32  ;;  %3063 = vmatmul.mubr.bf16.gmra.mxu0 %v2702_v44  ;;  %v5361_v54 = vpop.f32.mrf.mxu1  ;;  %v5364_v43 = vmul.f32 0.5, %v6614_v3  ;;  %v3629_v4 = vpop.eup %3628  ;;  %v2582_v42 = vmul.f32 %v2450_v63, %v5291_v51  ;;  %v2323_v59 = vadd.f32 1.0, %v3627_v6  ;;  %v5370_v23 = vmul.f32 0.5, %v6605_v22 }
 0x1b2   :  { %3231 = vmatmul.mubr.bf16.gmra.mxu1 %v2704_v17  ;;  %v5367_v44 = vpop.f32.mrf.mxu0  ;;  %v2069_v21 = vmul.f32 0.7978846, %v1937_v39  ;;  %v2584_v32 = vmul.f32 %v2452_v53, %v5297_v11  ;;  %v2451_v25 = vmul.f32 %v2319_v41, %v5280_v7  ;;  %v2454_v15 = vmul.f32 %v2322_v9, %v5286_v2 }
 0x1b3   :  { %v3631_v17 = vpop.eup %3630  ;;  %v2325_v18 = vadd.f32 1.0, %v3629_v4  ;;  %v5375_v14 = vpop.f32.mrf.mxu1  ;;  %v2453_v3 = vmul.f32 %v2321_v40, %v5283_v62  ;;  %v2456_v51 = vmul.f32 %v2324_v31, %v5304_v34  ;;  %v2455_v63 = vmul.f32 %v2323_v59, %v5307_v20  ;;  %v6615_v59 = vld [vmem:[#allocation41_spill] sm:$0xff] }
 0x1b4   :  { %3644 = vtanh.f32 %v2069_v21  ;;  %v5380_v22 = vpop.f32.mrf.mxu0  ;;  %v3633_v39 = vpop.eup %3632  ;;  %v2583_v6 = vmul.f32 %v2451_v25, %v5301_v33  ;;  %v2586_v11 = vmul.f32 %v2454_v15, %v5315_v58  ;;  %v2070_v2 = vmul.f32 0.7978846, %v4476_v45 }
 0x1b5   :  { %v2457_v7 = vmul.f32 %v2325_v18, %v5312_v60  ;;  %v5386_v41 = vpop.f32.mrf.mxu1  ;;  %v3635_v9 = vpop.eup %3634  ;;  %v2588_v62 = vmul.f32 %v2456_v51, %v5320_v30  ;;  %v2587_v34 = vmul.f32 %v2455_v63, %v5322_v61  ;;  %v2326_v20 = vadd.f32 1.0, %v3631_v17 }
 0x1b6   :  { %v2072_v40 = vmul.f32 0.7978846, %v4484_v8  ;;  %v5391_v31 = vpop.f32.mrf.mxu0  ;;  %v2585_v33 = vmul.f32 %v2453_v3, %v5309_v29  ;;  %v5396_v60 = vmul.f32 0.5, %v6610_v27  ;;  %v5399_v45 = vmul.f32 0.5, %v4340_v50  ;;  %v3637_v30 = vpop.eup %3636  ;;  %v6616_v3 = vld [vmem:[#allocation71_spill] sm:$0xff] }
 0x1b7   :  { %v2589_v58 = vmul.f32 %v2457_v7, %v5324_v56  ;;  %v5401_v53 = vpop.f32.mrf.mxu1  ;;  %v2707_v4 = vpack.c.bf16 %v2587_v34, %v2583_v6  ;;  %v2328_v61 = vadd.f32 1.0, %v3633_v39  ;;  %v5404_v21 = vmul.f32 0.5, %v6615_v59  ;;  %v6617_v39 = vld [vmem:[#allocation44_spill] sm:$0xff] }
 0x1b8   :  { %v2071_v8 = vmul.f32 0.7978846, %v4494_v55  ;;  %v5407_v17 = vpop.f32.mrf.mxu0  ;;  %v3639_v29 = vpop.eup %3638  ;;  %v2706_v56 = vpack.c.bf16 %v2586_v11, %v2582_v42  ;;  %v2327_v27 = vadd.f32 1.0, %v3635_v9  ;;  %3646 = vtanh.f32 %v2070_v2  ;;  %v6618_v42 = vld [vmem:[#allocation73_spill] sm:$0xff] }
 0x1b9   :  { %v2709_v25 = vpack.c.bf16 %v2589_v58, %v2585_v33  ;;  %v5409_v15 = vpop.f32.mrf.mxu1  ;;  %v2708_v50 = vpack.c.bf16 %v2588_v62, %v2584_v32  ;;  %v2458_v18 = vmul.f32 %v2326_v20, %v5333_v12  ;;  %3070 = vmatprep.mubr.bf16.mxu0 %v2707_v4  ;;  %3648 = vtanh.f32 %v2072_v40  ;;  %v6619_v9 = vld [vmem:[#allocation77_spill] sm:$0xff]  ;;  %v6620_v58 = vld [vmem:[#allocation52_spill] sm:$0xff] }
 0x1ba   :  { %v2073_v51 = vmul.f32 0.7978846, %v6616_v3  ;;  %v5413_v63 = vpop.f32.mrf.mxu0  ;;  %v2330_v55 = vadd.f32 1.0, %v3637_v30  ;;  %3071 = vmatmul.mubr.bf16.gmra.mxu0 %v2706_v56  ;;  %v5416_v6 = vmul.f32 0.5, %v6617_v39  ;;  %3650 = vtanh.f32 %v2071_v8  ;;  %v6621_v30 = vld [vmem:[#allocation75_spill] sm:$0xff] }
 0x1bb   :  { %3238 = vmatprep.mubr.bf16.mxu1 %v2709_v25  ;;  %v2074_v11 = vmul.f32 0.7978846, %v6618_v42  ;;  %v5419_v7 = vpop.f32.mrf.mxu1  ;;  %v3641_v32 = vpop.eup %3640  ;;  %v2460_v12 = vmul.f32 %v2328_v61, %v5338_v49  ;;  %v2329_v2 = vadd.f32 1.0, %v3639_v29  ;;  %v2076_v62 = vmul.f32 0.7978846, %v6619_v9  ;;  %v6622_v8 = vld [vmem:[#allocation79_spill] sm:$0xff] }
 0x1bc   :  { %3239 = vmatmul.mubr.bf16.gmra.mxu1 %v2708_v50  ;;  %3652 = vtanh.f32 %v2073_v51  ;;  %v5423_v34 = vpop.f32.mrf.mxu0  ;;  %v3643_v20 = vpop.eup %3642  ;;  %v2590_v40 = vmul.f32 %v2458_v18, %v5330_v46  ;;  %v2459_v33 = vmul.f32 %v2327_v27, %v5341_v10  ;;  %v1943_v4 = vadd.f32 %v6621_v30, %v6620_v58  ;;  %v6624_v9 = vld [vmem:[#allocation47_spill] sm:$0xff] }
 0x1bd   :  { %3654 = vtanh.f32 %v2074_v11  ;;  %v5429_v59 = vpop.f32.mrf.mxu1  ;;  %v5432_v49 = vmul.f32 %v2460_v12, %v5335_v48  ;;  %v2331_v61 = vadd.f32 1.0, %v3643_v20  ;;  %v1945_v29 = vadd.f32 %v6622_v8, %v4401_v38 }
 0x1be   :  { %3656 = vtanh.f32 %v2076_v62  ;;  %v5436_v56 = vpop.f32.mrf.mxu0  ;;  %v2462_v46 = vmul.f32 %v2330_v55, %v5359_v0  ;;  %v2332_v25 = vadd.f32 1.0, %v3641_v32  ;;  %v2075_v10 = vmul.f32 0.7978846, %v1943_v4 }
 0x1bf   :  { %v2078_v27 = vmul.f32 0.7978846, %v4539_v5  ;;  %v5440_v50 = vpop.f32.mrf.mxu1  ;;  %v2461_v18 = vmul.f32 %v2329_v2, %v5356_v26  ;;  %v2463_v48 = vmul.f32 %v2331_v61, %v5370_v23  ;;  %v2077_v3 = vmul.f32 0.7978846, %v1945_v29  ;;  %v6623_v23 = vld [vmem:[#allocation84_spill] sm:$0xff] }
 0x1c0   :  { %v2080_v51 = vmul.f32 0.7978846, %v4549_v16  ;;  %v5445_v39 = vpop.f32.mrf.mxu0  ;;  %v2591_v11 = vmul.f32 %v2459_v33, %v5345_v57  ;;  %v2594_v0 = vmul.f32 %v2462_v46, %v5350_v37  ;;  %3658 = vtanh.f32 %v2075_v10  ;;  %v6625_v37 = vld [vmem:[#allocation86_spill] sm:$0xff]  ;;  %v6627_v10 = vld [vmem:[#allocation49_spill] sm:$0xff] }
 0x1c1   :  { %v3645_v42 = vpop.eup %3644  ;;  %v2079_v55 = vmul.f32 0.7978846, %v4558_v1  ;;  %v5450_v5 = vpop.f32.mrf.mxu1  ;;  %v2595_v32 = vmul.f32 %v2463_v48, %v5367_v44  ;;  %3660 = vtanh.f32 %v2077_v3  ;;  %v2081_v12 = vmul.f32 0.7978846, %v6623_v23  ;;  %v6630_v3 = vld [vmem:[#allocation51_spill] sm:$0xff]  ;;  %v6633_v23 = vld [vmem:[#allocation54_spill] sm:$0xff] }
 0x1c2   :  { %v2333_v26 = vadd.f32 1.0, %v3645_v42  ;;  %v5454_v2 = vpop.f32.mrf.mxu0  ;;  %v2464_v16 = vmul.f32 %v2332_v25, %v5364_v43  ;;  %v5458_v62 = vmul.f32 0.5, %v6624_v9  ;;  %3662 = vtanh.f32 %v2078_v27  ;;  %v6626_v43 = vld [vmem:[#allocation90_spill] sm:$0xff]  ;;  %v6628_v27 = vld [vmem:[#allocation67_spill] sm:$0xff]  ;;  %v6631_v42 = vld [vmem:[#allocation68_spill] sm:$0xff] }
 0x1c3   :  { %v2082_v57 = vmul.f32 0.7978846, %v6625_v37  ;;  %v5461_v20 = vpop.f32.mrf.mxu1  ;;  %v2593_v1 = vmul.f32 %v2461_v18, %v5348_v35  ;;  %v2711_v33 = vpack.c.bf16 %v2595_v32, %v2591_v11  ;;  %3664 = vtanh.f32 %v2080_v51  ;;  %v6632_v11 = vld [vmem:[#allocation91_spill] sm:$0xff] }
 0x1c4   :  { %v2465_v44 = vmul.f32 %v2333_v26, %v5396_v60  ;;  %v5465_v30 = vpop.f32.mrf.mxu0  ;;  %v2710_v4 = vpack.c.bf16 %v2594_v0, %v2590_v40  ;;  %v2596_v61 = vmul.f32 %v2464_v16, %v5361_v54  ;;  %3666 = vtanh.f32 %v2079_v55  ;;  %v6629_v60 = vld [vmem:[#allocation87_spill] sm:$0xff] }
 0x1c5   :  { %v2084_v8 = vmul.f32 0.7978846, %v6626_v43  ;;  %v5469_v29 = vpop.f32.mrf.mxu1  ;;  %v3647_v46 = vpop.eup %3646  ;;  %3078 = vmatprep.mubr.bf16.mxu0 %v2711_v33  ;;  %v1414_v35 = vmul.f32 0.5, %v6627_v10  ;;  %3668 = vtanh.f32 %v2081_v12  ;;  %v1951_v18 = vadd.f32 %v6629_v60, %v6628_v27 }
 0x1c6   :  { %v2597_v25 = vmul.f32 %v2465_v44, %v5375_v14  ;;  %v5475_v48 = vpop.f32.mrf.mxu0  ;;  %v3649_v40 = vpop.eup %3648  ;;  %v1416_v54 = vmul.f32 0.5, %v6630_v3  ;;  %3079 = vmatmul.mubr.bf16.gmra.mxu0 %v2710_v4  ;;  %v1415_v51 = vmul.f32 0.5, %v6620_v58  ;;  %3670 = vtanh.f32 %v2082_v57 }
 0x1c7   :  { %v1953_v0 = vadd.f32 %v6632_v11, %v6631_v42  ;;  %v5481_v14 = vpop.f32.mrf.mxu1  ;;  %v3651_v55 = vpop.eup %3650  ;;  %v1417_v26 = vmul.f32 0.5, %v4401_v38  ;;  %v5485_v12 = vmul.f32 0.5, %v6633_v23  ;;  %3672 = vtanh.f32 %v2084_v8  ;;  %v6635_v38 = vld [vmem:[#allocation59_spill] sm:$0xff] }
 0x1c8   :  { %v2713_v32 = vpack.c.bf16 %v2597_v25, %v2593_v1  ;;  %v5487_v16 = vpop.f32.mrf.mxu0  ;;  %v2712_v37 = vpack.c.bf16 %v2596_v61, %v5432_v49  ;;  %v2334_v58 = vadd.f32 1.0, %v3647_v46  ;;  %v2083_v57 = vmul.f32 0.7978846, %v1951_v18  ;;  %v6634_v1 = vld [vmem:[#allocation56_spill] sm:$0xff]  ;;  %v6636_v61 = vld [vmem:[#allocation62_spill] sm:$0xff]  ;;  %v6638_v23 = vld [vmem:[#allocation95_spill] sm:$0xff] }
 0x1c9   :  { %v3653_v9 = vpop.eup %3652  ;;  %v2085_v33 = vmul.f32 0.7978846, %v1953_v0  ;;  %v5490_v44 = vpop.f32.mrf.mxu1  ;;  %v2336_v43 = vadd.f32 1.0, %v3649_v40  ;;  %v5493_v25 = vmul.f32 0.5, %v6634_v1  ;;  %v5496_v10 = vmul.f32 0.5, %v6635_v38  ;;  %v6637_v18 = vld [vmem:[#allocation64_spill] sm:$0xff] }
 0x1ca   :  { %v3655_v4 = vpop.eup %3654  ;;  %3246 = vmatprep.mubr.bf16.mxu1 %v2713_v32  ;;  %v2086_v8 = vmul.f32 0.7978846, %v4617_v24  ;;  %v5499_v60 = vpop.f32.mrf.mxu0  ;;  %v5502_v46 = vmul.f32 0.5, %v6636_v61  ;;  %v5505_v11 = vmul.f32 0.5, %v6637_v18  ;;  %3674 = vtanh.f32 %v2083_v57  ;;  %v6641_v18 = vld [vmem:[#allocation98_spill] sm:$0xff] }
 0x1cb   :  { %v3657_v3 = vpop.eup %3656  ;;  %v2338_v49 = vadd.f32 1.0, %v3655_v4  ;;  %3247 = vmatmul.mubr.bf16.gmra.mxu1 %v2712_v37  ;;  %v5507_v40 = vpop.f32.mrf.mxu1  ;;  %v2335_v0 = vadd.f32 1.0, %v3651_v55  ;;  %3676 = vtanh.f32 %v2085_v33  ;;  %v2088_v1 = vmul.f32 0.7978846, %v6638_v23  ;;  %v6640_v4 = vld [vmem:[#allocation66_spill] sm:$0xff] }
 0x1cc   :  { %v2340_v32 = vadd.f32 1.0, %v3657_v3  ;;  %v5510_v24 = vpop.f32.mrf.mxu0  ;;  %v2466_v38 = vmul.f32 %v2334_v58, %v5399_v45  ;;  %v5514_v37 = vmul.f32 0.5, %v6640_v4  ;;  %v5517_v61 = vmul.f32 0.5, %v6628_v27  ;;  %v6643_v27 = vld [vmem:[#allocation102_spill] sm:$0xff] }
 0x1cd   :  { %6639 = vst [vmem:[#allocation42_spill] sm:$0xff] %v5510_v24  ;;  %v2087_v52 = vmul.f32 0.7978846, %v6641_v18  ;;  %v5520_v57 = vpop.f32.mrf.mxu1  ;;  %v3659_v36 = vpop.eup %3658  ;;  %v2468_v55 = vmul.f32 %v2336_v43, %v5404_v21  ;;  %v2337_v33 = vadd.f32 1.0, %v3653_v9  ;;  %v5524_v3 = vmul.f32 0.5, %v6631_v42 }
 0x1ce   :  { %6642 = vst [vmem:[#allocation43_spill] sm:$0xff] %v5520_v57  ;;  %3678 = vtanh.f32 %v2086_v8  ;;  %v5526_v23 = vpop.f32.mrf.mxu0  ;;  %v3661_v45 = vpop.eup %3660  ;;  %v2470_v58 = vmul.f32 %v2338_v49, %v1414_v35  ;;  %v2472_v4 = vmul.f32 %v2340_v32, %v1416_v54  ;;  %v2339_v13 = vadd.f32 1.0, %v3659_v36 }
 0x1cf   :  { %v2089_v47 = vmul.f32 0.7978846, %v6643_v27  ;;  %v5529_v24 = vpop.f32.mrf.mxu1  ;;  %v3663_v18 = vpop.eup %3662  ;;  %v2598_v57 = vmul.f32 %v2466_v38, %v5380_v22  ;;  %v2467_v21 = vmul.f32 %v2335_v0, %v5416_v6  ;;  %v2341_v9 = vadd.f32 1.0, %v3661_v45  ;;  %v6644_v6 = vld [vmem:[#allocation105_spill] sm:$0xff] }
 0x1d0   :  { %3680 = vtanh.f32 %v2088_v1  ;;  %v5533_v42 = vpop.f32.mrf.mxu0  ;;  %v3665_v43 = vpop.eup %3664  ;;  %v2602_v8 = vmul.f32 %v2470_v58, %v5407_v17  ;;  %v2604_v35 = vmul.f32 %v2472_v4, %v5409_v15  ;;  %v2471_v54 = vmul.f32 %v2339_v13, %v1415_v51 }
 0x1d1   :  { %3682 = vtanh.f32 %v2087_v52  ;;  %v5537_v36 = vpop.f32.mrf.mxu1  ;;  %v3667_v49 = vpop.eup %3666  ;;  %v2600_v32 = vmul.f32 %v2468_v55, %v5386_v41  ;;  %v2469_v22 = vmul.f32 %v2337_v33, %v5458_v62  ;;  %v2473_v38 = vmul.f32 %v2341_v9, %v1417_v26  ;;  %v6645_v26 = vld [vmem:[#allocation69_spill] sm:$0xff] }
 0x1d2   :  { %v2090_v0 = vmul.f32 0.7978846, %v6644_v6  ;;  %v5542_v1 = vpop.f32.mrf.mxu0  ;;  %v3669_v45 = vpop.eup %3668  ;;  %v2599_v27 = vmul.f32 %v2467_v21, %v5391_v31  ;;  %v2603_v17 = vmul.f32 %v2471_v54, %v5413_v63  ;;  %v2342_v15 = vadd.f32 1.0, %v3663_v18  ;;  %v6646_v63 = vld [vmem:[#allocation108_spill] sm:$0xff] }
 0x1d3   :  { %3684 = vtanh.f32 %v2089_v47  ;;  %v5546_v13 = vpop.f32.mrf.mxu1  ;;  %v3671_v52 = vpop.eup %3670  ;;  %v2601_v51 = vmul.f32 %v2469_v22, %v5401_v53  ;;  %v2605_v41 = vmul.f32 %v2473_v38, %v5419_v7  ;;  %v2344_v62 = vadd.f32 1.0, %v3665_v43  ;;  %v6647_v38 = vld [vmem:[#allocation80_spill] sm:$0xff] }
 0x1d4   :  { %v5551_v55 = vmul.f32 0.5, %v6645_v26  ;;  %v5553_v33 = vpop.f32.mrf.mxu0  ;;  %v3673_v58 = vpop.eup %3672  ;;  %v2714_v4 = vpack.c.bf16 %v2602_v8, %v2598_v57  ;;  %v2716_v31 = vpack.c.bf16 %v2604_v35, %v2600_v32  ;;  %v2715_v21 = vpack.c.bf16 %v2603_v17, %v2599_v27  ;;  %v6648_v26 = vld [vmem:[#allocation100_spill] sm:$0xff] }
 0x1d5   :  { %v2092_v18 = vmul.f32 0.7978846, %v6646_v63  ;;  %v5556_v47 = vpop.f32.mrf.mxu1  ;;  %v2717_v9 = vpack.c.bf16 %v2605_v41, %v2601_v51  ;;  %v2343_v54 = vadd.f32 1.0, %v3667_v49  ;;  %v2346_v6 = vadd.f32 1.0, %v3671_v52  ;;  %v6649_v49 = vld [vmem:[#allocation70_spill] sm:$0xff] }
 0x1d6   :  { %3686 = vtanh.f32 %v2090_v0  ;;  %v5558_v53 = vpop.f32.mrf.mxu0  ;;  %v2474_v7 = vmul.f32 %v2342_v15, %v5485_v12  ;;  %v2345_v43 = vadd.f32 1.0, %v3669_v45  ;;  %3086 = vmatprep.mubr.bf16.mxu0 %v2715_v21  ;;  %v2348_v22 = vadd.f32 1.0, %v3673_v58  ;;  %v6650_v0 = vld [vmem:[#allocation72_spill] sm:$0xff]  ;;  %v6651_v12 = vld [vmem:[#allocation81_spill] sm:$0xff]  ;;  %v6652_v45 = vld [vmem:[#allocation106_spill] sm:$0xff] }
 0x1d7   :  { %v1827_v57 = vmul.f32 %v6648_v26, %v6647_v38  ;;  %v5563_v8 = vpop.f32.mrf.mxu1  ;;  %v3675_v35 = vpop.eup %3674  ;;  %v2476_v32 = vmul.f32 %v2344_v62, %v5493_v25  ;;  %3254 = vmatprep.mubr.bf16.mxu1 %v2717_v9  ;;  %3087 = vmatmul.mubr.bf16.gmra.mxu0 %v2714_v4  ;;  %v5567_v27 = vmul.f32 0.5, %v6649_v49  ;;  %v5570_v17 = vmul.f32 0.5, %v6650_v0 }
 0x1d8   :  { %v1829_v15 = vmul.f32 %v6652_v45, %v6651_v12  ;;  %v5574_v52 = vpop.f32.mrf.mxu0  ;;  %v3677_v51 = vpop.eup %3676  ;;  %v2606_v41 = vmul.f32 %v2474_v7, %v5423_v34  ;;  %3255 = vmatmul.mubr.bf16.gmra.mxu1 %v2716_v31  ;;  %v2347_v58 = vadd.f32 1.0, %v3675_v35  ;;  %3688 = vtanh.f32 %v2092_v18 }
 0x1d9   :  { %v1959_v25 = vadd.f32 %v1827_v57, %v6647_v38  ;;  %v5578_v62 = vpop.f32.mrf.mxu1  ;;  %v2475_v4 = vmul.f32 %v2343_v54, %v5496_v10  ;;  %v2478_v21 = vmul.f32 %v2346_v6, %v5505_v11  ;;  %v2349_v63 = vadd.f32 1.0, %v3677_v51 }
 0x1da   :  { %v1961_v9 = vadd.f32 %v1829_v15, %v6651_v12  ;;  %v5583_v26 = vpop.f32.mrf.mxu0  ;;  %v2477_v0 = vmul.f32 %v2345_v43, %v5502_v46  ;;  %v2480_v34 = vmul.f32 %v2348_v22, %v5514_v37  ;;  %v2479_v31 = vmul.f32 %v2347_v58, %v5517_v61 }
 0x1db   :  { %v3679_v49 = vpop.eup %3678  ;;  %v2091_v18 = vmul.f32 0.7978846, %v1959_v25  ;;  %v5588_v7 = vpop.f32.mrf.mxu1  ;;  %v2607_v57 = vmul.f32 %v2475_v4, %v5436_v56  ;;  %v2610_v10 = vmul.f32 %v2478_v21, %v5445_v39  ;;  %v2481_v11 = vmul.f32 %v2349_v63, %v5524_v3  ;;  %v6653_v39 = vld [vmem:[#allocation110_spill] sm:$0xff] }
 0x1dc   :  { %v2093_v54 = vmul.f32 0.7978846, %v1961_v9  ;;  %v5593_v6 = vpop.f32.mrf.mxu0  ;;  %v2609_v45 = vmul.f32 %v2477_v0, %v5440_v50  ;;  %v2612_v46 = vmul.f32 %v2480_v34, %v5450_v5  ;;  %v2611_v37 = vmul.f32 %v2479_v31, %v5454_v2  ;;  %v6654_v50 = vld [vmem:[#allocation74_spill] sm:$0xff]  ;;  %v6655_v5 = vld [vmem:[#allocation76_spill] sm:$0xff] }
 0x1dd   :  { %v3681_v35 = vpop.eup %3680  ;;  %3690 = vtanh.f32 %v2091_v18  ;;  %v5598_v61 = vpop.f32.mrf.mxu1  ;;  %v2613_v56 = vmul.f32 %v2481_v11, %v5461_v20  ;;  %v2350_v22 = vadd.f32 1.0, %v3679_v49  ;;  %v2094_v3 = vmul.f32 0.7978846, %v6653_v39  ;;  %v6656_v20 = vld [vmem:[#allocation78_spill] sm:$0xff] }
 0x1de   :  { %v3683_v43 = vpop.eup %3682  ;;  %3692 = vtanh.f32 %v2093_v54  ;;  %v5602_v15 = vpop.f32.mrf.mxu0  ;;  %v2608_v51 = vmul.f32 %v2476_v32, %v5429_v59  ;;  %v2719_v58 = vpack.c.bf16 %v2611_v37, %v2607_v57  ;;  %v1429_v25 = vmul.f32 0.5, %v6654_v50  ;;  %v6657_v32 = vld [vmem:[#allocation112_spill] sm:$0xff] }
 0x1df   :  { %v1430_v4 = vmul.f32 0.5, %v6655_v5  ;;  %v5607_v2 = vpop.f32.mrf.mxu1  ;;  %v2718_v63 = vpack.c.bf16 %v2610_v10, %v2606_v41  ;;  %v2721_v9 = vpack.c.bf16 %v2613_v56, %v2609_v45  ;;  %v2352_v0 = vadd.f32 1.0, %v3681_v35  ;;  %v6658_v10 = vld [vmem:[#allocation113_spill] sm:$0xff]  ;;  %v6660_v56 = vld [vmem:[#allocation118_spill] sm:$0xff] }
 0x1e0   :  { %v3685_v21 = vpop.eup %3684  ;;  %v5610_v49 = vmul.f32 0.5, %v6656_v20  ;;  %v5612_v34 = vpop.f32.mrf.mxu0  ;;  %v2720_v31 = vpack.c.bf16 %v2612_v46, %v2608_v51  ;;  %v2351_v18 = vadd.f32 1.0, %v3683_v43  ;;  %3094 = vmatprep.mubr.bf16.mxu0 %v2719_v58  ;;  %v5615_v59 = vmul.f32 0.5, %v6647_v38  ;;  %v6659_v38 = vld [vmem:[#allocation115_spill] sm:$0xff] }
 0x1e1   :  { %v2096_v57 = vmul.f32 0.7978846, %v6657_v32  ;;  %v5618_v11 = vpop.f32.mrf.mxu1  ;;  %v2482_v54 = vmul.f32 %v2350_v22, %v5551_v55  ;;  %3262 = vmatprep.mubr.bf16.mxu1 %v2721_v9  ;;  %3095 = vmatmul.mubr.bf16.gmra.mxu0 %v2718_v63  ;;  %v5622_v41 = vmul.f32 0.5, %v6651_v12  ;;  %3694 = vtanh.f32 %v2094_v3  ;;  %v6661_v22 = vld [vmem:[#allocation82_spill] sm:$0xff]  ;;  %v6664_v63 = vld [vmem:[#allocation93_spill] sm:$0xff]  ;;  %v6665_v9 = vld [vmem:[#allocation116_spill] sm:$0xff] }
 0x1e2   :  { %v2095_v35 = vmul.f32 0.7978846, %v6658_v10  ;;  %v5625_v45 = vpop.f32.mrf.mxu0  ;;  %v2353_v37 = vadd.f32 1.0, %v3685_v21  ;;  %3263 = vmatmul.mubr.bf16.gmra.mxu1 %v2720_v31  ;;  %v2097_v43 = vmul.f32 0.7978846, %v6659_v38  ;;  %v2484_v55 = vmul.f32 %v2352_v0, %v5567_v27  ;;  %v6662_v3 = vld [vmem:[#allocation122_spill] sm:$0xff] }
 0x1e3   :  { %v3687_v46 = vpop.eup %3686  ;;  %3696 = vtanh.f32 %v2096_v57  ;;  %v2098_v39 = vmul.f32 0.7978846, %v6660_v56  ;;  %v5629_v51 = vpop.f32.mrf.mxu1  ;;  %v5633_v12 = vmul.f32 0.5, %v6661_v22  ;;  %v2100_v58 = vmul.f32 0.7978846, %v6662_v3  ;;  %v6667_v57 = vld [vmem:[#allocation94_spill] sm:$0xff] }
 0x1e4   :  { %3698 = vtanh.f32 %v2095_v35  ;;  %v5636_v50 = vpop.f32.mrf.mxu0  ;;  %v5639_v5 = vmul.f32 %v2482_v54, %v5465_v30  ;;  %v2483_v21 = vmul.f32 %v2351_v18, %v5570_v17  ;;  %v1835_v20 = vmul.f32 %v6665_v9, %v6664_v63  ;;  %v6668_v10 = vld [vmem:[#allocation119_spill] sm:$0xff] }
 0x1e5   :  { %6663 = vst [vmem:[#allocation45_spill] sm:$0xff] %v5636_v50  ;;  %3700 = vtanh.f32 %v2097_v43  ;;  %v5644_v31 = vpop.f32.mrf.mxu1  ;;  %v3689_v27 = vpop.eup %3688  ;;  %v5647_v0 = vmul.f32 %v2484_v55, %v5469_v29  ;;  %v2354_v32 = vadd.f32 1.0, %v3687_v46  ;;  %v1837_v35 = vmul.f32 %v6668_v10, %v6667_v57  ;;  %v6671_v43 = vld [vmem:[#allocation83_spill] sm:$0xff]  ;;  %v6672_v29 = vld [vmem:[#allocation85_spill] sm:$0xff] }
 0x1e6   :  { %6666 = vst [vmem:[#allocation13_spill] sm:$0xff] %v5644_v31  ;;  %3702 = vtanh.f32 %v2098_v39  ;;  %v5651_v38 = vpop.f32.mrf.mxu0  ;;  %v5654_v30 = vmul.f32 %v2483_v21, %v5475_v48  ;;  %v2485_v17 = vmul.f32 %v2353_v37, %v1429_v25  ;;  %v1967_v18 = vadd.f32 %v1835_v20, %v6664_v63  ;;  %v6673_v10 = vld [vmem:[#allocation127_spill] sm:$0xff] }
 0x1e7   :  { %6669 = vst [vmem:[#allocation14_spill] sm:$0xff] %v5651_v38  ;;  %3704 = vtanh.f32 %v2100_v58  ;;  %v5657_v54 = vpop.f32.mrf.mxu1  ;;  %v5660_v56 = vmul.f32 0.5, %v6671_v43  ;;  %v5663_v46 = vmul.f32 0.5, %v6672_v29  ;;  %v1969_v39 = vadd.f32 %v1837_v35, %v6667_v57 }
 0x1e8   :  { %6670 = vst [vmem:[#allocation15_spill] sm:$0xff] %v5657_v54  ;;  %v2102_v55 = vmul.f32 0.7978846, %v4751_v28  ;;  %v5667_v22 = vpop.f32.mrf.mxu0  ;;  %v5670_v48 = vmul.f32 %v2485_v17, %v5481_v14  ;;  %v2356_v25 = vadd.f32 1.0, %v3689_v27  ;;  %v2099_v37 = vmul.f32 0.7978846, %v1967_v18 }
 0x1e9   :  { %v2104_v3 = vmul.f32 0.7978846, %v4754_v19  ;;  %v5673_v58 = vpop.f32.mrf.mxu1  ;;  %v2486_v9 = vmul.f32 %v2354_v32, %v1430_v4  ;;  %v2101_v20 = vmul.f32 0.7978846, %v1969_v39  ;;  %v2103_v43 = vmul.f32 0.7978846, %v6673_v10 }
 0x1ea   :  { %v3691_v21 = vpop.eup %3690  ;;  %3706 = vtanh.f32 %v2102_v55  ;;  %v5676_v35 = vpop.f32.mrf.mxu0  ;;  %v6675_v54 = vld [vmem:[#allocation88_spill] sm:$0xff]  ;;  %v6676_v14 = vld [vmem:[#allocation131_spill] sm:$0xff]  ;;  %v6678_v4 = vld [vmem:[#allocation134_spill] sm:$0xff]  ;;  %v2488_v55 = vmul.f32 %v2356_v25, %v5610_v49 }
 0x1eb   :  { %6674 = vst [vmem:[#allocation48_spill] sm:$0xff] %v5676_v35  ;;  %v3693_v28 = vpop.eup %3692  ;;  %v2355_v29 = vadd.f32 1.0, %v3691_v21  ;;  %v5679_v38 = vmul.f32 0.5, %v6675_v54  ;;  %3708 = vtanh.f32 %v2099_v37  ;;  %v2105_v27 = vmul.f32 0.7978846, %v6676_v14  ;;  %v5682_v17 = vpop.f32.mrf.mxu1  ;;  %v6680_v54 = vld [vmem:[#allocation137_spill] sm:$0xff] }
 0x1ec   :  { %6677 = vst [vmem:[#allocation24_spill] sm:$0xff] %v5682_v17  ;;  %v2618_v19 = vmul.f32 %v2486_v9, %v5487_v16  ;;  %v2357_v18 = vadd.f32 1.0, %v3693_v28  ;;  %3710 = vtanh.f32 %v2101_v20  ;;  %v2106_v32 = vmul.f32 0.7978846, %v6678_v4  ;;  %v5686_v39 = vpop.f32.mrf.mxu0  ;;  %v6682_v17 = vld [vmem:[#allocation89_spill] sm:$0xff]  ;;  %v6683_v16 = vld [vmem:[#allocation107_spill] sm:$0xff] }
 0x1ed   :  { %6679 = vst [vmem:[#allocation46_spill] sm:$0xff] %v5686_v39  ;;  %v2487_v21 = vmul.f32 %v2355_v29, %v5615_v59  ;;  %3712 = vtanh.f32 %v2104_v3  ;;  %v2108_v10 = vmul.f32 0.7978846, %v6680_v54  ;;  %v5691_v37 = vpop.f32.mrf.mxu1  ;;  %v5695_v35 = vmul.f32 0.5, %v6682_v17  ;;  %v6684_v9 = vld [vmem:[#allocation129_spill] sm:$0xff]  ;;  %v6686_v25 = vld [vmem:[#allocation92_spill] sm:$0xff] }
 0x1ee   :  { %6681 = vst [vmem:[#allocation25_spill] sm:$0xff] %v5691_v37  ;;  %v2489_v14 = vmul.f32 %v2357_v18, %v5622_v41  ;;  %3714 = vtanh.f32 %v2103_v43  ;;  %v1843_v20 = vmul.f32 %v6684_v9, %v6683_v16  ;;  %v5699_v28 = vpop.f32.mrf.mxu0  ;;  %v3695_v4 = vpop.eup %3694  ;;  %v2620_v49 = vmul.f32 %v2488_v55, %v5490_v44  ;;  %v6688_v18 = vld [vmem:[#allocation109_spill] sm:$0xff]  ;;  %v6689_v54 = vld [vmem:[#allocation132_spill] sm:$0xff] }
 0x1ef   :  { %6685 = vst [vmem:[#allocation50_spill] sm:$0xff] %v5699_v28  ;;  %v2619_v59 = vmul.f32 %v2487_v21, %v5499_v60  ;;  %v5704_v3 = vmul.f32 0.5, %v6686_v25  ;;  %3716 = vtanh.f32 %v2105_v27  ;;  %v5706_v29 = vpop.f32.mrf.mxu1  ;;  %v1845_v9 = vmul.f32 %v6689_v54, %v6688_v18 }
 0x1f0   :  { %6687 = vst [vmem:[#allocation18_spill] sm:$0xff] %v5706_v29  ;;  %v3697_v41 = vpop.eup %3696  ;;  %v2621_v17 = vmul.f32 %v2489_v14, %v5507_v40  ;;  %3718 = vtanh.f32 %v2106_v32  ;;  %v1975_v43 = vadd.f32 %v1843_v20, %v6683_v16  ;;  %v5712_v28 = vpop.f32.mrf.mxu0  ;;  %v2722_v60 = vpack.c.bf16 %v2618_v19, %v5639_v5  ;;  %v6694_v19 = vld [vmem:[#allocation97_spill] sm:$0xff] }
 0x1f1   :  { %6690 = vst [vmem:[#allocation19_spill] sm:$0xff] %v5712_v28  ;;  %v3699_v44 = vpop.eup %3698  ;;  %v2723_v55 = vpack.c.bf16 %v2619_v59, %v5654_v30  ;;  %v1439_v27 = vmul.f32 0.5, %v6664_v63  ;;  %3720 = vtanh.f32 %v2108_v10  ;;  %v5717_v21 = vpop.f32.mrf.mxu1  ;;  %v2358_v32 = vadd.f32 1.0, %v3695_v4  ;;  %v6693_v30 = vld [vmem:[#allocation96_spill] sm:$0xff] }
 0x1f2   :  { %6691 = vst [vmem:[#allocation53_spill] sm:$0xff] %v5717_v21  ;;  %v3701_v25 = vpop.eup %3700  ;;  %v2725_v40 = vpack.c.bf16 %v2621_v17, %v5670_v48  ;;  %v2107_v14 = vmul.f32 0.7978846, %v1975_v43  ;;  %v1977_v20 = vadd.f32 %v1845_v9, %v6688_v18  ;;  %v5721_v54 = vpop.f32.mrf.mxu0  ;;  %v2724_v28 = vpack.c.bf16 %v2620_v49, %v5647_v0  ;;  %v6696_v43 = vld [vmem:[#allocation140_spill] sm:$0xff]  ;;  %v6708_v21 = vld [vmem:[#allocation111_spill] sm:$0xff] }
 0x1f3   :  { %6692 = vst [vmem:[#allocation20_spill] sm:$0xff] %v5721_v54  ;;  %v3703_v29 = vpop.eup %3702  ;;  %3102 = vmatprep.mubr.bf16.mxu0 %v2723_v55  ;;  %v1441_v5 = vmul.f32 0.5, %v6667_v57  ;;  %v5726_v63 = vmul.f32 0.5, %v6693_v30  ;;  %v5729_v10 = vmul.f32 0.5, %v6694_v19  ;;  %v5731_v59 = vpop.f32.mrf.mxu1  ;;  %v2360_v4 = vadd.f32 1.0, %v3697_v41  ;;  %v6698_v57 = vld [vmem:[#allocation99_spill] sm:$0xff] }
 0x1f4   :  { %6695 = vst [vmem:[#allocation21_spill] sm:$0xff] %v5731_v59  ;;  %v3705_v48 = vpop.eup %3704  ;;  %3270 = vmatprep.mubr.bf16.mxu1 %v2725_v40  ;;  %3103 = vmatmul.mubr.bf16.gmra.mxu0 %v2722_v60  ;;  %3722 = vtanh.f32 %v2107_v14  ;;  %v2109_v17 = vmul.f32 0.7978846, %v1977_v20  ;;  %v2110_v9 = vmul.f32 0.7978846, %v6696_v43  ;;  %v5734_v0 = vpop.f32.mrf.mxu0  ;;  %v2362_v49 = vadd.f32 1.0, %v3703_v29 }
 0x1f5   :  { %6697 = vst [vmem:[#allocation22_spill] sm:$0xff] %v5734_v0  ;;  %3271 = vmatmul.mubr.bf16.gmra.mxu1 %v2724_v28  ;;  %v5737_v55 = vmul.f32 0.5, %v6698_v57  ;;  %v6699_v30 = vld [vmem:[#allocation101_spill] sm:$0xff]  ;;  %v6700_v54 = vld [vmem:[#allocation103_spill] sm:$0xff]  ;;  %v5745_v41 = vpop.f32.mrf.mxu1  ;;  %v2490_v60 = vmul.f32 %v2358_v32, %v5633_v12  ;;  %v2359_v40 = vadd.f32 1.0, %v3699_v44  ;;  %v2364_v14 = vadd.f32 1.0, %v3705_v48 }
 0x1f6   :  { %v5740_v19 = vmul.f32 0.5, %v6699_v30  ;;  %v5743_v59 = vmul.f32 0.5, %v6700_v54  ;;  %6701 = vst [vmem:[#allocation55_spill] sm:$0xff] %v5745_v41  ;;  %3724 = vtanh.f32 %v2109_v17  ;;  %v5748_v20 = vpop.f32.mrf.mxu0  ;;  %v2361_v28 = vadd.f32 1.0, %v3701_v25  ;;  %v6703_v43 = vld [vmem:[#allocation104_spill] sm:$0xff]  ;;  %v6705_v12 = vld [vmem:[#allocation42_spill] sm:$0xff] }
 0x1f7   :  { %6702 = vst [vmem:[#allocation57_spill] sm:$0xff] %v5748_v20  ;;  %v3707_v29 = vpop.eup %3706  ;;  %v5751_v57 = vmul.f32 0.5, %v6703_v43  ;;  %v5754_v30 = vmul.f32 0.5, %v6683_v16  ;;  %v5757_v54 = vmul.f32 0.5, %v6688_v18  ;;  %v5759_v0 = vpop.f32.mrf.mxu1  ;;  %v2622_v44 = vmul.f32 %v2490_v60, %v6705_v12  ;;  %v6706_v48 = vld [vmem:[#allocation142_spill] sm:$0xff]  ;;  %v6709_v18 = vld [vmem:[#allocation143_spill] sm:$0xff] }
 0x1f8   :  { %6704 = vst [vmem:[#allocation23_spill] sm:$0xff] %v5759_v0  ;;  %v3709_v41 = vpop.eup %3708  ;;  %v2492_v32 = vmul.f32 %v2360_v4, %v5660_v56  ;;  %3726 = vtanh.f32 %v2110_v9  ;;  %v2112_v17 = vmul.f32 0.7978846, %v6706_v48  ;;  %v5764_v25 = vpop.f32.mrf.mxu0  ;;  %v2494_v20 = vmul.f32 %v2362_v49, %v5695_v35  ;;  %v6711_v60 = vld [vmem:[#allocation43_spill] sm:$0xff] }
 0x1f9   :  { %6707 = vst [vmem:[#allocation60_spill] sm:$0xff] %v5764_v25  ;;  %v3711_v43 = vpop.eup %3710  ;;  %v2363_v16 = vadd.f32 1.0, %v3709_v41  ;;  %v5768_v37 = vmul.f32 0.5, %v6708_v21  ;;  %v2111_v39 = vmul.f32 0.7978846, %v6709_v18  ;;  %v5771_v0 = vpop.f32.mrf.mxu1  ;;  %v2491_v56 = vmul.f32 %v2359_v40, %v5663_v46  ;;  %v6712_v41 = vld [vmem:[#allocation146_spill] sm:$0xff] }
 0x1fa   :  { %6710 = vst [vmem:[#allocation58_spill] sm:$0xff] %v5771_v0  ;;  %v3713_v31 = vpop.eup %3712  ;;  %v2624_v12 = vmul.f32 %v2492_v32, %v6711_v60  ;;  %v2496_v4 = vmul.f32 %v2364_v14, %v5704_v3  ;;  %v2365_v9 = vadd.f32 1.0, %v3711_v43  ;;  %v5776_v48 = vpop.f32.mrf.mxu0  ;;  %v2493_v35 = vmul.f32 %v2361_v28, %v5679_v38 }
 0x1fb   :  { %v3715_v25 = vpop.eup %3714  ;;  %v2626_v21 = vmul.f32 %v2494_v20, %v5533_v42  ;;  %v2495_v49 = vmul.f32 %v2363_v16, %v1439_v27  ;;  %v2113_v18 = vmul.f32 0.7978846, %v6712_v41  ;;  %v5781_v50 = vpop.f32.mrf.mxu1  ;;  %v2366_v46 = vadd.f32 1.0, %v3707_v29  ;;  %v6713_v42 = vld [vmem:[#allocation148_spill] sm:$0xff]  ;;  %v6714_v29 = vld [vmem:[#allocation114_spill] sm:$0xff] }
 0x1fc   :  { %v3717_v0 = vpop.eup %3716  ;;  %v2628_v32 = vmul.f32 %v2496_v4, %v5537_v36  ;;  %v2497_v60 = vmul.f32 %v2365_v9, %v1441_v5  ;;  %3728 = vtanh.f32 %v2112_v17  ;;  %v5784_v3 = vpop.f32.mrf.mxu0  ;;  %v2623_v14 = vmul.f32 %v2491_v56, %v5526_v23 }
 0x1fd   :  { %v3719_v40 = vpop.eup %3718  ;;  %v2627_v38 = vmul.f32 %v2495_v49, %v5542_v1  ;;  %3730 = vtanh.f32 %v2111_v39  ;;  %v2114_v27 = vmul.f32 0.7978846, %v6713_v42  ;;  %v5789_v20 = vpop.f32.mrf.mxu1  ;;  %v2625_v43 = vmul.f32 %v2493_v35, %v5529_v24 }
 0x1fe   :  { %v3721_v28 = vpop.eup %3720  ;;  %v2629_v36 = vmul.f32 %v2497_v60, %v5546_v13  ;;  %v2368_v5 = vadd.f32 1.0, %v3713_v31  ;;  %v5794_v17 = vmul.f32 0.5, %v6714_v29  ;;  %v5796_v16 = vpop.f32.mrf.mxu0  ;;  %v2367_v23 = vadd.f32 1.0, %v3715_v25  ;;  %v6715_v60 = vld [vmem:[#allocation152_spill] sm:$0xff] }
 0x1ff   :  { %v2727_v4 = vpack.c.bf16 %v2627_v38, %v2623_v14  ;;  %v2370_v56 = vadd.f32 1.0, %v3719_v40  ;;  %3732 = vtanh.f32 %v2113_v18  ;;  %v5798_v1 = vpop.f32.mrf.mxu1  ;;  %v2726_v39 = vpack.c.bf16 %v2626_v21, %v2622_v44  ;;  %v6718_v18 = vld [vmem:[#allocation144_spill] sm:$0xff] }
 0x200   :  { %v2728_v9 = vpack.c.bf16 %v2628_v32, %v2624_v12  ;;  %v2729_v49 = vpack.c.bf16 %v2629_v36, %v2625_v43  ;;  %v2498_v41 = vmul.f32 %v2366_v46, %v5726_v63  ;;  %v5801_v24 = vpop.f32.mrf.mxu0  ;;  %v2369_v31 = vadd.f32 1.0, %v3717_v0  ;;  %v6716_v12 = vld [vmem:[#allocation117_spill] sm:$0xff]  ;;  %v6717_v63 = vld [vmem:[#allocation124_spill] sm:$0xff] }
 0x201   :  { %v3723_v13 = vpop.eup %3722  ;;  %3110 = vmatprep.mubr.bf16.mxu0 %v2727_v4  ;;  %v2372_v35 = vadd.f32 1.0, %v3721_v28  ;;  %3734 = vtanh.f32 %v2114_v27  ;;  %v2116_v42 = vmul.f32 0.7978846, %v6715_v60  ;;  %v5804_v14 = vpop.f32.mrf.mxu1  ;;  %v5808_v21 = vmul.f32 0.5, %v6716_v12  ;;  %v6720_v28 = vld [vmem:[#allocation149_spill] sm:$0xff] }
 0x202   :  { %v2630_v25 = vmul.f32 %v2498_v41, %v5553_v33  ;;  %3278 = vmatprep.mubr.bf16.mxu1 %v2729_v49  ;;  %3111 = vmatmul.mubr.bf16.gmra.mxu0 %v2726_v39  ;;  %v2371_v44 = vadd.f32 1.0, %v3723_v13  ;;  %v1851_v32 = vmul.f32 %v6718_v18, %v6717_v63  ;;  %v5812_v46 = vpop.f32.mrf.mxu0  ;;  %v2500_v40 = vmul.f32 %v2368_v5, %v5729_v10  ;;  %v6719_v33 = vld [vmem:[#allocation125_spill] sm:$0xff] }
 0x203   :  { %v3725_v0 = vpop.eup %3724  ;;  %v2499_v38 = vmul.f32 %v2367_v23, %v5737_v55  ;;  %v2502_v27 = vmul.f32 %v2370_v56, %v5743_v59  ;;  %3279 = vmatmul.mubr.bf16.gmra.mxu1 %v2728_v9  ;;  %v1853_v43 = vmul.f32 %v6720_v28, %v6719_v33  ;;  %v5819_v36 = vpop.f32.mrf.mxu1  ;;  %3736 = vtanh.f32 %v2116_v42  ;;  %v6726_v28 = vld [vmem:[#allocation120_spill] sm:$0xff] }
 0x204   :  { %v2503_v29 = vmul.f32 %v2371_v44, %v5754_v30  ;;  %v2373_v4 = vadd.f32 1.0, %v3725_v0  ;;  %v1983_v39 = vadd.f32 %v1851_v32, %v6717_v63  ;;  %v5823_v49 = vpop.f32.mrf.mxu0  ;;  %v2501_v10 = vmul.f32 %v2369_v31, %v5740_v19  ;;  %v6722_v31 = vld [vmem:[#allocation156_spill] sm:$0xff] }
 0x205   :  { %v3727_v41 = vpop.eup %3726  ;;  %v2634_v55 = vmul.f32 %v2502_v27, %v5574_v52  ;;  %v2504_v59 = vmul.f32 %v2372_v35, %v5751_v57  ;;  %v1985_v5 = vadd.f32 %v1853_v43, %v6719_v33  ;;  %v5829_v23 = vpop.f32.mrf.mxu1  ;;  %v2631_v56 = vmul.f32 %v2499_v38, %v5558_v53 }
 0x206   :  { %6721 = vst [vmem:[#allocation63_spill] sm:$0xff] %v5829_v23  ;;  %v2635_v30 = vmul.f32 %v2503_v29, %v5583_v26  ;;  %v2505_v9 = vmul.f32 %v2373_v4, %v5757_v54  ;;  %v2115_v13 = vmul.f32 0.7978846, %v1983_v39  ;;  %v5834_v60 = vpop.f32.mrf.mxu0  ;;  %v2633_v42 = vmul.f32 %v2501_v10, %v5563_v8  ;;  %v6724_v8 = vld [vmem:[#allocation157_spill] sm:$0xff]  ;;  %v6728_v4 = vld [vmem:[#allocation123_spill] sm:$0xff] }
 0x207   :  { %v2636_v19 = vmul.f32 %v2504_v59, %v5578_v62  ;;  %v2117_v52 = vmul.f32 0.7978846, %v1985_v5  ;;  %v2118_v57 = vmul.f32 0.7978846, %v6722_v31  ;;  %v5839_v35 = vpop.f32.mrf.mxu1  ;;  %v2374_v53 = vadd.f32 1.0, %v3727_v41  ;;  %v6727_v29 = vld [vmem:[#allocation121_spill] sm:$0xff] }
 0x208   :  { %6723 = vst [vmem:[#allocation37_spill] sm:$0xff] %v5839_v35  ;;  %v2731_v44 = vpack.c.bf16 %v2635_v30, %v2631_v56  ;;  %v2637_v12 = vmul.f32 %v2505_v9, %v5588_v7  ;;  %3738 = vtanh.f32 %v2115_v13  ;;  %v5842_v26 = vpop.f32.mrf.mxu0  ;;  %v2632_v18 = vmul.f32 %v2500_v40, %v5556_v47  ;;  %v6731_v30 = vld [vmem:[#allocation163_spill] sm:$0xff] }
 0x209   :  { %v3729_v54 = vpop.eup %3728  ;;  %v2730_v32 = vpack.c.bf16 %v2634_v55, %v2630_v25  ;;  %3740 = vtanh.f32 %v2117_v52  ;;  %v2120_v0 = vmul.f32 0.7978846, %v6724_v8  ;;  %v5846_v62 = vpop.f32.mrf.mxu1  ;;  %v1453_v43 = vmul.f32 0.5, %v6726_v28  ;;  %v6729_v25 = vld [vmem:[#allocation160_spill] sm:$0xff]  ;;  %v6739_v8 = vld [vmem:[#allocation161_spill] sm:$0xff] }
 0x20a   :  { %6725 = vst [vmem:[#allocation61_spill] sm:$0xff] %v5846_v62  ;;  %v3731_v38 = vpop.eup %3730  ;;  %v2733_v27 = vpack.c.bf16 %v2637_v12, %v2633_v42  ;;  %3118 = vmatprep.mubr.bf16.mxu0 %v2731_v44  ;;  %v1454_v7 = vmul.f32 0.5, %v6727_v29  ;;  %v5851_v39 = vmul.f32 0.5, %v6728_v4  ;;  %v5853_v41 = vpop.f32.mrf.mxu0  ;;  %v2732_v10 = vpack.c.bf16 %v2636_v19, %v2632_v18  ;;  %v6733_v19 = vld [vmem:[#allocation166_spill] sm:$0xff]  ;;  %v6743_v4 = vld [vmem:[#allocation128_spill] sm:$0xff]  ;;  %v6840_v62 = vld [vmem:[#allocation57_spill] sm:$0xff] }
 0x20b   :  { %3119 = vmatmul.mubr.bf16.gmra.mxu0 %v2730_v32  ;;  %v5856_v47 = vmul.f32 0.5, %v6717_v63  ;;  %3742 = vtanh.f32 %v2118_v57  ;;  %v2119_v40 = vmul.f32 0.7978846, %v6729_v25  ;;  %v5859_v55 = vpop.f32.mrf.mxu1  ;;  %v2506_v5 = vmul.f32 %v2374_v53, %v5768_v37  ;;  %v6735_v44 = vld [vmem:[#allocation126_spill] sm:$0xff]  ;;  %v6736_v53 = vld [vmem:[#allocation169_spill] sm:$0xff]  ;;  %v6744_v25 = vld [vmem:[#allocation171_spill] sm:$0xff] }
 0x20c   :  { %6730 = vst [vmem:[#allocation26_spill] sm:$0xff] %v5859_v55  ;;  %v3733_v59 = vpop.eup %3732  ;;  %v2376_v56 = vadd.f32 1.0, %v3729_v54  ;;  %3286 = vmatprep.mubr.bf16.mxu1 %v2733_v27  ;;  %3744 = vtanh.f32 %v2120_v0  ;;  %v2121_v9 = vmul.f32 0.7978846, %v6731_v30  ;;  %v5863_v13 = vpop.f32.mrf.mxu0  ;;  %v2375_v42 = vadd.f32 1.0, %v3731_v38  ;;  %v6740_v38 = vld [vmem:[#allocation139_spill] sm:$0xff] }
 0x20d   :  { %6732 = vst [vmem:[#allocation27_spill] sm:$0xff] %v5863_v13  ;;  %3287 = vmatmul.mubr.bf16.gmra.mxu1 %v2732_v10  ;;  %v5866_v63 = vmul.f32 0.5, %v6719_v33  ;;  %3746 = vtanh.f32 %v2119_v40  ;;  %v2122_v52 = vmul.f32 0.7978846, %v6733_v19  ;;  %v5869_v31 = vpop.f32.mrf.mxu1  ;;  %v5872_v37 = vmul.f32 %v2506_v5, %v5593_v6  ;;  %v6738_v33 = vld [vmem:[#allocation138_spill] sm:$0xff]  ;;  %v6741_v27 = vld [vmem:[#allocation164_spill] sm:$0xff] }
 0x20e   :  { %6734 = vst [vmem:[#allocation30_spill] sm:$0xff] %v5869_v31  ;;  %v3735_v57 = vpop.eup %3734  ;;  %v5875_v12 = vmul.f32 0.5, %v6735_v44  ;;  %3748 = vtanh.f32 %v2121_v9  ;;  %v2124_v54 = vmul.f32 0.7978846, %v6736_v53  ;;  %v5878_v18 = vpop.f32.mrf.mxu0  ;;  %v2377_v32 = vadd.f32 1.0, %v3733_v59  ;;  %v6838_v55 = vld [vmem:[#allocation60_spill] sm:$0xff] }
 0x20f   :  { %6737 = vst [vmem:[#allocation38_spill] sm:$0xff] %v5878_v18  ;;  %3750 = vtanh.f32 %v2122_v52  ;;  %v1859_v0 = vmul.f32 %v6739_v8, %v6738_v33  ;;  %v1861_v28 = vmul.f32 %v6741_v27, %v6740_v38  ;;  %v5884_v29 = vpop.f32.mrf.mxu1  ;;  %v2508_v6 = vmul.f32 %v2376_v56, %v5794_v17  ;;  %v6747_v56 = vld [vmem:[#allocation130_spill] sm:$0xff] }
 0x210   :  { %6742 = vst [vmem:[#allocation65_spill] sm:$0xff] %v5884_v29  ;;  %v5888_v10 = vmul.f32 0.5, %v6743_v4  ;;  %3752 = vtanh.f32 %v2124_v54  ;;  %v2126_v40 = vmul.f32 0.7978846, %v6744_v25  ;;  %v5891_v5 = vpop.f32.mrf.mxu0  ;;  %v3737_v59 = vpop.eup %3736  ;;  %v2507_v30 = vmul.f32 %v2375_v42, %v5808_v21  ;;  %v6748_v54 = vld [vmem:[#allocation173_spill] sm:$0xff]  ;;  %v6754_v29 = vld [vmem:[#allocation135_spill] sm:$0xff] }
 0x211   :  { %6745 = vst [vmem:[#allocation33_spill] sm:$0xff] %v5891_v5  ;;  %v2378_v9 = vadd.f32 1.0, %v3735_v57  ;;  %v1991_v19 = vadd.f32 %v1859_v0, %v6738_v33  ;;  %v1993_v52 = vadd.f32 %v1861_v28, %v6740_v38  ;;  %v5896_v44 = vpop.f32.mrf.mxu1  ;;  %v5899_v17 = vmul.f32 %v2508_v6, %v5598_v61  ;;  %v6751_v25 = vld [vmem:[#allocation133_spill] sm:$0xff]  ;;  %v6752_v61 = vld [vmem:[#allocation175_spill] sm:$0xff] }
 0x212   :  { %6746 = vst [vmem:[#allocation35_spill] sm:$0xff] %v5896_v44  ;;  %v5902_v53 = vmul.f32 0.5, %v6747_v56  ;;  %3754 = vtanh.f32 %v2126_v40  ;;  %v2128_v8 = vmul.f32 0.7978846, %v6748_v54  ;;  %v5905_v27 = vpop.f32.mrf.mxu0  ;;  %v2639_v21 = vmul.f32 %v2507_v30, %v5602_v15  ;;  %v6755_v15 = vld [vmem:[#allocation183_spill] sm:$0xff] }
 0x213   :  { %6749 = vst [vmem:[#allocation36_spill] sm:$0xff] %v5905_v27  ;;  %v2509_v42 = vmul.f32 %v2377_v32, %v1453_v43  ;;  %v2123_v57 = vmul.f32 0.7978846, %v1991_v19  ;;  %v2125_v0 = vmul.f32 0.7978846, %v1993_v52  ;;  %v5908_v4 = vpop.f32.mrf.mxu1  ;;  %v2380_v28 = vadd.f32 1.0, %v3737_v59 }
 0x214   :  { %6750 = vst [vmem:[#allocation41_spill] sm:$0xff] %v5908_v4  ;;  %v5911_v31 = vmul.f32 0.5, %v6751_v25  ;;  %3756 = vtanh.f32 %v2128_v8  ;;  %v2127_v6 = vmul.f32 0.7978846, %v6752_v61  ;;  %v5914_v56 = vpop.f32.mrf.mxu0  ;;  %v2510_v54 = vmul.f32 %v2378_v9, %v1454_v7  ;;  %v6757_v52 = vld [vmem:[#allocation184_spill] sm:$0xff] }
 0x215   :  { %6753 = vst [vmem:[#allocation71_spill] sm:$0xff] %v5914_v56  ;;  %v3739_v40 = vpop.eup %3738  ;;  %v1462_v27 = vmul.f32 0.5, %v6754_v29  ;;  %3758 = vtanh.f32 %v2123_v57  ;;  %v2130_v43 = vmul.f32 0.7978846, %v6755_v15  ;;  %v5918_v32 = vpop.f32.mrf.mxu1  ;;  %v2641_v59 = vmul.f32 %v2509_v42, %v5607_v2  ;;  %v6759_v7 = vld [vmem:[#allocation136_spill] sm:$0xff]  ;;  %v6760_v29 = vld [vmem:[#allocation178_spill] sm:$0xff] }
 0x216   :  { %6756 = vst [vmem:[#allocation44_spill] sm:$0xff] %v5918_v32  ;;  %v3741_v30 = vpop.eup %3740  ;;  %v2379_v19 = vadd.f32 1.0, %v3739_v40  ;;  %3760 = vtanh.f32 %v2125_v0  ;;  %v2132_v8 = vmul.f32 0.7978846, %v6757_v52  ;;  %v5922_v25 = vpop.f32.mrf.mxu0  ;;  %v2642_v61 = vmul.f32 %v2510_v54, %v5612_v34  ;;  %v6762_v42 = vld [vmem:[#allocation154_spill] sm:$0xff]  ;;  %v6763_v0 = vld [vmem:[#allocation179_spill] sm:$0xff] }
 0x217   :  { %6758 = vst [vmem:[#allocation73_spill] sm:$0xff] %v5922_v25  ;;  %v2381_v56 = vadd.f32 1.0, %v3741_v30  ;;  %v1464_v9 = vmul.f32 0.5, %v6759_v7  ;;  %v2129_v57 = vmul.f32 0.7978846, %v6760_v29  ;;  %v5927_v4 = vpop.f32.mrf.mxu1  ;;  %v2512_v32 = vmul.f32 %v2380_v28, %v5851_v39 }
 0x218   :  { %6761 = vst [vmem:[#allocation77_spill] sm:$0xff] %v5927_v4  ;;  %v3743_v15 = vpop.eup %3742  ;;  %v2511_v2 = vmul.f32 %v2379_v19, %v5856_v47  ;;  %3762 = vtanh.f32 %v2127_v6  ;;  %v1867_v40 = vmul.f32 %v6763_v0, %v6762_v42  ;;  %v1174_v52 = vpop.f32.mrf.mxu0  ;;  %v5935_v54 = vmul.f32 0.5, %v6738_v33  ;;  %v6765_v0 = vld [vmem:[#allocation155_spill] sm:$0xff] }
 0x219   :  { %v3745_v25 = vpop.eup %3744  ;;  %v2513_v34 = vmul.f32 %v2381_v56, %v5866_v63  ;;  %v5938_v30 = vmul.f32 0.5, %v6740_v38  ;;  %3764 = vtanh.f32 %v2130_v43  ;;  %v1375_v7 = vpop.f32.mrf.mxu1  ;;  %v2644_v39 = vmul.f32 %v2512_v32, %v5618_v11  ;;  %v6764_v56 = vld [vmem:[#allocation141_spill] sm:$0xff] }
 0x21a   :  { %v3747_v29 = vpop.eup %3746  ;;  %v2643_v47 = vmul.f32 %v2511_v2, %v5625_v45  ;;  %3766 = vtanh.f32 %v2132_v8  ;;  %v1999_v28 = vadd.f32 %v1867_v40, %v6762_v42  ;;  %v1175_v6 = vpop.f32.mrf.mxu0  ;;  %v1466_v33 = vmul.f32 0.5, %v6764_v56  ;;  %v6766_v38 = vld [vmem:[#allocation181_spill] sm:$0xff] }
 0x21b   :  { %v3749_v19 = vpop.eup %3748  ;;  %v2645_v63 = vmul.f32 %v2513_v34, %v5629_v51  ;;  %3768 = vtanh.f32 %v2129_v57  ;;  %v1869_v52 = vmul.f32 %v6766_v38, %v6765_v0  ;;  %v1376_v43 = vpop.f32.mrf.mxu1  ;;  %v2734_v4 = vpack.c.bf16 %v2642_v61, %v5872_v37  ;;  %v6767_v32 = vld [vmem:[#allocation145_spill] sm:$0xff]  ;;  %v6768_v37 = vld [vmem:[#allocation147_spill] sm:$0xff] }
 0x21c   :  { %v3751_v7 = vpop.eup %3750  ;;  %v2735_v11 = vpack.c.bf16 %v2643_v47, %v2639_v21  ;;  %v1468_v45 = vmul.f32 0.5, %v6767_v32  ;;  %v2131_v8 = vmul.f32 0.7978846, %v1999_v28  ;;  %v2382_v6 = vadd.f32 1.0, %v3743_v15  ;;  %v6769_v61 = vld [vmem:[#allocation151_spill] sm:$0xff] }
 0x21d   :  { %v3753_v2 = vpop.eup %3752  ;;  %v2737_v40 = vpack.c.bf16 %v2645_v63, %v2641_v59  ;;  %v2384_v44 = vadd.f32 1.0, %v3745_v25  ;;  %v2386_v18 = vadd.f32 1.0, %v3751_v7  ;;  %v2736_v51 = vpack.c.bf16 %v2644_v39, %v5899_v17  ;;  %v6770_v25 = vld [vmem:[#allocation153_spill] sm:$0xff] }
 0x21e   :  { %3126 = vmatprep.mubr.bf16.mxu0 %v2735_v11  ;;  %v2388_v57 = vadd.f32 1.0, %v3753_v2  ;;  %3770 = vtanh.f32 %v2131_v8  ;;  %v2001_v34 = vadd.f32 %v1869_v52, %v6765_v0  ;;  %v2383_v38 = vadd.f32 1.0, %v3747_v29 }
 0x21f   :  { %v3755_v56 = vpop.eup %3754  ;;  %v2385_v43 = vadd.f32 1.0, %v3749_v19  ;;  %3294 = vmatprep.mubr.bf16.mxu1 %v2737_v40  ;;  %3127 = vmatmul.mubr.bf16.gmra.mxu0 %v2734_v4  ;;  %v5952_v21 = vmul.f32 0.5, %v6768_v37  ;;  %v1470_v59 = vmul.f32 0.5, %v6769_v61  ;;  %v2518_v15 = vmul.f32 %v2386_v18, %v1462_v27  ;;  %v6771_v4 = vld [vmem:[#allocation188_spill] sm:$0xff]  ;;  %v6772_v18 = vld [vmem:[#allocation191_spill] sm:$0xff] }
 0x220   :  { %3295 = vmatmul.mubr.bf16.gmra.mxu1 %v2736_v51  ;;  %v1472_v47 = vmul.f32 0.5, %v6770_v25  ;;  %v5957_v17 = vmul.f32 0.5, %v6762_v42  ;;  %v2133_v39 = vmul.f32 0.7978846, %v2001_v34  ;;  %v2514_v63 = vmul.f32 %v2382_v6, %v5875_v12  ;;  %v6773_v6 = vld [vmem:[#allocation45_spill] sm:$0xff]  ;;  %v6776_v37 = vld [vmem:[#allocation15_spill] sm:$0xff] }
 0x221   :  { %v3757_v28 = vpop.eup %3756  ;;  %v2516_v29 = vmul.f32 %v2384_v44, %v5888_v10  ;;  %v2520_v19 = vmul.f32 %v2388_v57, %v1464_v9  ;;  %v2134_v52 = vmul.f32 0.7978846, %v6771_v4  ;;  %v2650_v11 = vmul.f32 %v2518_v15, %v5667_v22  ;;  %v6774_v44 = vld [vmem:[#allocation13_spill] sm:$0xff]  ;;  %v6775_v22 = vld [vmem:[#allocation14_spill] sm:$0xff] }
 0x222   :  { %v3759_v7 = vpop.eup %3758  ;;  %v2390_v32 = vadd.f32 1.0, %v3755_v56  ;;  %3772 = vtanh.f32 %v2133_v39  ;;  %v2136_v27 = vmul.f32 0.7978846, %v6772_v18  ;;  %v2515_v42 = vmul.f32 %v2383_v38, %v5902_v53  ;;  %v6777_v39 = vld [vmem:[#allocation48_spill] sm:$0xff] }
 0x223   :  { %v3761_v8 = vpop.eup %3760  ;;  %v2517_v2 = vmul.f32 %v2385_v43, %v5911_v31  ;;  %v2652_v40 = vmul.f32 %v2520_v19, %v5673_v58  ;;  %v2387_v12 = vadd.f32 1.0, %v3759_v7  ;;  %v2646_v10 = vmul.f32 %v2514_v63, %v6773_v6  ;;  %v6779_v7 = vld [vmem:[#allocation24_spill] sm:$0xff] }
 0x224   :  { %v2648_v9 = vmul.f32 %v2516_v29, %v6774_v44  ;;  %v2389_v51 = vadd.f32 1.0, %v3761_v8  ;;  %v2392_v57 = vadd.f32 1.0, %v3757_v28  ;;  %v2647_v56 = vmul.f32 %v2515_v42, %v6775_v22  ;;  %v6778_v28 = vld [vmem:[#allocation192_spill] sm:$0xff]  ;;  %v6784_v22 = vld [vmem:[#allocation19_spill] sm:$0xff] }
 0x225   :  { %v3763_v34 = vpop.eup %3762  ;;  %v2649_v61 = vmul.f32 %v2517_v2, %v6776_v37  ;;  %v2519_v15 = vmul.f32 %v2387_v12, %v5935_v54  ;;  %3774 = vtanh.f32 %v2134_v52  ;;  %v2738_v38 = vpack.c.bf16 %v2650_v11, %v2646_v10  ;;  %v6780_v54 = vld [vmem:[#allocation194_spill] sm:$0xff]  ;;  %v6783_v10 = vld [vmem:[#allocation197_spill] sm:$0xff] }
 0x226   :  { %v3765_v53 = vpop.eup %3764  ;;  %v2521_v31 = vmul.f32 %v2389_v51, %v5938_v30  ;;  %v2522_v58 = vmul.f32 %v2390_v32, %v1466_v33  ;;  %3776 = vtanh.f32 %v2136_v27  ;;  %v2740_v25 = vpack.c.bf16 %v2652_v40, %v2648_v9  ;;  %v6781_v11 = vld [vmem:[#allocation46_spill] sm:$0xff]  ;;  %v6782_v27 = vld [vmem:[#allocation25_spill] sm:$0xff] }
 0x227   :  { %v3767_v43 = vpop.eup %3766  ;;  %v2651_v63 = vmul.f32 %v2519_v15, %v6777_v39  ;;  %v2394_v29 = vadd.f32 1.0, %v3765_v53  ;;  %v2135_v19 = vmul.f32 0.7978846, %v6778_v28  ;;  %v2524_v8 = vmul.f32 %v2392_v57, %v1468_v45  ;;  %v6785_v57 = vld [vmem:[#allocation201_spill] sm:$0xff] }
 0x228   :  { %v3769_v4 = vpop.eup %3768  ;;  %v2653_v18 = vmul.f32 %v2521_v31, %v6779_v7  ;;  %v2396_v42 = vadd.f32 1.0, %v3767_v43  ;;  %v2137_v52 = vmul.f32 0.7978846, %v6780_v54  ;;  %v2654_v12 = vmul.f32 %v2522_v58, %v6781_v11  ;;  %v6789_v58 = vld [vmem:[#allocation172_spill] sm:$0xff]  ;;  %v6790_v43 = vld [vmem:[#allocation198_spill] sm:$0xff] }
 0x229   :  { %v2739_v2 = vpack.c.bf16 %v2651_v63, %v2647_v56  ;;  %v2391_v30 = vadd.f32 1.0, %v3763_v34  ;;  %v2526_v33 = vmul.f32 %v2394_v29, %v1470_v59  ;;  %v5979_v40 = vmul.f32 %v2524_v8, %v6782_v27  ;;  %v6786_v56 = vld [vmem:[#allocation53_spill] sm:$0xff]  ;;  %v6787_v34 = vld [vmem:[#allocation170_spill] sm:$0xff]  ;;  %v6799_v27 = vld [vmem:[#allocation40_spill] sm:$0xff] }
 0x22a   :  { %v2741_v32 = vpack.c.bf16 %v2653_v18, %v2649_v61  ;;  %v2528_v6 = vmul.f32 %v2396_v42, %v1472_v47  ;;  %v2138_v44 = vmul.f32 0.7978846, %v6783_v10  ;;  %v2393_v51 = vadd.f32 1.0, %v3769_v4  ;;  %v6788_v61 = vld [vmem:[#allocation195_spill] sm:$0xff]  ;;  %v6792_v4 = vld [vmem:[#allocation17_spill] sm:$0xff]  ;;  %v6793_v18 = vld [vmem:[#allocation150_spill] sm:$0xff] }
 0x22b   :  { %v3771_v9 = vpop.eup %3770  ;;  %3134 = vmatprep.mubr.bf16.mxu0 %v2739_v2  ;;  %v2658_v45 = vmul.f32 %v2526_v33, %v6784_v22  ;;  %3778 = vtanh.f32 %v2135_v19  ;;  %v2140_v37 = vmul.f32 0.7978846, %v6785_v57  ;;  %v1875_v47 = vmul.f32 %v6788_v61, %v6787_v34  ;;  %v6791_v19 = vld [vmem:[#allocation223_spill] sm:$0xff]  ;;  %v6794_v42 = vld [vmem:[#allocation50_spill] sm:$0xff]  ;;  %v6804_v61 = vld [vmem:[#allocation232_spill] sm:$0xff] }
 0x22c   :  { %3302 = vmatprep.mubr.bf16.mxu1 %v2741_v32  ;;  %v5985_v15 = vmul.f32 %v2528_v6, %v6786_v56  ;;  %3135 = vmatmul.mubr.bf16.gmra.mxu0 %v2738_v38  ;;  %v2395_v59 = vadd.f32 1.0, %v3771_v9  ;;  %3780 = vtanh.f32 %v2137_v52  ;;  %v2523_v53 = vmul.f32 %v2391_v30, %v5952_v21  ;;  %v6795_v52 = vld [vmem:[#allocation20_spill] sm:$0xff]  ;;  %v6797_v30 = vld [vmem:[#allocation39_spill] sm:$0xff]  ;;  %v6798_v32 = vld [vmem:[#allocation230_spill] sm:$0xff] }
 0x22d   :  { %v2742_v31 = vpack.c.bf16 %v2658_v45, %v2654_v12  ;;  %3303 = vmatmul.mubr.bf16.gmra.mxu1 %v2740_v25  ;;  %3782 = vtanh.f32 %v2138_v44  ;;  %v1877_v39 = vmul.f32 %v6790_v43, %v6789_v58  ;;  %v2007_v38 = vadd.f32 %v1875_v47, %v6787_v34  ;;  %v6802_v56 = vld [vmem:[#allocation29_spill] sm:$0xff] }
 0x22e   :  { %v2744_v63 = vpack.c.bf16 %v5985_v15, %v5979_v40  ;;  %v2527_v29 = vmul.f32 %v2395_v59, %v5957_v17  ;;  %3784 = vtanh.f32 %v2140_v37  ;;  %v1904_v7 = vmul.f32 %v6792_v4, %v6791_v19  ;;  %v6796_v17 = vld [vmem:[#allocation226_spill] sm:$0xff]  ;;  %v6801_v37 = vld [vmem:[#allocation212_spill] sm:$0xff]  ;;  %v6803_v59 = vld [vmem:[#allocation219_spill] sm:$0xff] }
 0x22f   :  { %v3773_v28 = vpop.eup %3772  ;;  %v1469_v21 = vmul.f32 0.5, %v6793_v18  ;;  %v1473_v25 = vmul.f32 0.5, %v6765_v0  ;;  %v2009_v8 = vadd.f32 %v1877_v39, %v6789_v58  ;;  %v2655_v54 = vmul.f32 %v2523_v53, %v6794_v42  ;;  %v6800_v0 = vld [vmem:[#allocation203_spill] sm:$0xff]  ;;  %v6805_v53 = vld [vmem:[#allocation205_spill] sm:$0xff]  ;;  %v6807_v39 = vld [vmem:[#allocation16_spill] sm:$0xff] }
 0x230   :  { %v2659_v2 = vmul.f32 %v2527_v29, %v6795_v52  ;;  %v2397_v11 = vadd.f32 1.0, %v3773_v28  ;;  %v2139_v12 = vmul.f32 0.7978846, %v2007_v38  ;;  %v1903_v33 = vmul.f32 %v6797_v30, %v6796_v17  ;;  %v6808_v38 = vld [vmem:[#allocation18_spill] sm:$0xff]  ;;  %v6809_v4 = vld [vmem:[#allocation21_spill] sm:$0xff]  ;;  %v6812_v42 = vld [vmem:[#allocation32_spill] sm:$0xff] }
 0x231   :  { %v1905_v40 = vmul.f32 %v6799_v27, %v6798_v32  ;;  %v2525_v6 = vmul.f32 %v2393_v51, %v1469_v21  ;;  %v2141_v10 = vmul.f32 0.7978846, %v2009_v8  ;;  %v2142_v45 = vmul.f32 0.7978846, %v6800_v0  ;;  %v6806_v51 = vld [vmem:[#allocation214_spill] sm:$0xff]  ;;  %v6810_v21 = vld [vmem:[#allocation207_spill] sm:$0xff] }
 0x232   :  { %v3775_v44 = vpop.eup %3774  ;;  %v2743_v9 = vpack.c.bf16 %v2659_v2, %v2655_v54  ;;  %v2529_v22 = vmul.f32 %v2397_v11, %v1473_v25  ;;  %3786 = vtanh.f32 %v2139_v12  ;;  %v6010_v15 = vadd.f32 %v6802_v56, %v6801_v37  ;;  %v6811_v8 = vld [vmem:[#allocation217_spill] sm:$0xff]  ;;  %v6814_v2 = vld [vmem:[#allocation34_spill] sm:$0xff]  ;;  %v6817_v56 = vld [vmem:[#allocation211_spill] sm:$0xff] }
 0x233   :  { %v3777_v57 = vpop.eup %3776  ;;  %v6014_v47 = vmul.f32 %v6804_v61, %v6803_v59  ;;  %3788 = vtanh.f32 %v2141_v10  ;;  %v2144_v43 = vmul.f32 0.7978846, %v6805_v53  ;;  %v6019_v29 = vadd.f32 %v6807_v39, %v6806_v51  ;;  %v6813_v52 = vld [vmem:[#allocation221_spill] sm:$0xff]  ;;  %v6815_v10 = vld [vmem:[#allocation215_spill] sm:$0xff]  ;;  %v6818_v53 = vld [vmem:[#allocation216_spill] sm:$0xff] }
 0x234   :  { %v2657_v28 = vmul.f32 %v2525_v6, %v6808_v38  ;;  %v2661_v18 = vmul.f32 %v2529_v22, %v6809_v4  ;;  %3142 = vmatprep.mubr.bf16.mxu0 %v2743_v9  ;;  %v2143_v25 = vmul.f32 0.7978846, %v6810_v21  ;;  %v6026_v54 = vadd.f32 %v6812_v42, %v6811_v8  ;;  %v6816_v22 = vld [vmem:[#allocation158_spill] sm:$0xff]  ;;  %v6819_v38 = vld [vmem:[#allocation159_spill] sm:$0xff]  ;;  %v6823_v42 = vld [vmem:[#allocation165_spill] sm:$0xff] }
 0x235   :  { %v6030_v11 = vadd.f32 %v6814_v2, %v6813_v52  ;;  %v6033_v12 = vadd.f32 %v1904_v7, %v6791_v19  ;;  %v6036_v30 = vadd.f32 %v1903_v33, %v6796_v17  ;;  %3143 = vmatmul.mubr.bf16.gmra.mxu0 %v2742_v31  ;;  %v6039_v27 = vadd.f32 %v1905_v40, %v6798_v32  ;;  %v6820_v33 = vld [vmem:[#allocation162_spill] sm:$0xff]  ;;  %v6822_v40 = vld [vmem:[#allocation209_spill] sm:$0xff]  ;;  %v6826_v19 = vld [vmem:[#allocation167_spill] sm:$0xff] }
 0x236   :  { %v2745_v6 = vpack.c.bf16 %v2661_v18, %v2657_v28  ;;  %3790 = vtanh.f32 %v2142_v45  ;;  %v2146_v9 = vmul.f32 0.7978846, %v6815_v10  ;;  %v1474_v0 = vmul.f32 0.5, %v6816_v22  ;;  %v6821_v31 = vld [vmem:[#allocation186_spill] sm:$0xff]  ;;  %v6825_v10 = vld [vmem:[#allocation213_spill] sm:$0xff]  ;;  %v6833_v37 = vld [vmem:[#allocation55_spill] sm:$0xff] }
 0x237   :  { %3792 = vtanh.f32 %v2144_v43  ;;  %v2145_v61 = vmul.f32 0.7978846, %v6817_v56  ;;  %v2148_v39 = vmul.f32 0.7978846, %v6818_v53  ;;  %v1476_v4 = vmul.f32 0.5, %v6819_v38  ;;  %v6824_v43 = vld [vmem:[#allocation187_spill] sm:$0xff] }
 0x238   :  { %v3779_v7 = vpop.eup %3778  ;;  %v1475_v21 = vmul.f32 0.5, %v6820_v33  ;;  %3310 = vmatprep.mubr.bf16.mxu1 %v2745_v6  ;;  %3794 = vtanh.f32 %v2143_v25  ;;  %v1883_v28 = vmul.f32 %v6822_v40, %v6821_v31  ;;  %v2398_v18 = vadd.f32 1.0, %v3775_v44  ;;  %v6827_v33 = vld [vmem:[#allocation168_spill] sm:$0xff]  ;;  %v6831_v8 = vld [vmem:[#allocation177_spill] sm:$0xff] }
 0x239   :  { %v3781_v45 = vpop.eup %3780  ;;  %v1477_v2 = vmul.f32 0.5, %v6823_v42  ;;  %3311 = vmatmul.mubr.bf16.gmra.mxu1 %v2744_v63  ;;  %3796 = vtanh.f32 %v2146_v9  ;;  %v1885_v22 = vmul.f32 %v6825_v10, %v6824_v43  ;;  %v2400_v53 = vadd.f32 1.0, %v3777_v57  ;;  %v6828_v9 = vld [vmem:[#allocation174_spill] sm:$0xff]  ;;  %v6829_v10 = vld [vmem:[#allocation176_spill] sm:$0xff] }
 0x23a   :  { %v3783_v56 = vpop.eup %3782  ;;  %v1478_v38 = vmul.f32 0.5, %v6826_v19  ;;  %3798 = vtanh.f32 %v2148_v39  ;;  %v2015_v6 = vadd.f32 %v1883_v28, %v6821_v31  ;;  %v1480_v52 = vmul.f32 0.5, %v6827_v33 }
 0x23b   :  { %v3785_v25 = vpop.eup %3784  ;;  %v1479_v40 = vmul.f32 0.5, %v6787_v34  ;;  %3800 = vtanh.f32 %v2145_v61  ;;  %v2017_v44 = vadd.f32 %v1885_v22, %v6824_v43  ;;  %v1481_v63 = vmul.f32 0.5, %v6789_v58  ;;  %v6830_v61 = vld [vmem:[#allocation22_spill] sm:$0xff] }
 0x23c   :  { %v6059_v42 = vmul.f32 0.5, %v6828_v9  ;;  %v6062_v57 = vmul.f32 0.5, %v6829_v10  ;;  %v2147_v19 = vmul.f32 0.7978846, %v2015_v6  ;;  %v2530_v39 = vmul.f32 %v2398_v18, %v1474_v0  ;;  %v6832_v9 = vld [vmem:[#allocation220_spill] sm:$0xff] }
 0x23d   :  { %v2399_v5 = vadd.f32 1.0, %v3779_v7  ;;  %v2402_v28 = vadd.f32 1.0, %v3783_v56  ;;  %v2149_v13 = vmul.f32 0.7978846, %v2017_v44  ;;  %v2532_v32 = vmul.f32 %v2400_v53, %v1476_v4  ;;  %v6834_v7 = vld [vmem:[#allocation180_spill] sm:$0xff]  ;;  %v6836_v44 = vld [vmem:[#allocation182_spill] sm:$0xff] }
 0x23e   :  { %v2401_v33 = vadd.f32 1.0, %v3781_v45  ;;  %v2404_v17 = vadd.f32 1.0, %v3785_v25  ;;  %3802 = vtanh.f32 %v2147_v19  ;;  %v2662_v22 = vmul.f32 %v2530_v39, %v6830_v61  ;;  %v6835_v4 = vld [vmem:[#allocation228_spill] sm:$0xff] }
 0x23f   :  { %v3787_v34 = vpop.eup %3786  ;;  %v6066_v58 = vmul.f32 0.5, %v6831_v8  ;;  %3804 = vtanh.f32 %v2149_v13  ;;  %v2150_v51 = vmul.f32 0.7978846, %v6832_v9  ;;  %v2664_v6 = vmul.f32 %v2532_v32, %v6833_v37  ;;  %v6837_v13 = vld [vmem:[#allocation224_spill] sm:$0xff]  ;;  %v6839_v37 = vld [vmem:[#allocation222_spill] sm:$0xff] }
 0x240   :  { %v3789_v10 = vpop.eup %3788  ;;  %v2403_v0 = vadd.f32 1.0, %v3787_v34  ;;  %v6071_v18 = vmul.f32 0.5, %v6834_v7  ;;  %v2154_v45 = vmul.f32 0.7978846, %v6835_v4  ;;  %v2531_v56 = vmul.f32 %v2399_v5, %v1475_v21  ;;  %v6841_v5 = vld [vmem:[#allocation58_spill] sm:$0xff] }
 0x241   :  { %v2534_v53 = vmul.f32 %v2402_v28, %v1478_v38  ;;  %v2405_v25 = vadd.f32 1.0, %v3789_v10  ;;  %v1486_v19 = vmul.f32 0.5, %v6836_v44  ;;  %v2533_v39 = vmul.f32 %v2401_v33, %v1477_v2  ;;  %v6843_v28 = vld [vmem:[#allocation231_spill] sm:$0xff] }
 0x242   :  { %v2536_v8 = vmul.f32 %v2404_v17, %v1480_v52  ;;  %v2535_v61 = vmul.f32 %v2403_v0, %v1479_v40  ;;  %v2151_v23 = vmul.f32 0.7978846, %v6837_v13  ;;  %3806 = vtanh.f32 %v2150_v51  ;;  %v6842_v17 = vld [vmem:[#allocation23_spill] sm:$0xff] }
 0x243   :  { %v3791_v9 = vpop.eup %3790  ;;  %v2666_v35 = vmul.f32 %v2534_v53, %v6838_v55  ;;  %v2537_v32 = vmul.f32 %v2405_v25, %v1481_v63  ;;  %v2152_v34 = vmul.f32 0.7978846, %v6839_v37  ;;  %v2663_v4 = vmul.f32 %v2531_v56, %v6840_v62  ;;  %v6844_v55 = vld [vmem:[#allocation202_spill] sm:$0xff]  ;;  %v6845_v63 = vld [vmem:[#allocation225_spill] sm:$0xff]  ;;  %v6847_v62 = vld [vmem:[#allocation227_spill] sm:$0xff] }
 0x244   :  { %v3793_v7 = vpop.eup %3792  ;;  %v2668_v21 = vmul.f32 %v2536_v8, %v6841_v5  ;;  %v2667_v38 = vmul.f32 %v2535_v61, %v5776_v48  ;;  %3808 = vtanh.f32 %v2154_v45  ;;  %v2665_v52 = vmul.f32 %v2533_v39, %v6842_v17  ;;  %v6846_v53 = vld [vmem:[#allocation185_spill] sm:$0xff] }
 0x245   :  { %v3795_v2 = vpop.eup %3794  ;;  %v2669_v40 = vmul.f32 %v2537_v32, %v5781_v50  ;;  %v2156_v33 = vmul.f32 0.7978846, %v6843_v28  ;;  %v1891_v51 = vmul.f32 %v6845_v63, %v6844_v55  ;;  %v1488_v25 = vmul.f32 0.5, %v6846_v53  ;;  %v6848_v32 = vld [vmem:[#allocation204_spill] sm:$0xff]  ;;  %v6849_v37 = vld [vmem:[#allocation229_spill] sm:$0xff] }
 0x246   :  { %v3797_v10 = vpop.eup %3796  ;;  %v2747_v0 = vpack.c.bf16 %v2667_v38, %v2663_v4  ;;  %3810 = vtanh.f32 %v2151_v23  ;;  %v2153_v56 = vmul.f32 0.7978846, %v6847_v62  ;;  %v2746_v48 = vpack.c.bf16 %v2666_v35, %v2662_v22  ;;  %v6850_v17 = vld [vmem:[#allocation189_spill] sm:$0xff]  ;;  %v6853_v53 = vld [vmem:[#allocation196_spill] sm:$0xff] }
 0x247   :  { %v3799_v44 = vpop.eup %3798  ;;  %v2749_v45 = vpack.c.bf16 %v2669_v40, %v2665_v52  ;;  %3812 = vtanh.f32 %v2152_v34  ;;  %v2023_v39 = vadd.f32 %v1891_v51, %v6844_v55  ;;  %v2748_v50 = vpack.c.bf16 %v2668_v21, %v2664_v6  ;;  %v6852_v63 = vld [vmem:[#allocation193_spill] sm:$0xff] }
 0x248   :  { %v3801_v8 = vpop.eup %3800  ;;  %3150 = vmatprep.mubr.bf16.mxu0 %v2747_v0  ;;  %v1487_v61 = vmul.f32 0.5, %v6821_v31  ;;  %v1489_v13 = vmul.f32 0.5, %v6824_v43  ;;  %v1893_v4 = vmul.f32 %v6849_v37, %v6848_v32  ;;  %v2406_v5 = vadd.f32 1.0, %v3791_v9  ;;  %v6851_v9 = vld [vmem:[#allocation190_spill] sm:$0xff] }
 0x249   :  { %3318 = vmatprep.mubr.bf16.mxu1 %v2749_v45  ;;  %v2410_v23 = vadd.f32 1.0, %v3797_v10  ;;  %3151 = vmatmul.mubr.bf16.gmra.mxu0 %v2746_v48  ;;  %3814 = vtanh.f32 %v2156_v33  ;;  %v2155_v35 = vmul.f32 0.7978846, %v2023_v39  ;;  %v2407_v22 = vadd.f32 1.0, %v3795_v2 }
 0x24a   :  { %v2412_v34 = vadd.f32 1.0, %v3799_v44  ;;  %3319 = vmatmul.mubr.bf16.gmra.mxu1 %v2748_v50  ;;  %3816 = vtanh.f32 %v2153_v56  ;;  %v2025_v6 = vadd.f32 %v1893_v4, %v6848_v32  ;;  %v2408_v38 = vadd.f32 1.0, %v3793_v7  ;;  %v6854_v4 = vld [vmem:[#allocation12_spill] sm:$0xff] }
 0x24b   :  { %v3803_v21 = vpop.eup %3802  ;;  %v2409_v31 = vadd.f32 1.0, %v3801_v8  ;;  %v1490_v43 = vmul.f32 0.5, %v6850_v17  ;;  %3818 = vtanh.f32 %v2155_v35  ;;  %v6096_v28 = vmul.f32 0.5, %v6851_v9  ;;  %v6856_v35 = vld [vmem:[#allocation199_spill] sm:$0xff] }
 0x24c   :  { %v3805_v52 = vpop.eup %3804  ;;  %v2411_v40 = vadd.f32 1.0, %v3803_v21  ;;  %v6099_v33 = vmul.f32 0.5, %v6852_v63  ;;  %v2157_v2 = vmul.f32 0.7978846, %v2025_v6  ;;  %v2538_v51 = vmul.f32 %v2406_v5, %v6059_v42 }
 0x24d   :  { %v2542_v10 = vmul.f32 %v2410_v23, %v1486_v19  ;;  %v2413_v0 = vadd.f32 1.0, %v3805_v52  ;;  %v6103_v62 = vmul.f32 0.5, %v6853_v53  ;;  %v2539_v7 = vmul.f32 %v2407_v22, %v6066_v58  ;;  %v6857_v22 = vld [vmem:[#allocation31_spill] sm:$0xff] }
 0x24e   :  { %v2544_v56 = vmul.f32 %v2412_v34, %v1488_v25  ;;  %v2543_v44 = vmul.f32 %v2411_v40, %v1487_v61  ;;  %3820 = vtanh.f32 %v2157_v2  ;;  %v2540_v48 = vmul.f32 %v2408_v38, %v6062_v57  ;;  %v6858_v38 = vld [vmem:[#allocation200_spill] sm:$0xff] }
 0x24f   :  { %v2541_v45 = vmul.f32 %v2409_v31, %v6071_v18  ;;  %v2674_v39 = vmul.f32 %v2542_v10, %v5801_v24  ;;  %v2545_v8 = vmul.f32 %v2413_v0, %v1489_v13  ;;  %v3807_v50 = vpop.eup %3806  ;;  %v2671_v42 = vmul.f32 %v2539_v7, %v5796_v16  ;;  %v6855_v18 = vld [vmem:[#allocation28_spill] sm:$0xff]  ;;  %v6860_v10 = vld [vmem:[#allocation233_spill] sm:$0xff] }
 0x250   :  { %v2676_v19 = vmul.f32 %v2544_v56, %v5804_v14  ;;  %v2675_v37 = vmul.f32 %v2543_v44, %v5812_v46  ;;  %v2158_v5 = vmul.f32 0.7978846, %v6854_v4  ;;  %v2670_v25 = vmul.f32 %v2538_v51, %v5784_v3  ;;  %v6859_v51 = vld [vmem:[#allocation218_spill] sm:$0xff] }
 0x251   :  { %v3809_v58 = vpop.eup %3808  ;;  %v2673_v61 = vmul.f32 %v2541_v45, %v5798_v1  ;;  %v2677_v57 = vmul.f32 %v2545_v8, %v5819_v36  ;;  %v2160_v23 = vmul.f32 0.7978846, %v6855_v18  ;;  %v2672_v24 = vmul.f32 %v2540_v48, %v5789_v20  ;;  %v6861_v18 = vld [vmem:[#allocation61_spill] sm:$0xff] }
 0x252   :  { %v2751_v13 = vpack.c.bf16 %v2675_v37, %v2671_v42  ;;  %v1494_v16 = vmul.f32 0.5, %v6856_v35  ;;  %v2159_v14 = vmul.f32 0.7978846, %v6857_v22  ;;  %v2750_v46 = vpack.c.bf16 %v2674_v39, %v2670_v25  ;;  %v6864_v22 = vld [vmem:[#allocation63_spill] sm:$0xff] }
 0x253   :  { %v3811_v34 = vpop.eup %3810  ;;  %v2753_v6 = vpack.c.bf16 %v2677_v57, %v2673_v61  ;;  %v2414_v21 = vadd.f32 1.0, %v3807_v50  ;;  %v1496_v31 = vmul.f32 0.5, %v6858_v38  ;;  %v2752_v17 = vpack.c.bf16 %v2676_v19, %v2672_v24 }
 0x254   :  { %v3813_v3 = vpop.eup %3812  ;;  %3158 = vmatprep.mubr.bf16.mxu0 %v2751_v13  ;;  %v2418_v1 = vadd.f32 1.0, %v3809_v58  ;;  %3822 = vtanh.f32 %v2158_v5  ;;  %v2162_v36 = vmul.f32 0.7978846, %v6019_v29  ;;  %v1495_v20 = vmul.f32 0.5, %v6844_v55 }
 0x255   :  { %3326 = vmatprep.mubr.bf16.mxu1 %v2753_v6  ;;  %3159 = vmatmul.mubr.bf16.gmra.mxu0 %v2750_v46  ;;  %3824 = vtanh.f32 %v2160_v23  ;;  %v2161_v52 = vmul.f32 0.7978846, %v6010_v15  ;;  %v2164_v40 = vmul.f32 0.7978846, %v6026_v54  ;;  %v2415_v63 = vadd.f32 1.0, %v3811_v34 }
 0x256   :  { %v3815_v9 = vpop.eup %3814  ;;  %3327 = vmatmul.mubr.bf16.gmra.mxu1 %v2752_v17  ;;  %v1497_v2 = vmul.f32 0.5, %v6848_v32  ;;  %3826 = vtanh.f32 %v2159_v14  ;;  %v1899_v0 = vmul.f32 %v6860_v10, %v6859_v51  ;;  %v2546_v29 = vmul.f32 %v2414_v21, %v1490_v43 }
 0x257   :  { %v3817_v53 = vpop.eup %3816  ;;  %v2416_v7 = vadd.f32 1.0, %v3813_v3  ;;  %3828 = vtanh.f32 %v2162_v36  ;;  %v1901_v55 = vmul.f32 %v6014_v47, %v6803_v59  ;;  %v2550_v15 = vmul.f32 %v2418_v1, %v1494_v16 }
 0x258   :  { %v3819_v56 = vpop.eup %3818  ;;  %3830 = vtanh.f32 %v2164_v40  ;;  %v2031_v54 = vadd.f32 %v1899_v0, %v6859_v51  ;;  %v2166_v44 = vmul.f32 0.7978846, %v6030_v11  ;;  %v2420_v48 = vadd.f32 1.0, %v3815_v9 }
 0x259   :  { %v2419_v32 = vadd.f32 1.0, %v3819_v56  ;;  %3832 = vtanh.f32 %v2161_v52  ;;  %v2033_v45 = vadd.f32 %v1901_v55, %v6803_v59  ;;  %v2547_v39 = vmul.f32 %v2415_v63, %v6099_v33  ;;  %v6865_v52 = vld [vmem:[#allocation206_spill] sm:$0xff] }
 0x25a   :  { %v2417_v43 = vadd.f32 1.0, %v3817_v53  ;;  %v2163_v8 = vmul.f32 0.7978846, %v2031_v54  ;;  %v2167_v50 = vmul.f32 0.7978846, %v6036_v30  ;;  %v2682_v47 = vmul.f32 %v2550_v15, %v5842_v26  ;;  %v6867_v53 = vld [vmem:[#allocation210_spill] sm:$0xff] }
 0x25b   :  { %v3821_v42 = vpop.eup %3820  ;;  %v2551_v19 = vmul.f32 %v2419_v32, %v1495_v20  ;;  %v2165_v37 = vmul.f32 0.7978846, %v2033_v45  ;;  %3834 = vtanh.f32 %v2166_v44  ;;  %v2168_v11 = vmul.f32 0.7978846, %v6033_v12  ;;  %v6862_v12 = vld [vmem:[#allocation37_spill] sm:$0xff]  ;;  %v6868_v54 = vld [vmem:[#allocation212_spill] sm:$0xff] }
 0x25c   :  { %v2421_v4 = vadd.f32 1.0, %v3821_v42  ;;  %3836 = vtanh.f32 %v2163_v8  ;;  %v2169_v5 = vmul.f32 0.7978846, %v6039_v27  ;;  %v2679_v58 = vmul.f32 %v2547_v39, %v5834_v60  ;;  %v6863_v60 = vld [vmem:[#allocation26_spill] sm:$0xff] }
 0x25d   :  { %v2552_v25 = vmul.f32 %v2420_v48, %v1496_v31  ;;  %v2683_v33 = vmul.f32 %v2551_v19, %v5853_v41  ;;  %3838 = vtanh.f32 %v2165_v37  ;;  %v2678_v30 = vmul.f32 %v2546_v29, %v5823_v49  ;;  %v6869_v48 = vld [vmem:[#allocation214_spill] sm:$0xff] }
 0x25e   :  { %v2549_v61 = vmul.f32 %v2417_v43, %v6103_v62  ;;  %v2553_v26 = vmul.f32 %v2421_v4, %v1497_v2  ;;  %3840 = vtanh.f32 %v2167_v50  ;;  %v2548_v57 = vmul.f32 %v2416_v7, %v6096_v28  ;;  %v6866_v2 = vld [vmem:[#allocation208_spill] sm:$0xff]  ;;  %v6870_v50 = vld [vmem:[#allocation217_spill] sm:$0xff] }
 0x25f   :  { %v2684_v23 = vmul.f32 %v2552_v25, %v6861_v18  ;;  %v2755_v24 = vpack.c.bf16 %v2683_v33, %v2679_v58  ;;  %3842 = vtanh.f32 %v2169_v5  ;;  %v2754_v13 = vpack.c.bf16 %v2682_v47, %v2678_v30  ;;  %v6872_v58 = vld [vmem:[#allocation230_spill] sm:$0xff]  ;;  %v6873_v30 = vld [vmem:[#allocation27_spill] sm:$0xff] }
 0x260   :  { %v2681_v27 = vmul.f32 %v2549_v61, %v6862_v12  ;;  %v2685_v35 = vmul.f32 %v2553_v26, %v6863_v60  ;;  %3844 = vtanh.f32 %v2168_v11  ;;  %v3056_v41 = vpop.f32.mrf.mxu0  ;;  %v2680_v49 = vmul.f32 %v2548_v57, %v6864_v22  ;;  %v6871_v11 = vld [vmem:[#allocation226_spill] sm:$0xff] }
 0x261   :  { %v3823_v16 = vpop.eup %3822  ;;  %3166 = vmatprep.mubr.bf16.mxu0 %v2755_v24  ;;  %v3224_v62 = vpop.f32.mrf.mxu1  ;;  %v1498_v40 = vmul.f32 0.5, %v6865_v52  ;;  %v1500_v10 = vmul.f32 0.5, %v6866_v2  ;;  %v1499_v29 = vmul.f32 0.5, %v6867_v53  ;;  %v1501_v44 = vmul.f32 0.5, %v6868_v54  ;;  %v6875_v22 = vld [vmem:[#allocation38_spill] sm:$0xff]  ;;  %v6884_v54 = vld [vmem:[#allocation223_spill] sm:$0xff] }
 0x262   :  { %v3825_v14 = vpop.eup %3824  ;;  %v2757_v34 = vpack.c.bf16 %v2685_v35, %v2681_v27  ;;  %3167 = vmatmul.mubr.bf16.gmra.mxu0 %v2754_v13  ;;  %v3225_v28 = vadd.f32 %v3224_v62, %v3056_v41  ;;  %v3058_v46 = vpop.f32.mrf.mxu0  ;;  %v2756_v21 = vpack.c.bf16 %v2684_v23, %v2680_v49  ;;  %v2422_v1 = vadd.f32 1.0, %v3823_v16  ;;  %v6874_v35 = vld [vmem:[#allocation33_spill] sm:$0xff]  ;;  %v6876_v62 = vld [vmem:[#allocation35_spill] sm:$0xff] }
 0x263   :  { %v3827_v6 = vpop.eup %3826  ;;  %v3226_v38 = vpop.f32.mrf.mxu1  ;;  %v2424_v0 = vadd.f32 1.0, %v3825_v14  ;;  %v1502_v32 = vmul.f32 0.5, %v6869_v48  ;;  %v1504_v42 = vmul.f32 0.5, %v6870_v50  ;;  %v1503_v47 = vmul.f32 0.5, %v6859_v51 }
 0x264   :  { %v3829_v31 = vpop.eup %3828  ;;  %3334 = vmatprep.mubr.bf16.mxu1 %v2757_v34  ;;  %3358 = vst [vmem:[#allocation8] sm:$0xff] %v3225_v28  ;;  %v3059_v3 = vpop.f32.mrf.mxu0  ;;  %v2423_v15 = vadd.f32 1.0, %v3827_v6  ;;  %v2554_v43 = vmul.f32 %v2422_v1, %v1498_v40  ;;  %v1505_v4 = vmul.f32 0.5, %v6803_v59  ;;  %v1507_v5 = vmul.f32 0.5, %v6871_v11  ;;  %v6877_v34 = vld [vmem:[#allocation36_spill] sm:$0xff]  ;;  %v6878_v6 = vld [vmem:[#allocation65_spill] sm:$0xff] }
 0x265   :  { %v3831_v17 = vpop.eup %3830  ;;  %3335 = vmatmul.mubr.bf16.gmra.mxu1 %v2756_v21  ;;  %v3227_v36 = vpop.f32.mrf.mxu1  ;;  %v2426_v7 = vadd.f32 1.0, %v3829_v31  ;;  %v1509_v25 = vmul.f32 0.5, %v6872_v58  ;;  %v2556_v26 = vmul.f32 %v2424_v0, %v1500_v10  ;;  %v6879_v38 = vld [vmem:[#allocation41_spill] sm:$0xff]  ;;  %v6880_v1 = vld [vmem:[#allocation30_spill] sm:$0xff] }
 0x266   :  { %v3833_v20 = vpop.eup %3832  ;;  %v3228_v9 = vadd.f32 %v3227_v36, %v3059_v3  ;;  %v3061_v63 = vpop.f32.mrf.mxu0  ;;  %v2428_v45 = vadd.f32 1.0, %v3831_v17  ;;  %v2686_v61 = vmul.f32 %v2554_v43, %v6873_v30  ;;  %v2555_v24 = vmul.f32 %v2423_v15, %v1499_v29  ;;  %v6881_v40 = vld [vmem:[#allocation73_spill] sm:$0xff] }
 0x267   :  { %v3229_v55 = vpop.f32.mrf.mxu1  ;;  %v2425_v8 = vadd.f32 1.0, %v3833_v20  ;;  %v2558_v57 = vmul.f32 %v2426_v7, %v1502_v32  ;;  %v2688_v36 = vmul.f32 %v2556_v26, %v6880_v1  ;;  %v6882_v0 = vld [vmem:[#allocation221_spill] sm:$0xff] }
 0x268   :  { %v3835_v56 = vpop.eup %3834  ;;  %3359 = vst [vmem:[#allocation8 + $0x8] sm:$0xff] %v3228_v9  ;;  %v2560_v12 = vmul.f32 %v2428_v45, %v1504_v42  ;;  %v2687_v49 = vmul.f32 %v2555_v24, %v6875_v22  ;;  %v1506_v53 = vmul.f32 0.5, %v6882_v0  ;;  %v6883_v29 = vld [vmem:[#allocation77_spill] sm:$0xff]  ;;  %v6885_v42 = vld [vmem:[#allocation71_spill] sm:$0xff] }
 0x269   :  { %v3837_v39 = vpop.eup %3836  ;;  %v2557_v60 = vmul.f32 %v2425_v8, %v1501_v44  ;;  %v2690_v41 = vmul.f32 %v2558_v57, %v6874_v35  ;;  %v2430_v3 = vadd.f32 1.0, %v3835_v56  ;;  %v1508_v44 = vmul.f32 0.5, %v6884_v54 }
 0x26a   :  { %v3839_v19 = vpop.eup %3838  ;;  %v2427_v37 = vadd.f32 1.0, %v3837_v39  ;;  %v2692_v14 = vmul.f32 %v2560_v12, %v6876_v62 }
 0x26b   :  { %v3841_v33 = vpop.eup %3840  ;;  %v2429_v18 = vadd.f32 1.0, %v3839_v19  ;;  %v2689_v21 = vmul.f32 %v2557_v60, %v6878_v6  ;;  %v2758_v2 = vpack.c.bf16 %v2690_v41, %v2686_v61  ;;  %v2562_v45 = vmul.f32 %v2430_v3, %v1506_v53 }
 0x26c   :  { %v3843_v23 = vpop.eup %3842  ;;  %v2559_v27 = vmul.f32 %v2427_v37, %v1503_v47  ;;  %v2431_v13 = vadd.f32 1.0, %v3841_v33  ;;  %v2760_v15 = vpack.c.bf16 %v2692_v14, %v2688_v36  ;;  %v6886_v37 = vld [vmem:[#allocation44_spill] sm:$0xff] }
 0x26d   :  { %v3845_v51 = vpop.eup %3844  ;;  %v2561_v59 = vmul.f32 %v2429_v18, %v1505_v4  ;;  %v2433_v16 = vadd.f32 1.0, %v3843_v23  ;;  %v2694_v47 = vmul.f32 %v2562_v45, %v6885_v42 }
 0x26e   :  { %v2691_v28 = vmul.f32 %v2559_v27, %v6877_v34  ;;  %v2563_v46 = vmul.f32 %v2431_v13, %v1507_v5  ;;  %v2432_v52 = vadd.f32 1.0, %v3845_v51 }
 0x26f   :  { %v2693_v31 = vmul.f32 %v2561_v59, %v6879_v38  ;;  %v2565_v17 = vmul.f32 %v2433_v16, %v1509_v25  ;;  %v2762_v25 = vpack.c.bf16 %v2694_v47, %v2694_v47 }
 0x270   :  { %v2759_v20 = vpack.c.bf16 %v2691_v28, %v2687_v49  ;;  %v2695_v9 = vmul.f32 %v2563_v46, %v6881_v40  ;;  %v2564_v8 = vmul.f32 %v2432_v52, %v1508_v44 }
 0x271   :  { %v3064_v63 = vpop.f32.mrf.mxu0  ;;  %v2761_v10 = vpack.c.bf16 %v2693_v31, %v2689_v21  ;;  %v2697_v7 = vmul.f32 %v2565_v17, %v6883_v29 }
 0x272   :  { %v3232_v55 = vpop.f32.mrf.mxu1  ;;  %v2763_v48 = vpack.c.bf16 %v2695_v9, %v2695_v9  ;;  %3174 = vmatprep.mubr.bf16.mxu0 %v2759_v20  ;;  %v2696_v4 = vmul.f32 %v2564_v8, %v6886_v37 }
 0x273   :  { %v3233_v56 = vadd.f32 %v3232_v55, %v3064_v63  ;;  %v3066_v32 = vpop.f32.mrf.mxu0  ;;  %v2765_v39 = vpack.c.bf16 %v2697_v7, %v2697_v7  ;;  %3342 = vmatprep.mubr.bf16.mxu1 %v2761_v10  ;;  %3175 = vmatmul.mubr.bf16.gmra.mxu0 %v2758_v2 }
 0x274   :  { %v3234_v43 = vpop.f32.mrf.mxu1  ;;  %3343 = vmatmul.mubr.bf16.gmra.mxu1 %v2760_v15  ;;  %3182 = vmatprep.mubr.bf16.mxu0 %v2763_v48  ;;  %v2764_v33 = vpack.c.bf16 %v2696_v4, %v2696_v4 }
 0x275   :  { %3360 = vst [vmem:[#allocation8 + $0x10] sm:$0xff] %v3233_v56  ;;  %v3067_v50 = vpop.f32.mrf.mxu0  ;;  %3350 = vmatprep.mubr.bf16.mxu1 %v2765_v39 }
 0x276   :  { %v3235_v19 = vpop.f32.mrf.mxu1 }
 0x277   :  { %v3236_v11 = vadd.f32 %v3235_v19, %v3067_v50  ;;  %v3069_v5 = vpop.f32.mrf.mxu0 }
 0x278   :  { %v3237_v58 = vpop.f32.mrf.mxu1 }
 0x279   :  { %3361 = vst [vmem:[#allocation8 + $0x18] sm:$0xff] %v3236_v11 }
 0x27a   :  { %v3072_v30 = vpop.f32.mrf.mxu0 }
 0x27b   :  { %3183 = vmatmul.mubr.bf16.gmra.mxu0 %v2762_v25 }
 0x27c   :  { %3351 = vmatmul.mubr.bf16.gmra.mxu1 %v2764_v33  ;;  %v3240_v61 = vpop.f32.mrf.mxu1  ;;  %v3074_v57 = vpop.f32.mrf.mxu0 }
 0x27d   :  { %v3241_v26 = vadd.f32 %v3240_v61, %v3072_v30 }
 0x27e   :  { %v3242_v18 = vpop.f32.mrf.mxu1  ;;  %v3075_v23 = vpop.f32.mrf.mxu0 }
 0x27f   :  { %3362 = vst [vmem:[#allocation8 + $0x20] sm:$0xff] %v3241_v26 }
 0x280   :  { %v3243_v24 = vpop.f32.mrf.mxu1  ;;  %v3077_v27 = vpop.f32.mrf.mxu0 }
 0x281   :  { %v3244_v12 = vadd.f32 %v3243_v24, %v3075_v23 }
 0x282   :  { %v3245_v13 = vpop.f32.mrf.mxu1 }
 0x283   :  { %3363 = vst [vmem:[#allocation8 + $0x28] sm:$0xff] %v3244_v12 }
 0x286   :  { %v3080_v51 = vpop.f32.mrf.mxu0 }
 0x288   :  { %v3082_v60 = vpop.f32.mrf.mxu0 }
 0x28a   :  { %v3083_v41 = vpop.f32.mrf.mxu0 }
 0x28b   :  { %v3248_v35 = vpop.f32.mrf.mxu1 }
 0x28c   :  { %v3249_v59 = vadd.f32 %v3248_v35, %v3080_v51  ;;  %v3085_v22 = vpop.f32.mrf.mxu0 }
 0x28d   :  { %v3250_v16 = vpop.f32.mrf.mxu1 }
 0x28e   :  { %3364 = vst [vmem:[#allocation8 + $0x30] sm:$0xff] %v3249_v59 }
 0x28f   :  { %v3251_v49 = vpop.f32.mrf.mxu1 }
 0x290   :  { %v3252_v62 = vadd.f32 %v3251_v49, %v3083_v41 }
 0x291   :  { %v3253_v14 = vpop.f32.mrf.mxu1 }
 0x292   :  { %3365 = vst [vmem:[#allocation8 + $0x38] sm:$0xff] %v3252_v62 }
 0x297   :  { %v3088_v34 = vpop.f32.mrf.mxu0 }
 0x298   :  { %v3256_v28 = vpop.f32.mrf.mxu1 }
 0x299   :  { %v3257_v46 = vadd.f32 %v3256_v28, %v3088_v34  ;;  %v3090_v6 = vpop.f32.mrf.mxu0 }
 0x29a   :  { %v3258_v21 = vpop.f32.mrf.mxu1 }
 0x29b   :  { %3366 = vst [vmem:[#allocation8 + $0x40] sm:$0xff] %v3257_v46  ;;  %v3091_v38 = vpop.f32.mrf.mxu0 }
 0x29c   :  { %v3259_v31 = vpop.f32.mrf.mxu1 }
 0x29d   :  { %v3260_v3 = vadd.f32 %v3259_v31, %v3091_v38  ;;  %v3093_v17 = vpop.f32.mrf.mxu0 }
 0x29e   :  { %v3261_v1 = vpop.f32.mrf.mxu1 }
 0x29f   :  { %3367 = vst [vmem:[#allocation8 + $0x48] sm:$0xff] %v3260_v3 }
 0x2a1   :  { %v3096_v36 = vpop.f32.mrf.mxu0 }
 0x2a2   :  { %v3264_v20 = vpop.f32.mrf.mxu1 }
 0x2a3   :  { %v3265_v52 = vadd.f32 %v3264_v20, %v3096_v36  ;;  %v3098_v40 = vpop.f32.mrf.mxu0 }
 0x2a4   :  { %v3266_v9 = vpop.f32.mrf.mxu1 }
 0x2a5   :  { %3368 = vst [vmem:[#allocation8 + $0x50] sm:$0xff] %v3265_v52  ;;  %v3099_v63 = vpop.f32.mrf.mxu0 }
 0x2a6   :  { %v3267_v2 = vpop.f32.mrf.mxu1 }
 0x2a7   :  { %v3268_v10 = vadd.f32 %v3267_v2, %v3099_v63  ;;  %v3101_v0 = vpop.f32.mrf.mxu0 }
 0x2a8   :  { %v3269_v53 = vpop.f32.mrf.mxu1 }
 0x2a9   :  { %3369 = vst [vmem:[#allocation8 + $0x58] sm:$0xff] %v3268_v10 }
 0x2b4   :  { %v3104_v29 = vpop.f32.mrf.mxu0 }
 0x2b5   :  { %v3272_v7 = vpop.f32.mrf.mxu1 }
 0x2b6   :  { %v3273_v55 = vadd.f32 %v3272_v7, %v3104_v29  ;;  %v3106_v15 = vpop.f32.mrf.mxu0 }
 0x2b7   :  { %v3274_v54 = vpop.f32.mrf.mxu1 }
 0x2b8   :  { %3370 = vst [vmem:[#allocation8 + $0x60] sm:$0xff] %v3273_v55  ;;  %v3107_v44 = vpop.f32.mrf.mxu0 }
 0x2b9   :  { %v3275_v48 = vpop.f32.mrf.mxu1 }
 0x2ba   :  { %v3276_v56 = vadd.f32 %v3275_v48, %v3107_v44  ;;  %v3109_v32 = vpop.f32.mrf.mxu0 }
 0x2bb   :  { %v3277_v45 = vpop.f32.mrf.mxu1 }
 0x2bc   :  { %3371 = vst [vmem:[#allocation8 + $0x68] sm:$0xff] %v3276_v56 }
 0x2c2   :  { %v3112_v39 = vpop.f32.mrf.mxu0 }
 0x2c3   :  { %v3280_v43 = vpop.f32.mrf.mxu1 }
 0x2c4   :  { %v3281_v8 = vadd.f32 %v3280_v43, %v3112_v39  ;;  %v3114_v50 = vpop.f32.mrf.mxu0 }
 0x2c5   :  { %v3282_v42 = vpop.f32.mrf.mxu1 }
 0x2c6   :  { %3372 = vst [vmem:[#allocation8 + $0x70] sm:$0xff] %v3281_v8  ;;  %v3115_v47 = vpop.f32.mrf.mxu0 }
 0x2c7   :  { %v3283_v19 = vpop.f32.mrf.mxu1 }
 0x2c8   :  { %v3284_v37 = vadd.f32 %v3283_v19, %v3115_v47  ;;  %v3117_v4 = vpop.f32.mrf.mxu0 }
 0x2c9   :  { %v3285_v11 = vpop.f32.mrf.mxu1 }
 0x2ca   :  { %3373 = vst [vmem:[#allocation8 + $0x78] sm:$0xff] %v3284_v37 }
 0x2cb   :  { %v3120_v5 = vpop.f32.mrf.mxu0 }
 0x2cd   :  { %v3288_v58 = vpop.f32.mrf.mxu1  ;;  %v3122_v25 = vpop.f32.mrf.mxu0 }
 0x2ce   :  { %v3289_v33 = vadd.f32 %v3288_v58, %v3120_v5 }
 0x2cf   :  { %v3290_v30 = vpop.f32.mrf.mxu1  ;;  %v3123_v61 = vpop.f32.mrf.mxu0 }
 0x2d0   :  { %3374 = vst [vmem:[#allocation8 + $0x80] sm:$0xff] %v3289_v33 }
 0x2d1   :  { %v3291_v26 = vpop.f32.mrf.mxu1  ;;  %v3125_v57 = vpop.f32.mrf.mxu0 }
 0x2d2   :  { %v3292_v18 = vadd.f32 %v3291_v26, %v3123_v61 }
 0x2d3   :  { %v3293_v23 = vpop.f32.mrf.mxu1 }
 0x2d4   :  { %3375 = vst [vmem:[#allocation8 + $0x88] sm:$0xff] %v3292_v18 }
 0x2df   :  { %v3128_v24 = vpop.f32.mrf.mxu0 }
 0x2e0   :  { %v3296_v12 = vpop.f32.mrf.mxu1 }
 0x2e1   :  { %v3297_v27 = vadd.f32 %v3296_v12, %v3128_v24  ;;  %v3130_v13 = vpop.f32.mrf.mxu0 }
 0x2e2   :  { %v3298_v51 = vpop.f32.mrf.mxu1 }
 0x2e3   :  { %3376 = vst [vmem:[#allocation8 + $0x90] sm:$0xff] %v3297_v27  ;;  %v3131_v60 = vpop.f32.mrf.mxu0 }
 0x2e4   :  { %v3299_v35 = vpop.f32.mrf.mxu1 }
 0x2e5   :  { %v3300_v41 = vadd.f32 %v3299_v35, %v3131_v60  ;;  %v3133_v59 = vpop.f32.mrf.mxu0 }
 0x2e6   :  { %v3301_v16 = vpop.f32.mrf.mxu1 }
 0x2e7   :  { %3377 = vst [vmem:[#allocation8 + $0x98] sm:$0xff] %v3300_v41 }
 0x2ec   :  { %v3136_v22 = vpop.f32.mrf.mxu0 }
 0x2ed   :  { %v3304_v49 = vpop.f32.mrf.mxu1 }
 0x2ee   :  { %v3305_v62 = vadd.f32 %v3304_v49, %v3136_v22  ;;  %v3138_v14 = vpop.f32.mrf.mxu0 }
 0x2ef   :  { %v3306_v34 = vpop.f32.mrf.mxu1 }
 0x2f0   :  { %3378 = vst [vmem:[#allocation8 + $0xa0] sm:$0xff] %v3305_v62  ;;  %v3139_v28 = vpop.f32.mrf.mxu0 }
 0x2f1   :  { %v3307_v46 = vpop.f32.mrf.mxu1 }
 0x2f2   :  { %v3308_v6 = vadd.f32 %v3307_v46, %v3139_v28  ;;  %v3141_v21 = vpop.f32.mrf.mxu0 }
 0x2f3   :  { %v3309_v38 = vpop.f32.mrf.mxu1 }
 0x2f4   :  { %3379 = vst [vmem:[#allocation8 + $0xa8] sm:$0xff] %v3308_v6 }
 0x2f5   :  { %v3144_v31 = vpop.f32.mrf.mxu0 }
 0x2f7   :  { %v3146_v3 = vpop.f32.mrf.mxu0 }
 0x2f9   :  { %v3312_v17 = vpop.f32.mrf.mxu1  ;;  %v3147_v1 = vpop.f32.mrf.mxu0 }
 0x2fa   :  { %v3313_v36 = vadd.f32 %v3312_v17, %v3144_v31 }
 0x2fb   :  { %v3314_v20 = vpop.f32.mrf.mxu1  ;;  %v3149_v52 = vpop.f32.mrf.mxu0 }
 0x2fc   :  { %3380 = vst [vmem:[#allocation8 + $0xb0] sm:$0xff] %v3313_v36 }
 0x2fd   :  { %v3315_v40 = vpop.f32.mrf.mxu1 }
 0x2fe   :  { %v3316_v9 = vadd.f32 %v3315_v40, %v3147_v1 }
 0x2ff   :  { %v3317_v63 = vpop.f32.mrf.mxu1 }
 0x300   :  { %3381 = vst [vmem:[#allocation8 + $0xb8] sm:$0xff] %v3316_v9 }
 0x309   :  { %v3152_v2 = vpop.f32.mrf.mxu0 }
 0x30a   :  { %v3320_v10 = vpop.f32.mrf.mxu1 }
 0x30b   :  { %v3321_v0 = vadd.f32 %v3320_v10, %v3152_v2  ;;  %v3154_v53 = vpop.f32.mrf.mxu0 }
 0x30c   :  { %v3322_v29 = vpop.f32.mrf.mxu1 }
 0x30d   :  { %3382 = vst [vmem:[#allocation8 + $0xc0] sm:$0xff] %v3321_v0  ;;  %v3155_v7 = vpop.f32.mrf.mxu0 }
 0x30e   :  { %v3323_v55 = vpop.f32.mrf.mxu1 }
 0x30f   :  { %v3324_v15 = vadd.f32 %v3323_v55, %v3155_v7  ;;  %v3157_v54 = vpop.f32.mrf.mxu0 }
 0x310   :  { %v3325_v44 = vpop.f32.mrf.mxu1 }
 0x311   :  { %3383 = vst [vmem:[#allocation8 + $0xc8] sm:$0xff] %v3324_v15 }
 0x315   :  { %v3160_v48 = vpop.f32.mrf.mxu0 }
 0x316   :  { %v3328_v56 = vpop.f32.mrf.mxu1 }
 0x317   :  { %v3329_v32 = vadd.f32 %v3328_v56, %v3160_v48  ;;  %v3162_v45 = vpop.f32.mrf.mxu0 }
 0x318   :  { %v3330_v39 = vpop.f32.mrf.mxu1 }
 0x319   :  { %3384 = vst [vmem:[#allocation8 + $0xd0] sm:$0xff] %v3329_v32  ;;  %v3163_v43 = vpop.f32.mrf.mxu0 }
 0x31a   :  { %v3331_v8 = vpop.f32.mrf.mxu1 }
 0x31b   :  { %v3332_v50 = vadd.f32 %v3331_v8, %v3163_v43  ;;  %v3165_v42 = vpop.f32.mrf.mxu0 }
 0x31c   :  { %v3333_v47 = vpop.f32.mrf.mxu1 }
 0x31d   :  { %3385 = vst [vmem:[#allocation8 + $0xd8] sm:$0xff] %v3332_v50 }
 0x322   :  { %v3168_v19 = vpop.f32.mrf.mxu0 }
 0x324   :  { %v3170_v37 = vpop.f32.mrf.mxu0 }
 0x325   :  { %v3336_v4 = vpop.f32.mrf.mxu1 }
 0x326   :  { %v3337_v11 = vadd.f32 %v3336_v4, %v3168_v19  ;;  %v3171_v5 = vpop.f32.mrf.mxu0 }
 0x327   :  { %v3338_v58 = vpop.f32.mrf.mxu1 }
 0x328   :  { %3386 = vst [vmem:[#allocation8 + $0xe0] sm:$0xff] %v3337_v11  ;;  %v3173_v25 = vpop.f32.mrf.mxu0 }
 0x329   :  { %v3339_v33 = vpop.f32.mrf.mxu1 }
 0x32a   :  { %v3340_v30 = vadd.f32 %v3339_v33, %v3171_v5 }
 0x32b   :  { %v3341_v61 = vpop.f32.mrf.mxu1 }
 0x32c   :  { %3387 = vst [vmem:[#allocation8 + $0xe8] sm:$0xff] %v3340_v30 }
 0x333   :  { %v3176_v26 = vpop.f32.mrf.mxu0 }
 0x334   :  { %v3344_v57 = vpop.f32.mrf.mxu1 }
 0x335   :  { %v3345_v18 = vadd.f32 %v3344_v57, %v3176_v26  ;;  %v3178_v23 = vpop.f32.mrf.mxu0 }
 0x336   :  { %v3346_v24 = vpop.f32.mrf.mxu1 }
 0x337   :  { %3388 = vst [vmem:[#allocation8 + $0xf0] sm:$0xff] %v3345_v18  ;;  %v3179_v12 = vpop.f32.mrf.mxu0 }
 0x338   :  { %v3347_v27 = vpop.f32.mrf.mxu1 }
 0x339   :  { %v3348_v13 = vadd.f32 %v3347_v27, %v3179_v12  ;;  %v3181_v51 = vpop.f32.mrf.mxu0 }
 0x33a   :  { %v3349_v60 = vpop.f32.mrf.mxu1 }
 0x33b   :  { %3389 = vst [vmem:[#allocation8 + $0xf8] sm:$0xff] %v3348_v13  ;;  %v3184_v35 = vpop.f32.mrf.mxu0 }
 0x33c   :  { %v3352_v41 = vpop.f32.mrf.mxu1 }
 0x33d   :  { %v3353_v59 = vadd.f32 %v3352_v41, %v3184_v35  ;;  %v3186_v16 = vpop.f32.mrf.mxu0 }
 0x33e   :  { %v3354_v22 = vpop.f32.mrf.mxu1 }
 0x33f   :  { %3390 = vst [vmem:[#allocation8 + $0x100] sm:$0xff] %v3353_v59  ;;  %v3187_v49 = vpop.f32.mrf.mxu0 }
 0x340   :  { %v3355_v62 = vpop.f32.mrf.mxu1 }
 0x341   :  { %3917 = shalt.err (!%p3914_p5)
}
 0x342   :  { %s3941_s4 = smov 128   ;;  %s3942_s5 = smov 8   ;;  %v3188_v14 = vpop.f32.mrf.mxu0  ;;  %v3356_v34 = vpop.f32.mrf.mxu1 }
 0x343   :  { %3402 = dma.vmem_to_hbm [thread:$0]  %s3397_s2, 4224, %s6177_s3, [#allocation4], %s3941_s4, %s3941_s4, %s3942_s5  }
 0x344   :  { %3930 = dma.done.wait [#allocation4], 4224  }
 0x345   :  { %3931 = vsyncadd [#allocation4], 4294963072 }
 0x346   :  { %3406 = vsyncpa [#allocation3], 1 }
 0x347   :  { %3407 = vsyncpa [#allocation6], 1 }
 0x348   :  { %3408 = vsyncpa [#allocation4], 1 }

</bundles_post_ra>
